<compile_context>
chip_gen: v6e
topology: v6e:2x2x1
jax: 0.10.0
libtpu: 0.0.40
codegen_flags: <defaults>
</compile_context>

<pallas_src>
import jax
import jax.numpy as jnp
from jax.experimental import pallas as pl
from jax.experimental.pallas import tpu as pltpu


# ----------------------- fused BiLSTM encoder kernel -------------------------
def _bilstm_kernel(x_ref, wih_ref, whh_ref, b_ref, out_ref, gxf_ref, gxb_ref):
    """x_ref: (T, N, H) time-major input.
    wih_ref: (H, 4H) = [W_ih_fwd | W_ih_bwd] (per-direction gate order i,f,g,o).
    whh_ref: (Hd, 4H) = [W_hh_fwd | W_hh_bwd].
    b_ref:   (1, 4H)  = [b_fwd | b_bwd] (b_ih + b_hh already summed).
    out_ref: (T, N, H) bidirectional hidden states ([..., :Hd]=fwd, [..., Hd:]=bwd).
    """
    T, N, H = x_ref.shape
    Hd = H // 2
    G = 2 * H  # per-direction gate width (4 * Hd)

    # ---- hoisted input projection: one big MXU GEMM for both directions ----
    x2d = x_ref[...].reshape(T * N, H)
    gx = jnp.dot(x2d, wih_ref[...], preferred_element_type=jnp.float32) + b_ref[...]
    gxf_ref[...] = gx[:, :G].reshape(T, N, G)   # forward gates, natural time order
    gxb_ref[...] = gx[:, G:].reshape(T, N, G)   # backward gates, natural time order

    whh = whh_ref[...]                           # hoisted out of the loop

    def body(t, carry):
        h, c = carry                             # (2N, Hd): rows [:N]=fwd, [N:]=bwd
        tb = T - 1 - t
        # single recurrence matmul for both directions
        hw = jnp.dot(h, whh, preferred_element_type=jnp.float32)     # (2N, 4H)
        gates = jnp.concatenate(
            [gxf_ref[t] + hw[:N, :G],            # forward gates at time t
             gxb_ref[tb] + hw[N:, G:]], axis=0)  # backward gates at time T-1-t
        # PyTorch LSTM gate order: i, f, g, o (both directions processed together)
        i_g = jax.nn.sigmoid(gates[:, 0 * Hd:1 * Hd])
        f_g = jax.nn.sigmoid(gates[:, 1 * Hd:2 * Hd])
        g_g = jnp.tanh(gates[:, 2 * Hd:3 * Hd])
        o_g = jax.nn.sigmoid(gates[:, 3 * Hd:4 * Hd])
        c_new = f_g * c + i_g * g_g
        h_new = o_g * jnp.tanh(c_new)
        out_ref[t, :, :Hd] = h_new[:N]           # forward output at time t
        out_ref[tb, :, Hd:] = h_new[N:]          # backward output at time T-1-t
        return (h_new, c_new)

    zeros = jnp.zeros((2 * N, Hd), jnp.float32)
    jax.lax.fori_loop(0, T, body, (zeros, zeros), unroll=bool(T <= 32))


def bilstm_encoder(x, p, *, block_n=128):
    """x: (N, T, H) -> bidirectional per-token hidden states (N, T, H)."""
    N, T, H = x.shape
    Hd = H // 2
    bn = N if N <= block_n else block_n
    xt = jnp.transpose(x, (1, 0, 2)).astype(jnp.float32)      # (T, N, H)
    out = pl.pallas_call(
        _bilstm_kernel,
        out_shape=jax.ShapeDtypeStruct((T, N, H), jnp.float32),
        grid=(pl.cdiv(N, bn),),
        in_specs=[
            pl.BlockSpec((T, bn, H), lambda i: (0, i, 0)),
            pl.BlockSpec((H, 4 * H), lambda i: (0, 0)),
            pl.BlockSpec((Hd, 4 * H), lambda i: (0, 0)),
            pl.BlockSpec((1, 4 * H), lambda i: (0, 0)),
        ],
        out_specs=pl.BlockSpec((T, bn, H), lambda i: (0, i, 0)),
        scratch_shapes=[
            pltpu.VMEM((T, bn, 2 * H), jnp.float32),   # fwd input-projected gates
            pltpu.VMEM((T, bn, 2 * H), jnp.float32),   # bwd input-projected gates
        ],
        compiler_params=pltpu.CompilerParams(
            dimension_semantics=("parallel",)),
    )(xt, p["wih"], p["whh"], p["b"])
    return jnp.transpose(out, (1, 0, 2))                       # (N, T, H)


# ----------------------- fused attention + max-over-time kernel --------------
def _attention_max_kernel(h_ref, out_ref):
    """out = max_t [ softmax(h h^T, dim=2) @ h ]   (only output DEC consumes)."""
    h = h_ref[...]                                             # (bn, T, H)
    a = jnp.einsum('ntd,nsd->nts', h, h, preferred_element_type=jnp.float32)
    a_max = jnp.max(a, axis=2, keepdims=True)
    e = jnp.exp(a - a_max)
    inv = pl.reciprocal(jnp.sum(e, axis=2, keepdims=True), approx=True)
    p = e * inv                                                # softmax over dim=2
    att = jnp.einsum('nts,nsd->ntd', p, h, preferred_element_type=jnp.float32)
    out_ref[...] = jnp.max(att, axis=1)                        # (bn, H)


def attention_max(h, *, block_n=128):
    """h: (N, T, H) -> (N, H): attended tokens max-pooled over time."""
    N, T, H = h.shape
    bn = N if N <= block_n else block_n
    return pl.pallas_call(
        _attention_max_kernel,
        out_shape=jax.ShapeDtypeStruct((N, H), jnp.float32),
        grid=(pl.cdiv(N, bn),),
        in_specs=[pl.BlockSpec((bn, T, H), lambda i: (i, 0, 0))],
        out_specs=pl.BlockSpec((bn, H), lambda i: (i, 0)),
        compiler_params=pltpu.CompilerParams(
            dimension_semantics=("parallel",)),
    )(h.astype(jnp.float32))


# ----------------------- parameter init (deterministic) ----------------------
def init_lstm_params(key, H):
    """Returns fused BiLSTM weights: wih (H,4H), whh (Hd,4H), b (1,4H)."""
    Hd = H // 2
    k = 1.0 / float(Hd) ** 0.5
    keys = jax.random.split(key, 8)

    def u(kk, shape):
        return jax.random.uniform(kk, shape, jnp.float32, -k, k)

    wih_f = u(keys[0], (H, 4 * Hd))
    whh_f = u(keys[1], (Hd, 4 * Hd))
    b_f = u(keys[2], (1, 4 * Hd)) + u(keys[3], (1, 4 * Hd))    # b_ih + b_hh
    wih_b = u(keys[4], (H, 4 * Hd))
    whh_b = u(keys[5], (Hd, 4 * Hd))
    b_b = u(keys[6], (1, 4 * Hd)) + u(keys[7], (1, 4 * Hd))
    return {
        "wih": jnp.concatenate([wih_f, wih_b], axis=1),        # (H, 4H)
        "whh": jnp.concatenate([whh_f, whh_b], axis=1),        # (Hd, 4H)
        "b":   jnp.concatenate([b_f, b_b], axis=1),            # (1, 4H)
    }


# ----------------------- DEC forward ------------------------------------------
def dec_forward(x, params):
    B, S, W, H = x.shape
    xs = x.reshape(B * S, W, H)
    # _, h1 = sentence_encoder(x.view(batch*sent, word, hidden))
    h1 = bilstm_encoder(xs, params["sentence_encoder"])        # (B*S, W, H)
    # x, _, _ = sentence_attention(h1, h1); x = max(x.view(B,S,W,H), dim=2)
    # (attention + max fused in one kernel; attended tensor never hits HBM)
    x_doc = attention_max(h1).reshape(B, S, H)                 # (B, S, H)
    # _, h2 = document_encoder(x)
    h2 = bilstm_encoder(x_doc, params["document_encoder"])     # (B, S, H)
    # document_attention(h2, h2) output is dead in the reference (overwritten) -> removed
    # y = max(h2, dim=1); cat([max(x, dim=1), y], dim=1)
    y = jnp.max(h2, axis=1)                                    # (B, H)
    x_max = jnp.max(x_doc, axis=1)                             # (B, H)
    return jnp.concatenate([x_max, y], axis=1)                 # (B, 2H)


if __name__ == "__main__":
    B, S, W, H = 2, 4, 8, 32
    key = jax.random.PRNGKey(0)
    kx, ks, kd = jax.random.split(key, 3)
    x = jax.random.normal(kx, (B, S, W, H), dtype=jnp.float32)
    params = {
        "sentence_encoder": init_lstm_params(ks, H),
        "document_encoder": init_lstm_params(kd, H),
    }
    out = jax.jit(dec_forward)(x, params)
    jax.block_until_ready(out)
    assert out.shape == (B, 2 * H) and out.dtype == jnp.float32
    print("KERNEL_OK")
</pallas_src>

<mosaic_0001>
module attributes {stable_mosaic.version = 11 : i64} {
  func.func @_attention_max_kernel(%arg0: i32, %arg1: memref<8x8x32xf32, #tpu.memory_space<vmem>>, %arg2: memref<8x32xf32, #tpu.memory_space<vmem>>) attributes {dimension_semantics = [#tpu.dimension_semantics<parallel>], iteration_bounds = array<i64: 1>, scalar_prefetch = 0 : i64, scratch_operands = 0 : i64, tpu.core_type = #tpu.core_type<tc>, window_params = [{transform_indices = @transform_0, window_bounds = array<i64: 8, 8, 32>}, {transform_indices = @transform_1, window_bounds = array<i64: 8, 32>}]} {
    %c0 = arith.constant 0 : index
    %c0_0 = arith.constant 0 : index
    %c0_1 = arith.constant 0 : index
    %0 = vector.load %arg1[%c0, %c0_0, %c0_1] : memref<8x8x32xf32, #tpu.memory_space<vmem>>, vector<8x8x32xf32>
    "tpu.trace_start"() <{level = 10 : i32, message = "ntd,nsd->nts"}> : () -> ()
    %cst = arith.constant dense<0.000000e+00> : vector<8x8x8xf32>
    %1 = tpu.matmul %0, %0, %cst {dimension_numbers = #tpu.dot_dimension_numbers<[2], [2], [1], [1], [0, 0, 0, 1, 1, 1], [0], [0]>} : vector<8x8x32xf32>, vector<8x8x32xf32>, vector<8x8x8xf32> -> vector<8x8x8xf32>
    "tpu.trace_stop"() : () -> ()
    %cst_2 = arith.constant dense<0xFF800000> : vector<8x8xf32>
    %2 = vector.multi_reduction <maximumf>, %1, %cst_2 [2] : vector<8x8x8xf32> to vector<8x8xf32>
    %3 = vector.shape_cast %2 : vector<8x8xf32> to vector<8x8x1xf32>
    %4 = vector.broadcast %3 : vector<8x8x1xf32> to vector<8x8x8xf32>
    %5 = arith.subf %1, %4 : vector<8x8x8xf32>
    %6 = math.exp %5 : vector<8x8x8xf32>
    %cst_3 = arith.constant dense<0.000000e+00> : vector<8x8xf32>
    %7 = vector.multi_reduction <add>, %6, %cst_3 [2] : vector<8x8x8xf32> to vector<8x8xf32>
    %8 = vector.shape_cast %7 : vector<8x8xf32> to vector<8x8x1xf32>
    %9 = tpu.reciprocal %8 {approx = true} : vector<8x8x1xf32> -> vector<8x8x1xf32>
    %10 = vector.broadcast %9 : vector<8x8x1xf32> to vector<8x8x8xf32>
    %11 = arith.mulf %6, %10 : vector<8x8x8xf32>
    "tpu.trace_start"() <{level = 10 : i32, message = "nts,nsd->ntd"}> : () -> ()
    %cst_4 = arith.constant dense<0.000000e+00> : vector<8x8x32xf32>
    %12 = tpu.matmul %11, %0, %cst_4 {dimension_numbers = #tpu.dot_dimension_numbers<[2], [1], [1], [2], [0, 0, 0, 1, 1, 2], [0], [0]>} : vector<8x8x8xf32>, vector<8x8x32xf32>, vector<8x8x32xf32> -> vector<8x8x32xf32>
    "tpu.trace_stop"() : () -> ()
    %cst_5 = arith.constant dense<0xFF800000> : vector<8x32xf32>
    %13 = vector.multi_reduction <maximumf>, %12, %cst_5 [1] : vector<8x8x32xf32> to vector<8x32xf32>
    %c0_6 = arith.constant 0 : index
    %c0_7 = arith.constant 0 : index
    %14 = vector.load %arg2[%c0_6, %c0_7] : memref<8x32xf32, #tpu.memory_space<vmem>>, vector<8x32xf32>
    tpu.vector_store %arg2[%c0_6, %c0_7], %13 {strides = array<i32>} : memref<8x32xf32, #tpu.memory_space<vmem>>, vector<8x32xf32>,
    return
  }
  func.func @transform_0(%arg0: i32) -> (i32, i32, i32) {
    %c0_i32 = arith.constant 0 : i32
    %c0_i32_0 = arith.constant 0 : i32
    %c0_i32_1 = arith.constant 0 : i32
    return %arg0, %c0_i32, %c0_i32_0 : i32, i32, i32
  }
  func.func @transform_1(%arg0: i32) -> (i32, i32) {
    %c0_i32 = arith.constant 0 : i32
    %c0_i32_0 = arith.constant 0 : i32
    return %arg0, %c0_i32 : i32, i32
  }
}

module attributes {stable_mosaic.version = 11 : i64} {
  func.func @_bilstm_kernel(%arg0: i32, %arg1: memref<8x8x32xf32, #tpu.memory_space<vmem>>, %arg2: memref<32x128xf32, #tpu.memory_space<vmem>>, %arg3: memref<16x128xf32, #tpu.memory_space<vmem>>, %arg4: memref<1x128xf32, #tpu.memory_space<vmem>>, %arg5: memref<8x8x32xf32, #tpu.memory_space<vmem>>, %arg6: memref<8x8x64xf32, #tpu.memory_space<vmem>>, %arg7: memref<8x8x64xf32, #tpu.memory_space<vmem>>) attributes {dimension_semantics = [#tpu.dimension_semantics<parallel>], iteration_bounds = array<i64: 1>, scalar_prefetch = 0 : i64, scratch_operands = 2 : i64, tpu.core_type = #tpu.core_type<tc>, window_params = [{transform_indices = @transform_0, window_bounds = array<i64: 8, 8, 32>}, {pipeline_mode = #tpu.pipeline_mode<synchronous>, transform_indices = @transform_1, window_bounds = array<i64: 32, 128>}, {pipeline_mode = #tpu.pipeline_mode<synchronous>, transform_indices = @transform_2, window_bounds = array<i64: 16, 128>}, {pipeline_mode = #tpu.pipeline_mode<synchronous>, transform_indices = @transform_3, window_bounds = array<i64: 1, 128>}, {transform_indices = @transform_4, window_bounds = array<i64: 8, 8, 32>}]} {
    %c0 = arith.constant 0 : index
    %c0_0 = arith.constant 0 : index
    %c0_1 = arith.constant 0 : index
    %0 = vector.load %arg1[%c0, %c0_0, %c0_1] : memref<8x8x32xf32, #tpu.memory_space<vmem>>, vector<8x8x32xf32>
    %1 = vector.shape_cast %0 : vector<8x8x32xf32> to vector<64x32xf32>
    %c0_2 = arith.constant 0 : index
    %c0_3 = arith.constant 0 : index
    %2 = vector.load %arg2[%c0_2, %c0_3] : memref<32x128xf32, #tpu.memory_space<vmem>>, vector<32x128xf32>
    %cst = arith.constant dense<0.000000e+00> : vector<64x128xf32>
    %3 = tpu.matmul %1, %2, %cst {dimension_numbers = #tpu.dot_dimension_numbers<[1], [0], [0], [1], [0, 0, 1, 1], [], []>} : vector<64x32xf32>, vector<32x128xf32>, vector<64x128xf32> -> vector<64x128xf32>
    %c0_4 = arith.constant 0 : index
    %c0_5 = arith.constant 0 : index
    %4 = vector.load %arg4[%c0_4, %c0_5] : memref<1x128xf32, #tpu.memory_space<vmem>>, vector<1x128xf32>
    %5 = vector.broadcast %4 : vector<1x128xf32> to vector<64x128xf32>
    %6 = arith.addf %3, %5 : vector<64x128xf32>
    %7 = vector.extract_strided_slice %6 {offsets = [0, 0], sizes = [64, 64], strides = [1, 1]} : vector<64x128xf32> to vector<64x64xf32>
    %8 = vector.shape_cast %7 : vector<64x64xf32> to vector<8x8x64xf32>
    %c0_6 = arith.constant 0 : index
    %c0_7 = arith.constant 0 : index
    %c0_8 = arith.constant 0 : index
    %9 = vector.load %arg6[%c0_6, %c0_7, %c0_8] : memref<8x8x64xf32, #tpu.memory_space<vmem>>, vector<8x8x64xf32>
    tpu.vector_store %arg6[%c0_6, %c0_7, %c0_8], %8 {strides = array<i32>} : memref<8x8x64xf32, #tpu.memory_space<vmem>>, vector<8x8x64xf32>,
    %10 = vector.extract_strided_slice %6 {offsets = [0, 64], sizes = [64, 64], strides = [1, 1]} : vector<64x128xf32> to vector<64x64xf32>
    %11 = vector.shape_cast %10 : vector<64x64xf32> to vector<8x8x64xf32>
    %c0_9 = arith.constant 0 : index
    %c0_10 = arith.constant 0 : index
    %c0_11 = arith.constant 0 : index
    %12 = vector.load %arg7[%c0_9, %c0_10, %c0_11] : memref<8x8x64xf32, #tpu.memory_space<vmem>>, vector<8x8x64xf32>
    tpu.vector_store %arg7[%c0_9, %c0_10, %c0_11], %11 {strides = array<i32>} : memref<8x8x64xf32, #tpu.memory_space<vmem>>, vector<8x8x64xf32>,
    %c0_12 = arith.constant 0 : index
    %c0_13 = arith.constant 0 : index
    %13 = vector.load %arg3[%c0_12, %c0_13] : memref<16x128xf32, #tpu.memory_space<vmem>>, vector<16x128xf32>
    %cst_14 = arith.constant 0.000000e+00 : f32
    %14 = vector.broadcast %cst_14 : f32 to vector<16x16xf32>
    %c0_i32 = arith.constant 0 : i32
    %c7_i32 = arith.constant 7 : i32
    %15 = arith.subi %c7_i32, %c0_i32 : i32
    %cst_15 = arith.constant dense<0.000000e+00> : vector<16x128xf32>
    %16 = tpu.matmul %14, %13, %cst_15 {dimension_numbers = #tpu.dot_dimension_numbers<[1], [0], [0], [1], [0, 0, 1, 1], [], []>} : vector<16x16xf32>, vector<16x128xf32>, vector<16x128xf32> -> vector<16x128xf32>
    %17 = arith.index_cast %c0_i32 : i32 to index
    %c0_16 = arith.constant 0 : index
    %c0_17 = arith.constant 0 : index
    %18 = vector.load %arg6[%17, %c0_16, %c0_17] : memref<8x8x64xf32, #tpu.memory_space<vmem>>, vector<1x8x64xf32>
    %19 = vector.shape_cast %18 : vector<1x8x64xf32> to vector<8x64xf32>
    %20 = vector.extract_strided_slice %16 {offsets = [0, 0], sizes = [8, 64], strides = [1, 1]} : vector<16x128xf32> to vector<8x64xf32>
    %21 = arith.addf %19, %20 : vector<8x64xf32>
    %22 = arith.index_cast %15 : i32 to index
    %c0_18 = arith.constant 0 : index
    %c0_19 = arith.constant 0 : index
    %23 = vector.load %arg7[%22, %c0_18, %c0_19] : memref<8x8x64xf32, #tpu.memory_space<vmem>>, vector<1x8x64xf32>
    %24 = vector.shape_cast %23 : vector<1x8x64xf32> to vector<8x64xf32>
    %25 = vector.extract_strided_slice %16 {offsets = [8, 64], sizes = [8, 64], strides = [1, 1]} : vector<16x128xf32> to vector<8x64xf32>
    %26 = arith.addf %24, %25 : vector<8x64xf32>
    %27 = tpu.concatenate %21, %26 in 0 : vector<8x64xf32>, vector<8x64xf32> -> vector<16x64xf32>
    %28 = vector.extract_strided_slice %27 {offsets = [0, 0], sizes = [16, 16], strides = [1, 1]} : vector<16x64xf32> to vector<16x16xf32>
    %29 = arith.negf %28 : vector<16x16xf32>
    %30 = math.exp %29 : vector<16x16xf32>
    %cst_20 = arith.constant 1.000000e+00 : f32
    %31 = vector.broadcast %cst_20 : f32 to vector<16x16xf32>
    %32 = arith.addf %31, %30 : vector<16x16xf32>
    %33 = arith.divf %31, %32 : vector<16x16xf32>
    %34 = vector.extract_strided_slice %27 {offsets = [0, 16], sizes = [16, 16], strides = [1, 1]} : vector<16x64xf32> to vector<16x16xf32>
    %35 = arith.negf %34 : vector<16x16xf32>
    %36 = math.exp %35 : vector<16x16xf32>
    %cst_21 = arith.constant 1.000000e+00 : f32
    %37 = vector.broadcast %cst_21 : f32 to vector<16x16xf32>
    %38 = arith.addf %37, %36 : vector<16x16xf32>
    %39 = arith.divf %37, %38 : vector<16x16xf32>
    %40 = vector.extract_strided_slice %27 {offsets = [0, 32], sizes = [16, 16], strides = [1, 1]} : vector<16x64xf32> to vector<16x16xf32>
    %41 = math.tanh %40 : vector<16x16xf32>
    %42 = vector.extract_strided_slice %27 {offsets = [0, 48], sizes = [16, 16], strides = [1, 1]} : vector<16x64xf32> to vector<16x16xf32>
    %43 = arith.negf %42 : vector<16x16xf32>
    %44 = math.exp %43 : vector<16x16xf32>
    %cst_22 = arith.constant 1.000000e+00 : f32
    %45 = vector.broadcast %cst_22 : f32 to vector<16x16xf32>
    %46 = arith.addf %45, %44 : vector<16x16xf32>
    %47 = arith.divf %45, %46 : vector<16x16xf32>
    %48 = arith.mulf %39, %14 : vector<16x16xf32>
    %49 = arith.mulf %33, %41 : vector<16x16xf32>
    %50 = arith.addf %48, %49 : vector<16x16xf32>
    %51 = math.tanh %50 : vector<16x16xf32>
    %52 = arith.mulf %47, %51 : vector<16x16xf32>
    %53 = vector.extract_strided_slice %52 {offsets = [0, 0], sizes = [8, 16], strides = [1, 1]} : vector<16x16xf32> to vector<8x16xf32>
    %54 = arith.index_cast %c0_i32 : i32 to index
    %c0_23 = arith.constant 0 : index
    %c0_24 = arith.constant 0 : index
    %55 = vector.load %arg5[%54, %c0_23, %c0_24] : memref<8x8x32xf32, #tpu.memory_space<vmem>>, vector<1x8x16xf32>
    %56 = vector.shape_cast %55 : vector<1x8x16xf32> to vector<8x16xf32>
    %57 = vector.shape_cast %53 : vector<8x16xf32> to vector<1x8x16xf32>
    tpu.vector_store %arg5[%54, %c0_23, %c0_24], %57 {strides = array<i32>} : memref<8x8x32xf32, #tpu.memory_space<vmem>>, vector<1x8x16xf32>,
    %58 = vector.extract_strided_slice %52 {offsets = [8, 0], sizes = [8, 16], strides = [1, 1]} : vector<16x16xf32> to vector<8x16xf32>
    %59 = arith.index_cast %15 : i32 to index
    %c0_25 = arith.constant 0 : index
    %c16 = arith.constant 16 : index
    %60 = vector.load %arg5[%59, %c0_25, %c16] : memref<8x8x32xf32, #tpu.memory_space<vmem>>, vector<1x8x16xf32>
    %61 = vector.shape_cast %60 : vector<1x8x16xf32> to vector<8x16xf32>
    %62 = vector.shape_cast %58 : vector<8x16xf32> to vector<1x8x16xf32>
    tpu.vector_store %arg5[%59, %c0_25, %c16], %62 {strides = array<i32>} : memref<8x8x32xf32, #tpu.memory_space<vmem>>, vector<1x8x16xf32>,
    %c1_i32 = arith.constant 1 : i32
    %c7_i32_26 = arith.constant 7 : i32
    %63 = arith.subi %c7_i32_26, %c1_i32 : i32
    %cst_27 = arith.constant dense<0.000000e+00> : vector<16x128xf32>
    %64 = tpu.matmul %52, %13, %cst_27 {dimension_numbers = #tpu.dot_dimension_numbers<[1], [0], [0], [1], [0, 0, 1, 1], [], []>} : vector<16x16xf32>, vector<16x128xf32>, vector<16x128xf32> -> vector<16x128xf32>
    %65 = arith.index_cast %c1_i32 : i32 to index
    %c0_28 = arith.constant 0 : index
    %c0_29 = arith.constant 0 : index
    %66 = vector.load %arg6[%65, %c0_28, %c0_29] : memref<8x8x64xf32, #tpu.memory_space<vmem>>, vector<1x8x64xf32>
    %67 = vector.shape_cast %66 : vector<1x8x64xf32> to vector<8x64xf32>
    %68 = vector.extract_strided_slice %64 {offsets = [0, 0], sizes = [8, 64], strides = [1, 1]} : vector<16x128xf32> to vector<8x64xf32>
    %69 = arith.addf %67, %68 : vector<8x64xf32>
    %70 = arith.index_cast %63 : i32 to index
    %c0_30 = arith.constant 0 : index
    %c0_31 = arith.constant 0 : index
    %71 = vector.load %arg7[%70, %c0_30, %c0_31] : memref<8x8x64xf32, #tpu.memory_space<vmem>>, vector<1x8x64xf32>
    %72 = vector.shape_cast %71 : vector<1x8x64xf32> to vector<8x64xf32>
    %73 = vector.extract_strided_slice %64 {offsets = [8, 64], sizes = [8, 64], strides = [1, 1]} : vector<16x128xf32> to vector<8x64xf32>
    %74 = arith.addf %72, %73 : vector<8x64xf32>
    %75 = tpu.concatenate %69, %74 in 0 : vector<8x64xf32>, vector<8x64xf32> -> vector<16x64xf32>
    %76 = vector.extract_strided_slice %75 {offsets = [0, 0], sizes = [16, 16], strides = [1, 1]} : vector<16x64xf32> to vector<16x16xf32>
    %77 = arith.negf %76 : vector<16x16xf32>
    %78 = math.exp %77 : vector<16x16xf32>
    %cst_32 = arith.constant 1.000000e+00 : f32
    %79 = vector.broadcast %cst_32 : f32 to vector<16x16xf32>
    %80 = arith.addf %79, %78 : vector<16x16xf32>
    %81 = arith.divf %79, %80 : vector<16x16xf32>
    %82 = vector.extract_strided_slice %75 {offsets = [0, 16], sizes = [16, 16], strides = [1, 1]} : vector<16x64xf32> to vector<16x16xf32>
    %83 = arith.negf %82 : vector<16x16xf32>
    %84 = math.exp %83 : vector<16x16xf32>
    %cst_33 = arith.constant 1.000000e+00 : f32
    %85 = vector.broadcast %cst_33 : f32 to vector<16x16xf32>
    %86 = arith.addf %85, %84 : vector<16x16xf32>
    %87 = arith.divf %85, %86 : vector<16x16xf32>
    %88 = vector.extract_strided_slice %75 {offsets = [0, 32], sizes = [16, 16], strides = [1, 1]} : vector<16x64xf32> to vector<16x16xf32>
    %89 = math.tanh %88 : vector<16x16xf32>
    %90 = vector.extract_strided_slice %75 {offsets = [0, 48], sizes = [16, 16], strides = [1, 1]} : vector<16x64xf32> to vector<16x16xf32>
    %91 = arith.negf %90 : vector<16x16xf32>
    %92 = math.exp %91 : vector<16x16xf32>
    %cst_34 = arith.constant 1.000000e+00 : f32
    %93 = vector.broadcast %cst_34 : f32 to vector<16x16xf32>
    %94 = arith.addf %93, %92 : vector<16x16xf32>
    %95 = arith.divf %93, %94 : vector<16x16xf32>
    %96 = arith.mulf %87, %50 : vector<16x16xf32>
    %97 = arith.mulf %81, %89 : vector<16x16xf32>
    %98 = arith.addf %96, %97 : vector<16x16xf32>
    %99 = math.tanh %98 : vector<16x16xf32>
    %100 = arith.mulf %95, %99 : vector<16x16xf32>
    %101 = vector.extract_strided_slice %100 {offsets = [0, 0], sizes = [8, 16], strides = [1, 1]} : vector<16x16xf32> to vector<8x16xf32>
    %102 = arith.index_cast %c1_i32 : i32 to index
    %c0_35 = arith.constant 0 : index
    %c0_36 = arith.constant 0 : index
    %103 = vector.load %arg5[%102, %c0_35, %c0_36] : memref<8x8x32xf32, #tpu.memory_space<vmem>>, vector<1x8x16xf32>
    %104 = vector.shape_cast %103 : vector<1x8x16xf32> to vector<8x16xf32>
    %105 = vector.shape_cast %101 : vector<8x16xf32> to vector<1x8x16xf32>
    tpu.vector_store %arg5[%102, %c0_35, %c0_36], %105 {strides = array<i32>} : memref<8x8x32xf32, #tpu.memory_space<vmem>>, vector<1x8x16xf32>,
    %106 = vector.extract_strided_slice %100 {offsets = [8, 0], sizes = [8, 16], strides = [1, 1]} : vector<16x16xf32> to vector<8x16xf32>
    %107 = arith.index_cast %63 : i32 to index
    %c0_37 = arith.constant 0 : index
    %c16_38 = arith.constant 16 : index
    %108 = vector.load %arg5[%107, %c0_37, %c16_38] : memref<8x8x32xf32, #tpu.memory_space<vmem>>, vector<1x8x16xf32>
    %109 = vector.shape_cast %108 : vector<1x8x16xf32> to vector<8x16xf32>
    %110 = vector.shape_cast %106 : vector<8x16xf32> to vector<1x8x16xf32>
    tpu.vector_store %arg5[%107, %c0_37, %c16_38], %110 {strides = array<i32>} : memref<8x8x32xf32, #tpu.memory_space<vmem>>, vector<1x8x16xf32>,
    %c2_i32 = arith.constant 2 : i32
    %c7_i32_39 = arith.constant 7 : i32
    %111 = arith.subi %c7_i32_39, %c2_i32 : i32
    %cst_40 = arith.constant dense<0.000000e+00> : vector<16x128xf32>
    %112 = tpu.matmul %100, %13, %cst_40 {dimension_numbers = #tpu.dot_dimension_numbers<[1], [0], [0], [1], [0, 0, 1, 1], [], []>} : vector<16x16xf32>, vector<16x128xf32>, vector<16x128xf32> -> vector<16x128xf32>
    %113 = arith.index_cast %c2_i32 : i32 to index
    %c0_41 = arith.constant 0 : index
    %c0_42 = arith.constant 0 : index
    %114 = vector.load %arg6[%113, %c0_41, %c0_42] : memref<8x8x64xf32, #tpu.memory_space<vmem>>, vector<1x8x64xf32>
    %115 = vector.shape_cast %114 : vector<1x8x64xf32> to vector<8x64xf32>
    %116 = vector.extract_strided_slice %112 {offsets = [0, 0], sizes = [8, 64], strides = [1, 1]} : vector<16x128xf32> to vector<8x64xf32>
    %117 = arith.addf %115, %116 : vector<8x64xf32>
    %118 = arith.index_cast %111 : i32 to index
    %c0_43 = arith.constant 0 : index
    %c0_44 = arith.constant 0 : index
    %119 = vector.load %arg7[%118, %c0_43, %c0_44] : memref<8x8x64xf32, #tpu.memory_space<vmem>>, vector<1x8x64xf32>
    %120 = vector.shape_cast %119 : vector<1x8x64xf32> to vector<8x64xf32>
    %121 = vector.extract_strided_slice %112 {offsets = [8, 64], sizes = [8, 64], strides = [1, 1]} : vector<16x128xf32> to vector<8x64xf32>
    %122 = arith.addf %120, %121 : vector<8x64xf32>
    %123 = tpu.concatenate %117, %122 in 0 : vector<8x64xf32>, vector<8x64xf32> -> vector<16x64xf32>
    %124 = vector.extract_strided_slice %123 {offsets = [0, 0], sizes = [16, 16], strides = [1, 1]} : vector<16x64xf32> to vector<16x16xf32>
    %125 = arith.negf %124 : vector<16x16xf32>
    %126 = math.exp %125 : vector<16x16xf32>
    %cst_45 = arith.constant 1.000000e+00 : f32
    %127 = vector.broadcast %cst_45 : f32 to vector<16x16xf32>
    %128 = arith.addf %127, %126 : vector<16x16xf32>
    %129 = arith.divf %127, %128 : vector<16x16xf32>
    %130 = vector.extract_strided_slice %123 {offsets = [0, 16], sizes = [16, 16], strides = [1, 1]} : vector<16x64xf32> to vector<16x16xf32>
    %131 = arith.negf %130 : vector<16x16xf32>
    %132 = math.exp %131 : vector<16x16xf32>
    %cst_46 = arith.constant 1.000000e+00 : f32
    %133 = vector.broadcast %cst_46 : f32 to vector<16x16xf32>
    %134 = arith.addf %133, %132 : vector<16x16xf32>
    %135 = arith.divf %133, %134 : vector<16x16xf32>
    %136 = vector.extract_strided_slice %123 {offsets = [0, 32], sizes = [16, 16], strides = [1, 1]} : vector<16x64xf32> to vector<16x16xf32>
    %137 = math.tanh %136 : vector<16x16xf32>
    %138 = vector.extract_strided_slice %123 {offsets = [0, 48], sizes = [16, 16], strides = [1, 1]} : vector<16x64xf32> to vector<16x16xf32>
    %139 = arith.negf %138 : vector<16x16xf32>
    %140 = math.exp %139 : vector<16x16xf32>
    %cst_47 = arith.constant 1.000000e+00 : f32
    %141 = vector.broadcast %cst_47 : f32 to vector<16x16xf32>
    %142 = arith.addf %141, %140 : vector<16x16xf32>
    %143 = arith.divf %141, %142 : vector<16x16xf32>
    %144 = arith.mulf %135, %98 : vector<16x16xf32>
    %145 = arith.mulf %129, %137 : vector<16x16xf32>
    %146 = arith.addf %144, %145 : vector<16x16xf32>
    %147 = math.tanh %146 : vector<16x16xf32>
    %148 = arith.mulf %143, %147 : vector<16x16xf32>
    %149 = vector.extract_strided_slice %148 {offsets = [0, 0], sizes = [8, 16], strides = [1, 1]} : vector<16x16xf32> to vector<8x16xf32>
    %150 = arith.index_cast %c2_i32 : i32 to index
    %c0_48 = arith.constant 0 : index
    %c0_49 = arith.constant 0 : index
    %151 = vector.load %arg5[%150, %c0_48, %c0_49] : memref<8x8x32xf32, #tpu.memory_space<vmem>>, vector<1x8x16xf32>
    %152 = vector.shape_cast %151 : vector<1x8x16xf32> to vector<8x16xf32>
    %153 = vector.shape_cast %149 : vector<8x16xf32> to vector<1x8x16xf32>
    tpu.vector_store %arg5[%150, %c0_48, %c0_49], %153 {strides = array<i32>} : memref<8x8x32xf32, #tpu.memory_space<vmem>>, vector<1x8x16xf32>,
    %154 = vector.extract_strided_slice %148 {offsets = [8, 0], sizes = [8, 16], strides = [1, 1]} : vector<16x16xf32> to vector<8x16xf32>
    %155 = arith.index_cast %111 : i32 to index
    %c0_50 = arith.constant 0 : index
    %c16_51 = arith.constant 16 : index
    %156 = vector.load %arg5[%155, %c0_50, %c16_51] : memref<8x8x32xf32, #tpu.memory_space<vmem>>, vector<1x8x16xf32>
    %157 = vector.shape_cast %156 : vector<1x8x16xf32> to vector<8x16xf32>
    %158 = vector.shape_cast %154 : vector<8x16xf32> to vector<1x8x16xf32>
    tpu.vector_store %arg5[%155, %c0_50, %c16_51], %158 {strides = array<i32>} : memref<8x8x32xf32, #tpu.memory_space<vmem>>, vector<1x8x16xf32>,
    %c3_i32 = arith.constant 3 : i32
    %c7_i32_52 = arith.constant 7 : i32
    %159 = arith.subi %c7_i32_52, %c3_i32 : i32
    %cst_53 = arith.constant dense<0.000000e+00> : vector<16x128xf32>
    %160 = tpu.matmul %148, %13, %cst_53 {dimension_numbers = #tpu.dot_dimension_numbers<[1], [0], [0], [1], [0, 0, 1, 1], [], []>} : vector<16x16xf32>, vector<16x128xf32>, vector<16x128xf32> -> vector<16x128xf32>
    %161 = arith.index_cast %c3_i32 : i32 to index
    %c0_54 = arith.constant 0 : index
    %c0_55 = arith.constant 0 : index
    %162 = vector.load %arg6[%161, %c0_54, %c0_55] : memref<8x8x64xf32, #tpu.memory_space<vmem>>, vector<1x8x64xf32>
    %163 = vector.shape_cast %162 : vector<1x8x64xf32> to vector<8x64xf32>
    %164 = vector.extract_strided_slice %160 {offsets = [0, 0], sizes = [8, 64], strides = [1, 1]} : vector<16x128xf32> to vector<8x64xf32>
    %165 = arith.addf %163, %164 : vector<8x64xf32>
    %166 = arith.index_cast %159 : i32 to index
    %c0_56 = arith.constant 0 : index
    %c0_57 = arith.constant 0 : index
    %167 = vector.load %arg7[%166, %c0_56, %c0_57] : memref<8x8x64xf32, #tpu.memory_space<vmem>>, vector<1x8x64xf32>
    %168 = vector.shape_cast %167 : vector<1x8x64xf32> to vector<8x64xf32>
    %169 = vector.extract_strided_slice %160 {offsets = [8, 64], sizes = [8, 64], strides = [1, 1]} : vector<16x128xf32> to vector<8x64xf32>
    %170 = arith.addf %168, %169 : vector<8x64xf32>
    %171 = tpu.concatenate %165, %170 in 0 : vector<8x64xf32>, vector<8x64xf32> -> vector<16x64xf32>
    %172 = vector.extract_strided_slice %171 {offsets = [0, 0], sizes = [16, 16], strides = [1, 1]} : vector<16x64xf32> to vector<16x16xf32>
    %173 = arith.negf %172 : vector<16x16xf32>
    %174 = math.exp %173 : vector<16x16xf32>
    %cst_58 = arith.constant 1.000000e+00 : f32
    %175 = vector.broadcast %cst_58 : f32 to vector<16x16xf32>
    %176 = arith.addf %175, %174 : vector<16x16xf32>
    %177 = arith.divf %175, %176 : vector<16x16xf32>
    %178 = vector.extract_strided_slice %171 {offsets = [0, 16], sizes = [16, 16], strides = [1, 1]} : vector<16x64xf32> to vector<16x16xf32>
    %179 = arith.negf %178 : vector<16x16xf32>
    %180 = math.exp %179 : vector<16x16xf32>
    %cst_59 = arith.constant 1.000000e+00 : f32
    %181 = vector.broadcast %cst_59 : f32 to vector<16x16xf32>
    %182 = arith.addf %181, %180 : vector<16x16xf32>
    %183 = arith.divf %181, %182 : vector<16x16xf32>
    %184 = vector.extract_strided_slice %171 {offsets = [0, 32], sizes = [16, 16], strides = [1, 1]} : vector<16x64xf32> to vector<16x16xf32>
    %185 = math.tanh %184 : vector<16x16xf32>
    %186 = vector.extract_strided_slice %171 {offsets = [0, 48], sizes = [16, 16], strides = [1, 1]} : vector<16x64xf32> to vector<16x16xf32>
    %187 = arith.negf %186 : vector<16x16xf32>
    %188 = math.exp %187 : vector<16x16xf32>
    %cst_60 = arith.constant 1.000000e+00 : f32
    %189 = vector.broadcast %cst_60 : f32 to vector<16x16xf32>
    %190 = arith.addf %189, %188 : vector<16x16xf32>
    %191 = arith.divf %189, %190 : vector<16x16xf32>
    %192 = arith.mulf %183, %146 : vector<16x16xf32>
    %193 = arith.mulf %177, %185 : vector<16x16xf32>
    %194 = arith.addf %192, %193 : vector<16x16xf32>
    %195 = math.tanh %194 : vector<16x16xf32>
    %196 = arith.mulf %191, %195 : vector<16x16xf32>
    %197 = vector.extract_strided_slice %196 {offsets = [0, 0], sizes = [8, 16], strides = [1, 1]} : vector<16x16xf32> to vector<8x16xf32>
    %198 = arith.index_cast %c3_i32 : i32 to index
    %c0_61 = arith.constant 0 : index
    %c0_62 = arith.constant 0 : index
    %199 = vector.load %arg5[%198, %c0_61, %c0_62] : memref<8x8x32xf32, #tpu.memory_space<vmem>>, vector<1x8x16xf32>
    %200 = vector.shape_cast %199 : vector<1x8x16xf32> to vector<8x16xf32>
    %201 = vector.shape_cast %197 : vector<8x16xf32> to vector<1x8x16xf32>
    tpu.vector_store %arg5[%198, %c0_61, %c0_62], %201 {strides = array<i32>} : memref<8x8x32xf32, #tpu.memory_space<vmem>>, vector<1x8x16xf32>,
    %202 = vector.extract_strided_slice %196 {offsets = [8, 0], sizes = [8, 16], strides = [1, 1]} : vector<16x16xf32> to vector<8x16xf32>
    %203 = arith.index_cast %159 : i32 to index
    %c0_63 = arith.constant 0 : index
    %c16_64 = arith.constant 16 : index
    %204 = vector.load %arg5[%203, %c0_63, %c16_64] : memref<8x8x32xf32, #tpu.memory_space<vmem>>, vector<1x8x16xf32>
    %205 = vector.shape_cast %204 : vector<1x8x16xf32> to vector<8x16xf32>
    %206 = vector.shape_cast %202 : vector<8x16xf32> to vector<1x8x16xf32>
    tpu.vector_store %arg5[%203, %c0_63, %c16_64], %206 {strides = array<i32>} : memref<8x8x32xf32, #tpu.memory_space<vmem>>, vector<1x8x16xf32>,
    %c4_i32 = arith.constant 4 : i32
    %c7_i32_65 = arith.constant 7 : i32
    %207 = arith.subi %c7_i32_65, %c4_i32 : i32
    %cst_66 = arith.constant dense<0.000000e+00> : vector<16x128xf32>
    %208 = tpu.matmul %196, %13, %cst_66 {dimension_numbers = #tpu.dot_dimension_numbers<[1], [0], [0], [1], [0, 0, 1, 1], [], []>} : vector<16x16xf32>, vector<16x128xf32>, vector<16x128xf32> -> vector<16x128xf32>
    %209 = arith.index_cast %c4_i32 : i32 to index
    %c0_67 = arith.constant 0 : index
    %c0_68 = arith.constant 0 : index
    %210 = vector.load %arg6[%209, %c0_67, %c0_68] : memref<8x8x64xf32, #tpu.memory_space<vmem>>, vector<1x8x64xf32>
    %211 = vector.shape_cast %210 : vector<1x8x64xf32> to vector<8x64xf32>
    %212 = vector.extract_strided_slice %208 {offsets = [0, 0], sizes = [8, 64], strides = [1, 1]} : vector<16x128xf32> to vector<8x64xf32>
    %213 = arith.addf %211, %212 : vector<8x64xf32>
    %214 = arith.index_cast %207 : i32 to index
    %c0_69 = arith.constant 0 : index
    %c0_70 = arith.constant 0 : index
    %215 = vector.load %arg7[%214, %c0_69, %c0_70] : memref<8x8x64xf32, #tpu.memory_space<vmem>>, vector<1x8x64xf32>
    %216 = vector.shape_cast %215 : vector<1x8x64xf32> to vector<8x64xf32>
    %217 = vector.extract_strided_slice %208 {offsets = [8, 64], sizes = [8, 64], strides = [1, 1]} : vector<16x128xf32> to vector<8x64xf32>
    %218 = arith.addf %216, %217 : vector<8x64xf32>
    %219 = tpu.concatenate %213, %218 in 0 : vector<8x64xf32>, vector<8x64xf32> -> vector<16x64xf32>
    %220 = vector.extract_strided_slice %219 {offsets = [0, 0], sizes = [16, 16], strides = [1, 1]} : vector<16x64xf32> to vector<16x16xf32>
    %221 = arith.negf %220 : vector<16x16xf32>
    %222 = math.exp %221 : vector<16x16xf32>
    %cst_71 = arith.constant 1.000000e+00 : f32
    %223 = vector.broadcast %cst_71 : f32 to vector<16x16xf32>
    %224 = arith.addf %223, %222 : vector<16x16xf32>
    %225 = arith.divf %223, %224 : vector<16x16xf32>
    %226 = vector.extract_strided_slice %219 {offsets = [0, 16], sizes = [16, 16], strides = [1, 1]} : vector<16x64xf32> to vector<16x16xf32>
    %227 = arith.negf %226 : vector<16x16xf32>
    %228 = math.exp %227 : vector<16x16xf32>
    %cst_72 = arith.constant 1.000000e+00 : f32
    %229 = vector.broadcast %cst_72 : f32 to vector<16x16xf32>
    %230 = arith.addf %229, %228 : vector<16x16xf32>
    %231 = arith.divf %229, %230 : vector<16x16xf32>
    %232 = vector.extract_strided_slice %219 {offsets = [0, 32], sizes = [16, 16], strides = [1, 1]} : vector<16x64xf32> to vector<16x16xf32>
    %233 = math.tanh %232 : vector<16x16xf32>
    %234 = vector.extract_strided_slice %219 {offsets = [0, 48], sizes = [16, 16], strides = [1, 1]} : vector<16x64xf32> to vector<16x16xf32>
    %235 = arith.negf %234 : vector<16x16xf32>
    %236 = math.exp %235 : vector<16x16xf32>
    %cst_73 = arith.constant 1.000000e+00 : f32
    %237 = vector.broadcast %cst_73 : f32 to vector<16x16xf32>
    %238 = arith.addf %237, %236 : vector<16x16xf32>
    %239 = arith.divf %237, %238 : vector<16x16xf32>
    %240 = arith.mulf %231, %194 : vector<16x16xf32>
    %241 = arith.mulf %225, %233 : vector<16x16xf32>
    %242 = arith.addf %240, %241 : vector<16x16xf32>
    %243 = math.tanh %242 : vector<16x16xf32>
    %244 = arith.mulf %239, %243 : vector<16x16xf32>
    %245 = vector.extract_strided_slice %244 {offsets = [0, 0], sizes = [8, 16], strides = [1, 1]} : vector<16x16xf32> to vector<8x16xf32>
    %246 = arith.index_cast %c4_i32 : i32 to index
    %c0_74 = arith.constant 0 : index
    %c0_75 = arith.constant 0 : index
    %247 = vector.load %arg5[%246, %c0_74, %c0_75] : memref<8x8x32xf32, #tpu.memory_space<vmem>>, vector<1x8x16xf32>
    %248 = vector.shape_cast %247 : vector<1x8x16xf32> to vector<8x16xf32>
    %249 = vector.shape_cast %245 : vector<8x16xf32> to vector<1x8x16xf32>
    tpu.vector_store %arg5[%246, %c0_74, %c0_75], %249 {strides = array<i32>} : memref<8x8x32xf32, #tpu.memory_space<vmem>>, vector<1x8x16xf32>,
    %250 = vector.extract_strided_slice %244 {offsets = [8, 0], sizes = [8, 16], strides = [1, 1]} : vector<16x16xf32> to vector<8x16xf32>
    %251 = arith.index_cast %207 : i32 to index
    %c0_76 = arith.constant 0 : index
    %c16_77 = arith.constant 16 : index
    %252 = vector.load %arg5[%251, %c0_76, %c16_77] : memref<8x8x32xf32, #tpu.memory_space<vmem>>, vector<1x8x16xf32>
    %253 = vector.shape_cast %252 : vector<1x8x16xf32> to vector<8x16xf32>
    %254 = vector.shape_cast %250 : vector<8x16xf32> to vector<1x8x16xf32>
    tpu.vector_store %arg5[%251, %c0_76, %c16_77], %254 {strides = array<i32>} : memref<8x8x32xf32, #tpu.memory_space<vmem>>, vector<1x8x16xf32>,
    %c5_i32 = arith.constant 5 : i32
    %c7_i32_78 = arith.constant 7 : i32
    %255 = arith.subi %c7_i32_78, %c5_i32 : i32
    %cst_79 = arith.constant dense<0.000000e+00> : vector<16x128xf32>
    %256 = tpu.matmul %244, %13, %cst_79 {dimension_numbers = #tpu.dot_dimension_numbers<[1], [0], [0], [1], [0, 0, 1, 1], [], []>} : vector<16x16xf32>, vector<16x128xf32>, vector<16x128xf32> -> vector<16x128xf32>
    %257 = arith.index_cast %c5_i32 : i32 to index
    %c0_80 = arith.constant 0 : index
    %c0_81 = arith.constant 0 : index
    %258 = vector.load %arg6[%257, %c0_80, %c0_81] : memref<8x8x64xf32, #tpu.memory_space<vmem>>, vector<1x8x64xf32>
    %259 = vector.shape_cast %258 : vector<1x8x64xf32> to vector<8x64xf32>
    %260 = vector.extract_strided_slice %256 {offsets = [0, 0], sizes = [8, 64], strides = [1, 1]} : vector<16x128xf32> to vector<8x64xf32>
    %261 = arith.addf %259, %260 : vector<8x64xf32>
    %262 = arith.index_cast %255 : i32 to index
    %c0_82 = arith.constant 0 : index
    %c0_83 = arith.constant 0 : index
    %263 = vector.load %arg7[%262, %c0_82, %c0_83] : memref<8x8x64xf32, #tpu.memory_space<vmem>>, vector<1x8x64xf32>
    %264 = vector.shape_cast %263 : vector<1x8x64xf32> to vector<8x64xf32>
    %265 = vector.extract_strided_slice %256 {offsets = [8, 64], sizes = [8, 64], strides = [1, 1]} : vector<16x128xf32> to vector<8x64xf32>
    %266 = arith.addf %264, %265 : vector<8x64xf32>
    %267 = tpu.concatenate %261, %266 in 0 : vector<8x64xf32>, vector<8x64xf32> -> vector<16x64xf32>
    %268 = vector.extract_strided_slice %267 {offsets = [0, 0], sizes = [16, 16], strides = [1, 1]} : vector<16x64xf32> to vector<16x16xf32>
    %269 = arith.negf %268 : vector<16x16xf32>
    %270 = math.exp %269 : vector<16x16xf32>
    %cst_84 = arith.constant 1.000000e+00 : f32
    %271 = vector.broadcast %cst_84 : f32 to vector<16x16xf32>
    %272 = arith.addf %271, %270 : vector<16x16xf32>
    %273 = arith.divf %271, %272 : vector<16x16xf32>
    %274 = vector.extract_strided_slice %267 {offsets = [0, 16], sizes = [16, 16], strides = [1, 1]} : vector<16x64xf32> to vector<16x16xf32>
    %275 = arith.negf %274 : vector<16x16xf32>
    %276 = math.exp %275 : vector<16x16xf32>
    %cst_85 = arith.constant 1.000000e+00 : f32
    %277 = vector.broadcast %cst_85 : f32 to vector<16x16xf32>
    %278 = arith.addf %277, %276 : vector<16x16xf32>
    %279 = arith.divf %277, %278 : vector<16x16xf32>
    %280 = vector.extract_strided_slice %267 {offsets = [0, 32], sizes = [16, 16], strides = [1, 1]} : vector<16x64xf32> to vector<16x16xf32>
    %281 = math.tanh %280 : vector<16x16xf32>
    %282 = vector.extract_strided_slice %267 {offsets = [0, 48], sizes = [16, 16], strides = [1, 1]} : vector<16x64xf32> to vector<16x16xf32>
    %283 = arith.negf %282 : vector<16x16xf32>
    %284 = math.exp %283 : vector<16x16xf32>
    %cst_86 = arith.constant 1.000000e+00 : f32
    %285 = vector.broadcast %cst_86 : f32 to vector<16x16xf32>
    %286 = arith.addf %285, %284 : vector<16x16xf32>
    %287 = arith.divf %285, %286 : vector<16x16xf32>
    %288 = arith.mulf %279, %242 : vector<16x16xf32>
    %289 = arith.mulf %273, %281 : vector<16x16xf32>
    %290 = arith.addf %288, %289 : vector<16x16xf32>
    %291 = math.tanh %290 : vector<16x16xf32>
    %292 = arith.mulf %287, %291 : vector<16x16xf32>
    %293 = vector.extract_strided_slice %292 {offsets = [0, 0], sizes = [8, 16], strides = [1, 1]} : vector<16x16xf32> to vector<8x16xf32>
    %294 = arith.index_cast %c5_i32 : i32 to index
    %c0_87 = arith.constant 0 : index
    %c0_88 = arith.constant 0 : index
    %295 = vector.load %arg5[%294, %c0_87, %c0_88] : memref<8x8x32xf32, #tpu.memory_space<vmem>>, vector<1x8x16xf32>
    %296 = vector.shape_cast %295 : vector<1x8x16xf32> to vector<8x16xf32>
    %297 = vector.shape_cast %293 : vector<8x16xf32> to vector<1x8x16xf32>
    tpu.vector_store %arg5[%294, %c0_87, %c0_88], %297 {strides = array<i32>} : memref<8x8x32xf32, #tpu.memory_space<vmem>>, vector<1x8x16xf32>,
    %298 = vector.extract_strided_slice %292 {offsets = [8, 0], sizes = [8, 16], strides = [1, 1]} : vector<16x16xf32> to vector<8x16xf32>
    %299 = arith.index_cast %255 : i32 to index
    %c0_89 = arith.constant 0 : index
    %c16_90 = arith.constant 16 : index
    %300 = vector.load %arg5[%299, %c0_89, %c16_90] : memref<8x8x32xf32, #tpu.memory_space<vmem>>, vector<1x8x16xf32>
    %301 = vector.shape_cast %300 : vector<1x8x16xf32> to vector<8x16xf32>
    %302 = vector.shape_cast %298 : vector<8x16xf32> to vector<1x8x16xf32>
    tpu.vector_store %arg5[%299, %c0_89, %c16_90], %302 {strides = array<i32>} : memref<8x8x32xf32, #tpu.memory_space<vmem>>, vector<1x8x16xf32>,
    %c6_i32 = arith.constant 6 : i32
    %c7_i32_91 = arith.constant 7 : i32
    %303 = arith.subi %c7_i32_91, %c6_i32 : i32
    %cst_92 = arith.constant dense<0.000000e+00> : vector<16x128xf32>
    %304 = tpu.matmul %292, %13, %cst_92 {dimension_numbers = #tpu.dot_dimension_numbers<[1], [0], [0], [1], [0, 0, 1, 1], [], []>} : vector<16x16xf32>, vector<16x128xf32>, vector<16x128xf32> -> vector<16x128xf32>
    %305 = arith.index_cast %c6_i32 : i32 to index
    %c0_93 = arith.constant 0 : index
    %c0_94 = arith.constant 0 : index
    %306 = vector.load %arg6[%305, %c0_93, %c0_94] : memref<8x8x64xf32, #tpu.memory_space<vmem>>, vector<1x8x64xf32>
    %307 = vector.shape_cast %306 : vector<1x8x64xf32> to vector<8x64xf32>
    %308 = vector.extract_strided_slice %304 {offsets = [0, 0], sizes = [8, 64], strides = [1, 1]} : vector<16x128xf32> to vector<8x64xf32>
    %309 = arith.addf %307, %308 : vector<8x64xf32>
    %310 = arith.index_cast %303 : i32 to index
    %c0_95 = arith.constant 0 : index
    %c0_96 = arith.constant 0 : index
    %311 = vector.load %arg7[%310, %c0_95, %c0_96] : memref<8x8x64xf32, #tpu.memory_space<vmem>>, vector<1x8x64xf32>
    %312 = vector.shape_cast %311 : vector<1x8x64xf32> to vector<8x64xf32>
    %313 = vector.extract_strided_slice %304 {offsets = [8, 64], sizes = [8, 64], strides = [1, 1]} : vector<16x128xf32> to vector<8x64xf32>
    %314 = arith.addf %312, %313 : vector<8x64xf32>
    %315 = tpu.concatenate %309, %314 in 0 : vector<8x64xf32>, vector<8x64xf32> -> vector<16x64xf32>
    %316 = vector.extract_strided_slice %315 {offsets = [0, 0], sizes = [16, 16], strides = [1, 1]} : vector<16x64xf32> to vector<16x16xf32>
    %317 = arith.negf %316 : vector<16x16xf32>
    %318 = math.exp %317 : vector<16x16xf32>
    %cst_97 = arith.constant 1.000000e+00 : f32
    %319 = vector.broadcast %cst_97 : f32 to vector<16x16xf32>
    %320 = arith.addf %319, %318 : vector<16x16xf32>
    %321 = arith.divf %319, %320 : vector<16x16xf32>
    %322 = vector.extract_strided_slice %315 {offsets = [0, 16], sizes = [16, 16], strides = [1, 1]} : vector<16x64xf32> to vector<16x16xf32>
    %323 = arith.negf %322 : vector<16x16xf32>
    %324 = math.exp %323 : vector<16x16xf32>
    %cst_98 = arith.constant 1.000000e+00 : f32
    %325 = vector.broadcast %cst_98 : f32 to vector<16x16xf32>
    %326 = arith.addf %325, %324 : vector<16x16xf32>
    %327 = arith.divf %325, %326 : vector<16x16xf32>
    %328 = vector.extract_strided_slice %315 {offsets = [0, 32], sizes = [16, 16], strides = [1, 1]} : vector<16x64xf32> to vector<16x16xf32>
    %329 = math.tanh %328 : vector<16x16xf32>
    %330 = vector.extract_strided_slice %315 {offsets = [0, 48], sizes = [16, 16], strides = [1, 1]} : vector<16x64xf32> to vector<16x16xf32>
    %331 = arith.negf %330 : vector<16x16xf32>
    %332 = math.exp %331 : vector<16x16xf32>
    %cst_99 = arith.constant 1.000000e+00 : f32
    %333 = vector.broadcast %cst_99 : f32 to vector<16x16xf32>
    %334 = arith.addf %333, %332 : vector<16x16xf32>
    %335 = arith.divf %333, %334 : vector<16x16xf32>
    %336 = arith.mulf %327, %290 : vector<16x16xf32>
    %337 = arith.mulf %321, %329 : vector<16x16xf32>
    %338 = arith.addf %336, %337 : vector<16x16xf32>
    %339 = math.tanh %338 : vector<16x16xf32>
    %340 = arith.mulf %335, %339 : vector<16x16xf32>
    %341 = vector.extract_strided_slice %340 {offsets = [0, 0], sizes = [8, 16], strides = [1, 1]} : vector<16x16xf32> to vector<8x16xf32>
    %342 = arith.index_cast %c6_i32 : i32 to index
    %c0_100 = arith.constant 0 : index
    %c0_101 = arith.constant 0 : index
    %343 = vector.load %arg5[%342, %c0_100, %c0_101] : memref<8x8x32xf32, #tpu.memory_space<vmem>>, vector<1x8x16xf32>
    %344 = vector.shape_cast %343 : vector<1x8x16xf32> to vector<8x16xf32>
    %345 = vector.shape_cast %341 : vector<8x16xf32> to vector<1x8x16xf32>
    tpu.vector_store %arg5[%342, %c0_100, %c0_101], %345 {strides = array<i32>} : memref<8x8x32xf32, #tpu.memory_space<vmem>>, vector<1x8x16xf32>,
    %346 = vector.extract_strided_slice %340 {offsets = [8, 0], sizes = [8, 16], strides = [1, 1]} : vector<16x16xf32> to vector<8x16xf32>
    %347 = arith.index_cast %303 : i32 to index
    %c0_102 = arith.constant 0 : index
    %c16_103 = arith.constant 16 : index
    %348 = vector.load %arg5[%347, %c0_102, %c16_103] : memref<8x8x32xf32, #tpu.memory_space<vmem>>, vector<1x8x16xf32>
    %349 = vector.shape_cast %348 : vector<1x8x16xf32> to vector<8x16xf32>
    %350 = vector.shape_cast %346 : vector<8x16xf32> to vector<1x8x16xf32>
    tpu.vector_store %arg5[%347, %c0_102, %c16_103], %350 {strides = array<i32>} : memref<8x8x32xf32, #tpu.memory_space<vmem>>, vector<1x8x16xf32>,
    %c7_i32_104 = arith.constant 7 : i32
    %c7_i32_105 = arith.constant 7 : i32
    %351 = arith.subi %c7_i32_105, %c7_i32_104 : i32
    %cst_106 = arith.constant dense<0.000000e+00> : vector<16x128xf32>
    %352 = tpu.matmul %340, %13, %cst_106 {dimension_numbers = #tpu.dot_dimension_numbers<[1], [0], [0], [1], [0, 0, 1, 1], [], []>} : vector<16x16xf32>, vector<16x128xf32>, vector<16x128xf32> -> vector<16x128xf32>
    %353 = arith.index_cast %c7_i32_104 : i32 to index
    %c0_107 = arith.constant 0 : index
    %c0_108 = arith.constant 0 : index
    %354 = vector.load %arg6[%353, %c0_107, %c0_108] : memref<8x8x64xf32, #tpu.memory_space<vmem>>, vector<1x8x64xf32>
    %355 = vector.shape_cast %354 : vector<1x8x64xf32> to vector<8x64xf32>
    %356 = vector.extract_strided_slice %352 {offsets = [0, 0], sizes = [8, 64], strides = [1, 1]} : vector<16x128xf32> to vector<8x64xf32>
    %357 = arith.addf %355, %356 : vector<8x64xf32>
    %358 = arith.index_cast %351 : i32 to index
    %c0_109 = arith.constant 0 : index
    %c0_110 = arith.constant 0 : index
    %359 = vector.load %arg7[%358, %c0_109, %c0_110] : memref<8x8x64xf32, #tpu.memory_space<vmem>>, vector<1x8x64xf32>
    %360 = vector.shape_cast %359 : vector<1x8x64xf32> to vector<8x64xf32>
    %361 = vector.extract_strided_slice %352 {offsets = [8, 64], sizes = [8, 64], strides = [1, 1]} : vector<16x128xf32> to vector<8x64xf32>
    %362 = arith.addf %360, %361 : vector<8x64xf32>
    %363 = tpu.concatenate %357, %362 in 0 : vector<8x64xf32>, vector<8x64xf32> -> vector<16x64xf32>
    %364 = vector.extract_strided_slice %363 {offsets = [0, 0], sizes = [16, 16], strides = [1, 1]} : vector<16x64xf32> to vector<16x16xf32>
    %365 = arith.negf %364 : vector<16x16xf32>
    %366 = math.exp %365 : vector<16x16xf32>
    %cst_111 = arith.constant 1.000000e+00 : f32
    %367 = vector.broadcast %cst_111 : f32 to vector<16x16xf32>
    %368 = arith.addf %367, %366 : vector<16x16xf32>
    %369 = arith.divf %367, %368 : vector<16x16xf32>
    %370 = vector.extract_strided_slice %363 {offsets = [0, 16], sizes = [16, 16], strides = [1, 1]} : vector<16x64xf32> to vector<16x16xf32>
    %371 = arith.negf %370 : vector<16x16xf32>
    %372 = math.exp %371 : vector<16x16xf32>
    %cst_112 = arith.constant 1.000000e+00 : f32
    %373 = vector.broadcast %cst_112 : f32 to vector<16x16xf32>
    %374 = arith.addf %373, %372 : vector<16x16xf32>
    %375 = arith.divf %373, %374 : vector<16x16xf32>
    %376 = vector.extract_strided_slice %363 {offsets = [0, 32], sizes = [16, 16], strides = [1, 1]} : vector<16x64xf32> to vector<16x16xf32>
    %377 = math.tanh %376 : vector<16x16xf32>
    %378 = vector.extract_strided_slice %363 {offsets = [0, 48], sizes = [16, 16], strides = [1, 1]} : vector<16x64xf32> to vector<16x16xf32>
    %379 = arith.negf %378 : vector<16x16xf32>
    %380 = math.exp %379 : vector<16x16xf32>
    %cst_113 = arith.constant 1.000000e+00 : f32
    %381 = vector.broadcast %cst_113 : f32 to vector<16x16xf32>
    %382 = arith.addf %381, %380 : vector<16x16xf32>
    %383 = arith.divf %381, %382 : vector<16x16xf32>
    %384 = arith.mulf %375, %338 : vector<16x16xf32>
    %385 = arith.mulf %369, %377 : vector<16x16xf32>
    %386 = arith.addf %384, %385 : vector<16x16xf32>
    %387 = math.tanh %386 : vector<16x16xf32>
    %388 = arith.mulf %383, %387 : vector<16x16xf32>
    %389 = vector.extract_strided_slice %388 {offsets = [0, 0], sizes = [8, 16], strides = [1, 1]} : vector<16x16xf32> to vector<8x16xf32>
    %390 = arith.index_cast %c7_i32_104 : i32 to index
    %c0_114 = arith.constant 0 : index
    %c0_115 = arith.constant 0 : index
    %391 = vector.load %arg5[%390, %c0_114, %c0_115] : memref<8x8x32xf32, #tpu.memory_space<vmem>>, vector<1x8x16xf32>
    %392 = vector.shape_cast %391 : vector<1x8x16xf32> to vector<8x16xf32>
    %393 = vector.shape_cast %389 : vector<8x16xf32> to vector<1x8x16xf32>
    tpu.vector_store %arg5[%390, %c0_114, %c0_115], %393 {strides = array<i32>} : memref<8x8x32xf32, #tpu.memory_space<vmem>>, vector<1x8x16xf32>,
    %394 = vector.extract_strided_slice %388 {offsets = [8, 0], sizes = [8, 16], strides = [1, 1]} : vector<16x16xf32> to vector<8x16xf32>
    %395 = arith.index_cast %351 : i32 to index
    %c0_116 = arith.constant 0 : index
    %c16_117 = arith.constant 16 : index
    %396 = vector.load %arg5[%395, %c0_116, %c16_117] : memref<8x8x32xf32, #tpu.memory_space<vmem>>, vector<1x8x16xf32>
    %397 = vector.shape_cast %396 : vector<1x8x16xf32> to vector<8x16xf32>
    %398 = vector.shape_cast %394 : vector<8x16xf32> to vector<1x8x16xf32>
    tpu.vector_store %arg5[%395, %c0_116, %c16_117], %398 {strides = array<i32>} : memref<8x8x32xf32, #tpu.memory_space<vmem>>, vector<1x8x16xf32>,
    %c8_i32 = arith.constant 8 : i32
    return
  }
  func.func @transform_0(%arg0: i32) -> (i32, i32, i32) {
    %c0_i32 = arith.constant 0 : i32
    %c0_i32_0 = arith.constant 0 : i32
    %c0_i32_1 = arith.constant 0 : i32
    return %c0_i32, %arg0, %c0_i32_0 : i32, i32, i32
  }
  func.func @transform_1(%arg0: i32) -> (i32, i32) {
    %c0_i32 = arith.constant 0 : i32
    %c0_i32_0 = arith.constant 0 : i32
    %c0_i32_1 = arith.constant 0 : i32
    return %c0_i32, %c0_i32_0 : i32, i32
  }
  func.func @transform_2(%arg0: i32) -> (i32, i32) {
    %c0_i32 = arith.constant 0 : i32
    %c0_i32_0 = arith.constant 0 : i32
    %c0_i32_1 = arith.constant 0 : i32
    return %c0_i32, %c0_i32_0 : i32, i32
  }
  func.func @transform_3(%arg0: i32) -> (i32, i32) {
    %c0_i32 = arith.constant 0 : i32
    %c0_i32_0 = arith.constant 0 : i32
    %c0_i32_1 = arith.constant 0 : i32
    return %c0_i32, %c0_i32_0 : i32, i32
  }
  func.func @transform_4(%arg0: i32) -> (i32, i32, i32) {
    %c0_i32 = arith.constant 0 : i32
    %c0_i32_0 = arith.constant 0 : i32
    %c0_i32_1 = arith.constant 0 : i32
    return %c0_i32, %arg0, %c0_i32_0 : i32, i32, i32
  }
}

module attributes {stable_mosaic.version = 11 : i64} {
  func.func @_bilstm_kernel(%arg0: i32, %arg1: memref<4x2x32xf32, #tpu.memory_space<vmem>>, %arg2: memref<32x128xf32, #tpu.memory_space<vmem>>, %arg3: memref<16x128xf32, #tpu.memory_space<vmem>>, %arg4: memref<1x128xf32, #tpu.memory_space<vmem>>, %arg5: memref<4x2x32xf32, #tpu.memory_space<vmem>>, %arg6: memref<4x2x64xf32, #tpu.memory_space<vmem>>, %arg7: memref<4x2x64xf32, #tpu.memory_space<vmem>>) attributes {dimension_semantics = [#tpu.dimension_semantics<parallel>], iteration_bounds = array<i64: 1>, scalar_prefetch = 0 : i64, scratch_operands = 2 : i64, tpu.core_type = #tpu.core_type<tc>, window_params = [{transform_indices = @transform_0, window_bounds = array<i64: 4, 2, 32>}, {pipeline_mode = #tpu.pipeline_mode<synchronous>, transform_indices = @transform_1, window_bounds = array<i64: 32, 128>}, {pipeline_mode = #tpu.pipeline_mode<synchronous>, transform_indices = @transform_2, window_bounds = array<i64: 16, 128>}, {pipeline_mode = #tpu.pipeline_mode<synchronous>, transform_indices = @transform_3, window_bounds = array<i64: 1, 128>}, {transform_indices = @transform_4, window_bounds = array<i64: 4, 2, 32>}]} {
    %c0 = arith.constant 0 : index
    %c0_0 = arith.constant 0 : index
    %c0_1 = arith.constant 0 : index
    %0 = vector.load %arg1[%c0, %c0_0, %c0_1] : memref<4x2x32xf32, #tpu.memory_space<vmem>>, vector<4x2x32xf32>
    %1 = vector.shape_cast %0 : vector<4x2x32xf32> to vector<8x32xf32>
    %c0_2 = arith.constant 0 : index
    %c0_3 = arith.constant 0 : index
    %2 = vector.load %arg2[%c0_2, %c0_3] : memref<32x128xf32, #tpu.memory_space<vmem>>, vector<32x128xf32>
    %cst = arith.constant dense<0.000000e+00> : vector<8x128xf32>
    %3 = tpu.matmul %1, %2, %cst {dimension_numbers = #tpu.dot_dimension_numbers<[1], [0], [0], [1], [0, 0, 1, 1], [], []>} : vector<8x32xf32>, vector<32x128xf32>, vector<8x128xf32> -> vector<8x128xf32>
    %c0_4 = arith.constant 0 : index
    %c0_5 = arith.constant 0 : index
    %4 = vector.load %arg4[%c0_4, %c0_5] : memref<1x128xf32, #tpu.memory_space<vmem>>, vector<1x128xf32>
    %5 = vector.broadcast %4 : vector<1x128xf32> to vector<8x128xf32>
    %6 = arith.addf %3, %5 : vector<8x128xf32>
    %7 = vector.extract_strided_slice %6 {offsets = [0, 0], sizes = [8, 64], strides = [1, 1]} : vector<8x128xf32> to vector<8x64xf32>
    %8 = vector.shape_cast %7 : vector<8x64xf32> to vector<4x2x64xf32>
    %c0_6 = arith.constant 0 : index
    %c0_7 = arith.constant 0 : index
    %c0_8 = arith.constant 0 : index
    %9 = vector.load %arg6[%c0_6, %c0_7, %c0_8] : memref<4x2x64xf32, #tpu.memory_space<vmem>>, vector<4x2x64xf32>
    tpu.vector_store %arg6[%c0_6, %c0_7, %c0_8], %8 {strides = array<i32>} : memref<4x2x64xf32, #tpu.memory_space<vmem>>, vector<4x2x64xf32>,
    %10 = vector.extract_strided_slice %6 {offsets = [0, 64], sizes = [8, 64], strides = [1, 1]} : vector<8x128xf32> to vector<8x64xf32>
    %11 = vector.shape_cast %10 : vector<8x64xf32> to vector<4x2x64xf32>
    %c0_9 = arith.constant 0 : index
    %c0_10 = arith.constant 0 : index
    %c0_11 = arith.constant 0 : index
    %12 = vector.load %arg7[%c0_9, %c0_10, %c0_11] : memref<4x2x64xf32, #tpu.memory_space<vmem>>, vector<4x2x64xf32>
    tpu.vector_store %arg7[%c0_9, %c0_10, %c0_11], %11 {strides = array<i32>} : memref<4x2x64xf32, #tpu.memory_space<vmem>>, vector<4x2x64xf32>,
    %c0_12 = arith.constant 0 : index
    %c0_13 = arith.constant 0 : index
    %13 = vector.load %arg3[%c0_12, %c0_13] : memref<16x128xf32, #tpu.memory_space<vmem>>, vector<16x128xf32>
    %cst_14 = arith.constant 0.000000e+00 : f32
    %14 = vector.broadcast %cst_14 : f32 to vector<4x16xf32>
    %c0_i32 = arith.constant 0 : i32
    %c3_i32 = arith.constant 3 : i32
    %15 = arith.subi %c3_i32, %c0_i32 : i32
    %cst_15 = arith.constant dense<0.000000e+00> : vector<4x128xf32>
    %16 = tpu.matmul %14, %13, %cst_15 {dimension_numbers = #tpu.dot_dimension_numbers<[1], [0], [0], [1], [0, 0, 1, 1], [], []>} : vector<4x16xf32>, vector<16x128xf32>, vector<4x128xf32> -> vector<4x128xf32>
    %17 = arith.index_cast %c0_i32 : i32 to index
    %c0_16 = arith.constant 0 : index
    %c0_17 = arith.constant 0 : index
    %18 = vector.load %arg6[%17, %c0_16, %c0_17] : memref<4x2x64xf32, #tpu.memory_space<vmem>>, vector<1x2x64xf32>
    %19 = vector.shape_cast %18 : vector<1x2x64xf32> to vector<2x64xf32>
    %20 = vector.extract_strided_slice %16 {offsets = [0, 0], sizes = [2, 64], strides = [1, 1]} : vector<4x128xf32> to vector<2x64xf32>
    %21 = arith.addf %19, %20 : vector<2x64xf32>
    %22 = arith.index_cast %15 : i32 to index
    %c0_18 = arith.constant 0 : index
    %c0_19 = arith.constant 0 : index
    %23 = vector.load %arg7[%22, %c0_18, %c0_19] : memref<4x2x64xf32, #tpu.memory_space<vmem>>, vector<1x2x64xf32>
    %24 = vector.shape_cast %23 : vector<1x2x64xf32> to vector<2x64xf32>
    %25 = vector.extract_strided_slice %16 {offsets = [2, 64], sizes = [2, 64], strides = [1, 1]} : vector<4x128xf32> to vector<2x64xf32>
    %26 = arith.addf %24, %25 : vector<2x64xf32>
    %27 = tpu.concatenate %21, %26 in 0 : vector<2x64xf32>, vector<2x64xf32> -> vector<4x64xf32>
    %28 = vector.extract_strided_slice %27 {offsets = [0, 0], sizes = [4, 16], strides = [1, 1]} : vector<4x64xf32> to vector<4x16xf32>
    %29 = arith.negf %28 : vector<4x16xf32>
    %30 = math.exp %29 : vector<4x16xf32>
    %cst_20 = arith.constant 1.000000e+00 : f32
    %31 = vector.broadcast %cst_20 : f32 to vector<4x16xf32>
    %32 = arith.addf %31, %30 : vector<4x16xf32>
    %33 = arith.divf %31, %32 : vector<4x16xf32>
    %34 = vector.extract_strided_slice %27 {offsets = [0, 16], sizes = [4, 16], strides = [1, 1]} : vector<4x64xf32> to vector<4x16xf32>
    %35 = arith.negf %34 : vector<4x16xf32>
    %36 = math.exp %35 : vector<4x16xf32>
    %cst_21 = arith.constant 1.000000e+00 : f32
    %37 = vector.broadcast %cst_21 : f32 to vector<4x16xf32>
    %38 = arith.addf %37, %36 : vector<4x16xf32>
    %39 = arith.divf %37, %38 : vector<4x16xf32>
    %40 = vector.extract_strided_slice %27 {offsets = [0, 32], sizes = [4, 16], strides = [1, 1]} : vector<4x64xf32> to vector<4x16xf32>
    %41 = math.tanh %40 : vector<4x16xf32>
    %42 = vector.extract_strided_slice %27 {offsets = [0, 48], sizes = [4, 16], strides = [1, 1]} : vector<4x64xf32> to vector<4x16xf32>
    %43 = arith.negf %42 : vector<4x16xf32>
    %44 = math.exp %43 : vector<4x16xf32>
    %cst_22 = arith.constant 1.000000e+00 : f32
    %45 = vector.broadcast %cst_22 : f32 to vector<4x16xf32>
    %46 = arith.addf %45, %44 : vector<4x16xf32>
    %47 = arith.divf %45, %46 : vector<4x16xf32>
    %48 = arith.mulf %39, %14 : vector<4x16xf32>
    %49 = arith.mulf %33, %41 : vector<4x16xf32>
    %50 = arith.addf %48, %49 : vector<4x16xf32>
    %51 = math.tanh %50 : vector<4x16xf32>
    %52 = arith.mulf %47, %51 : vector<4x16xf32>
    %53 = vector.extract_strided_slice %52 {offsets = [0, 0], sizes = [2, 16], strides = [1, 1]} : vector<4x16xf32> to vector<2x16xf32>
    %54 = arith.index_cast %c0_i32 : i32 to index
    %c0_23 = arith.constant 0 : index
    %c0_24 = arith.constant 0 : index
    %55 = vector.load %arg5[%54, %c0_23, %c0_24] : memref<4x2x32xf32, #tpu.memory_space<vmem>>, vector<1x2x16xf32>
    %56 = vector.shape_cast %55 : vector<1x2x16xf32> to vector<2x16xf32>
    %57 = vector.shape_cast %53 : vector<2x16xf32> to vector<1x2x16xf32>
    tpu.vector_store %arg5[%54, %c0_23, %c0_24], %57 {strides = array<i32>} : memref<4x2x32xf32, #tpu.memory_space<vmem>>, vector<1x2x16xf32>,
    %58 = vector.extract_strided_slice %52 {offsets = [2, 0], sizes = [2, 16], strides = [1, 1]} : vector<4x16xf32> to vector<2x16xf32>
    %59 = arith.index_cast %15 : i32 to index
    %c0_25 = arith.constant 0 : index
    %c16 = arith.constant 16 : index
    %60 = vector.load %arg5[%59, %c0_25, %c16] : memref<4x2x32xf32, #tpu.memory_space<vmem>>, vector<1x2x16xf32>
    %61 = vector.shape_cast %60 : vector<1x2x16xf32> to vector<2x16xf32>
    %62 = vector.shape_cast %58 : vector<2x16xf32> to vector<1x2x16xf32>
    tpu.vector_store %arg5[%59, %c0_25, %c16], %62 {strides = array<i32>} : memref<4x2x32xf32, #tpu.memory_space<vmem>>, vector<1x2x16xf32>,
    %c1_i32 = arith.constant 1 : i32
    %c3_i32_26 = arith.constant 3 : i32
    %63 = arith.subi %c3_i32_26, %c1_i32 : i32
    %cst_27 = arith.constant dense<0.000000e+00> : vector<4x128xf32>
    %64 = tpu.matmul %52, %13, %cst_27 {dimension_numbers = #tpu.dot_dimension_numbers<[1], [0], [0], [1], [0, 0, 1, 1], [], []>} : vector<4x16xf32>, vector<16x128xf32>, vector<4x128xf32> -> vector<4x128xf32>
    %65 = arith.index_cast %c1_i32 : i32 to index
    %c0_28 = arith.constant 0 : index
    %c0_29 = arith.constant 0 : index
    %66 = vector.load %arg6[%65, %c0_28, %c0_29] : memref<4x2x64xf32, #tpu.memory_space<vmem>>, vector<1x2x64xf32>
    %67 = vector.shape_cast %66 : vector<1x2x64xf32> to vector<2x64xf32>
    %68 = vector.extract_strided_slice %64 {offsets = [0, 0], sizes = [2, 64], strides = [1, 1]} : vector<4x128xf32> to vector<2x64xf32>
    %69 = arith.addf %67, %68 : vector<2x64xf32>
    %70 = arith.index_cast %63 : i32 to index
    %c0_30 = arith.constant 0 : index
    %c0_31 = arith.constant 0 : index
    %71 = vector.load %arg7[%70, %c0_30, %c0_31] : memref<4x2x64xf32, #tpu.memory_space<vmem>>, vector<1x2x64xf32>
    %72 = vector.shape_cast %71 : vector<1x2x64xf32> to vector<2x64xf32>
    %73 = vector.extract_strided_slice %64 {offsets = [2, 64], sizes = [2, 64], strides = [1, 1]} : vector<4x128xf32> to vector<2x64xf32>
    %74 = arith.addf %72, %73 : vector<2x64xf32>
    %75 = tpu.concatenate %69, %74 in 0 : vector<2x64xf32>, vector<2x64xf32> -> vector<4x64xf32>
    %76 = vector.extract_strided_slice %75 {offsets = [0, 0], sizes = [4, 16], strides = [1, 1]} : vector<4x64xf32> to vector<4x16xf32>
    %77 = arith.negf %76 : vector<4x16xf32>
    %78 = math.exp %77 : vector<4x16xf32>
    %cst_32 = arith.constant 1.000000e+00 : f32
    %79 = vector.broadcast %cst_32 : f32 to vector<4x16xf32>
    %80 = arith.addf %79, %78 : vector<4x16xf32>
    %81 = arith.divf %79, %80 : vector<4x16xf32>
    %82 = vector.extract_strided_slice %75 {offsets = [0, 16], sizes = [4, 16], strides = [1, 1]} : vector<4x64xf32> to vector<4x16xf32>
    %83 = arith.negf %82 : vector<4x16xf32>
    %84 = math.exp %83 : vector<4x16xf32>
    %cst_33 = arith.constant 1.000000e+00 : f32
    %85 = vector.broadcast %cst_33 : f32 to vector<4x16xf32>
    %86 = arith.addf %85, %84 : vector<4x16xf32>
    %87 = arith.divf %85, %86 : vector<4x16xf32>
    %88 = vector.extract_strided_slice %75 {offsets = [0, 32], sizes = [4, 16], strides = [1, 1]} : vector<4x64xf32> to vector<4x16xf32>
    %89 = math.tanh %88 : vector<4x16xf32>
    %90 = vector.extract_strided_slice %75 {offsets = [0, 48], sizes = [4, 16], strides = [1, 1]} : vector<4x64xf32> to vector<4x16xf32>
    %91 = arith.negf %90 : vector<4x16xf32>
    %92 = math.exp %91 : vector<4x16xf32>
    %cst_34 = arith.constant 1.000000e+00 : f32
    %93 = vector.broadcast %cst_34 : f32 to vector<4x16xf32>
    %94 = arith.addf %93, %92 : vector<4x16xf32>
    %95 = arith.divf %93, %94 : vector<4x16xf32>
    %96 = arith.mulf %87, %50 : vector<4x16xf32>
    %97 = arith.mulf %81, %89 : vector<4x16xf32>
    %98 = arith.addf %96, %97 : vector<4x16xf32>
    %99 = math.tanh %98 : vector<4x16xf32>
    %100 = arith.mulf %95, %99 : vector<4x16xf32>
    %101 = vector.extract_strided_slice %100 {offsets = [0, 0], sizes = [2, 16], strides = [1, 1]} : vector<4x16xf32> to vector<2x16xf32>
    %102 = arith.index_cast %c1_i32 : i32 to index
    %c0_35 = arith.constant 0 : index
    %c0_36 = arith.constant 0 : index
    %103 = vector.load %arg5[%102, %c0_35, %c0_36] : memref<4x2x32xf32, #tpu.memory_space<vmem>>, vector<1x2x16xf32>
    %104 = vector.shape_cast %103 : vector<1x2x16xf32> to vector<2x16xf32>
    %105 = vector.shape_cast %101 : vector<2x16xf32> to vector<1x2x16xf32>
    tpu.vector_store %arg5[%102, %c0_35, %c0_36], %105 {strides = array<i32>} : memref<4x2x32xf32, #tpu.memory_space<vmem>>, vector<1x2x16xf32>,
    %106 = vector.extract_strided_slice %100 {offsets = [2, 0], sizes = [2, 16], strides = [1, 1]} : vector<4x16xf32> to vector<2x16xf32>
    %107 = arith.index_cast %63 : i32 to index
    %c0_37 = arith.constant 0 : index
    %c16_38 = arith.constant 16 : index
    %108 = vector.load %arg5[%107, %c0_37, %c16_38] : memref<4x2x32xf32, #tpu.memory_space<vmem>>, vector<1x2x16xf32>
    %109 = vector.shape_cast %108 : vector<1x2x16xf32> to vector<2x16xf32>
    %110 = vector.shape_cast %106 : vector<2x16xf32> to vector<1x2x16xf32>
    tpu.vector_store %arg5[%107, %c0_37, %c16_38], %110 {strides = array<i32>} : memref<4x2x32xf32, #tpu.memory_space<vmem>>, vector<1x2x16xf32>,
    %c2_i32 = arith.constant 2 : i32
    %c3_i32_39 = arith.constant 3 : i32
    %111 = arith.subi %c3_i32_39, %c2_i32 : i32
    %cst_40 = arith.constant dense<0.000000e+00> : vector<4x128xf32>
    %112 = tpu.matmul %100, %13, %cst_40 {dimension_numbers = #tpu.dot_dimension_numbers<[1], [0], [0], [1], [0, 0, 1, 1], [], []>} : vector<4x16xf32>, vector<16x128xf32>, vector<4x128xf32> -> vector<4x128xf32>
    %113 = arith.index_cast %c2_i32 : i32 to index
    %c0_41 = arith.constant 0 : index
    %c0_42 = arith.constant 0 : index
    %114 = vector.load %arg6[%113, %c0_41, %c0_42] : memref<4x2x64xf32, #tpu.memory_space<vmem>>, vector<1x2x64xf32>
    %115 = vector.shape_cast %114 : vector<1x2x64xf32> to vector<2x64xf32>
    %116 = vector.extract_strided_slice %112 {offsets = [0, 0], sizes = [2, 64], strides = [1, 1]} : vector<4x128xf32> to vector<2x64xf32>
    %117 = arith.addf %115, %116 : vector<2x64xf32>
    %118 = arith.index_cast %111 : i32 to index
    %c0_43 = arith.constant 0 : index
    %c0_44 = arith.constant 0 : index
    %119 = vector.load %arg7[%118, %c0_43, %c0_44] : memref<4x2x64xf32, #tpu.memory_space<vmem>>, vector<1x2x64xf32>
    %120 = vector.shape_cast %119 : vector<1x2x64xf32> to vector<2x64xf32>
    %121 = vector.extract_strided_slice %112 {offsets = [2, 64], sizes = [2, 64], strides = [1, 1]} : vector<4x128xf32> to vector<2x64xf32>
    %122 = arith.addf %120, %121 : vector<2x64xf32>
    %123 = tpu.concatenate %117, %122 in 0 : vector<2x64xf32>, vector<2x64xf32> -> vector<4x64xf32>
    %124 = vector.extract_strided_slice %123 {offsets = [0, 0], sizes = [4, 16], strides = [1, 1]} : vector<4x64xf32> to vector<4x16xf32>
    %125 = arith.negf %124 : vector<4x16xf32>
    %126 = math.exp %125 : vector<4x16xf32>
    %cst_45 = arith.constant 1.000000e+00 : f32
    %127 = vector.broadcast %cst_45 : f32 to vector<4x16xf32>
    %128 = arith.addf %127, %126 : vector<4x16xf32>
    %129 = arith.divf %127, %128 : vector<4x16xf32>
    %130 = vector.extract_strided_slice %123 {offsets = [0, 16], sizes = [4, 16], strides = [1, 1]} : vector<4x64xf32> to vector<4x16xf32>
    %131 = arith.negf %130 : vector<4x16xf32>
    %132 = math.exp %131 : vector<4x16xf32>
    %cst_46 = arith.constant 1.000000e+00 : f32
    %133 = vector.broadcast %cst_46 : f32 to vector<4x16xf32>
    %134 = arith.addf %133, %132 : vector<4x16xf32>
    %135 = arith.divf %133, %134 : vector<4x16xf32>
    %136 = vector.extract_strided_slice %123 {offsets = [0, 32], sizes = [4, 16], strides = [1, 1]} : vector<4x64xf32> to vector<4x16xf32>
    %137 = math.tanh %136 : vector<4x16xf32>
    %138 = vector.extract_strided_slice %123 {offsets = [0, 48], sizes = [4, 16], strides = [1, 1]} : vector<4x64xf32> to vector<4x16xf32>
    %139 = arith.negf %138 : vector<4x16xf32>
    %140 = math.exp %139 : vector<4x16xf32>
    %cst_47 = arith.constant 1.000000e+00 : f32
    %141 = vector.broadcast %cst_47 : f32 to vector<4x16xf32>
    %142 = arith.addf %141, %140 : vector<4x16xf32>
    %143 = arith.divf %141, %142 : vector<4x16xf32>
    %144 = arith.mulf %135, %98 : vector<4x16xf32>
    %145 = arith.mulf %129, %137 : vector<4x16xf32>
    %146 = arith.addf %144, %145 : vector<4x16xf32>
    %147 = math.tanh %146 : vector<4x16xf32>
    %148 = arith.mulf %143, %147 : vector<4x16xf32>
    %149 = vector.extract_strided_slice %148 {offsets = [0, 0], sizes = [2, 16], strides = [1, 1]} : vector<4x16xf32> to vector<2x16xf32>
    %150 = arith.index_cast %c2_i32 : i32 to index
    %c0_48 = arith.constant 0 : index
    %c0_49 = arith.constant 0 : index
    %151 = vector.load %arg5[%150, %c0_48, %c0_49] : memref<4x2x32xf32, #tpu.memory_space<vmem>>, vector<1x2x16xf32>
    %152 = vector.shape_cast %151 : vector<1x2x16xf32> to vector<2x16xf32>
    %153 = vector.shape_cast %149 : vector<2x16xf32> to vector<1x2x16xf32>
    tpu.vector_store %arg5[%150, %c0_48, %c0_49], %153 {strides = array<i32>} : memref<4x2x32xf32, #tpu.memory_space<vmem>>, vector<1x2x16xf32>,
    %154 = vector.extract_strided_slice %148 {offsets = [2, 0], sizes = [2, 16], strides = [1, 1]} : vector<4x16xf32> to vector<2x16xf32>
    %155 = arith.index_cast %111 : i32 to index
    %c0_50 = arith.constant 0 : index
    %c16_51 = arith.constant 16 : index
    %156 = vector.load %arg5[%155, %c0_50, %c16_51] : memref<4x2x32xf32, #tpu.memory_space<vmem>>, vector<1x2x16xf32>
    %157 = vector.shape_cast %156 : vector<1x2x16xf32> to vector<2x16xf32>
    %158 = vector.shape_cast %154 : vector<2x16xf32> to vector<1x2x16xf32>
    tpu.vector_store %arg5[%155, %c0_50, %c16_51], %158 {strides = array<i32>} : memref<4x2x32xf32, #tpu.memory_space<vmem>>, vector<1x2x16xf32>,
    %c3_i32_52 = arith.constant 3 : i32
    %c3_i32_53 = arith.constant 3 : i32
    %159 = arith.subi %c3_i32_53, %c3_i32_52 : i32
    %cst_54 = arith.constant dense<0.000000e+00> : vector<4x128xf32>
    %160 = tpu.matmul %148, %13, %cst_54 {dimension_numbers = #tpu.dot_dimension_numbers<[1], [0], [0], [1], [0, 0, 1, 1], [], []>} : vector<4x16xf32>, vector<16x128xf32>, vector<4x128xf32> -> vector<4x128xf32>
    %161 = arith.index_cast %c3_i32_52 : i32 to index
    %c0_55 = arith.constant 0 : index
    %c0_56 = arith.constant 0 : index
    %162 = vector.load %arg6[%161, %c0_55, %c0_56] : memref<4x2x64xf32, #tpu.memory_space<vmem>>, vector<1x2x64xf32>
    %163 = vector.shape_cast %162 : vector<1x2x64xf32> to vector<2x64xf32>
    %164 = vector.extract_strided_slice %160 {offsets = [0, 0], sizes = [2, 64], strides = [1, 1]} : vector<4x128xf32> to vector<2x64xf32>
    %165 = arith.addf %163, %164 : vector<2x64xf32>
    %166 = arith.index_cast %159 : i32 to index
    %c0_57 = arith.constant 0 : index
    %c0_58 = arith.constant 0 : index
    %167 = vector.load %arg7[%166, %c0_57, %c0_58] : memref<4x2x64xf32, #tpu.memory_space<vmem>>, vector<1x2x64xf32>
    %168 = vector.shape_cast %167 : vector<1x2x64xf32> to vector<2x64xf32>
    %169 = vector.extract_strided_slice %160 {offsets = [2, 64], sizes = [2, 64], strides = [1, 1]} : vector<4x128xf32> to vector<2x64xf32>
    %170 = arith.addf %168, %169 : vector<2x64xf32>
    %171 = tpu.concatenate %165, %170 in 0 : vector<2x64xf32>, vector<2x64xf32> -> vector<4x64xf32>
    %172 = vector.extract_strided_slice %171 {offsets = [0, 0], sizes = [4, 16], strides = [1, 1]} : vector<4x64xf32> to vector<4x16xf32>
    %173 = arith.negf %172 : vector<4x16xf32>
    %174 = math.exp %173 : vector<4x16xf32>
    %cst_59 = arith.constant 1.000000e+00 : f32
    %175 = vector.broadcast %cst_59 : f32 to vector<4x16xf32>
    %176 = arith.addf %175, %174 : vector<4x16xf32>
    %177 = arith.divf %175, %176 : vector<4x16xf32>
    %178 = vector.extract_strided_slice %171 {offsets = [0, 16], sizes = [4, 16], strides = [1, 1]} : vector<4x64xf32> to vector<4x16xf32>
    %179 = arith.negf %178 : vector<4x16xf32>
    %180 = math.exp %179 : vector<4x16xf32>
    %cst_60 = arith.constant 1.000000e+00 : f32
    %181 = vector.broadcast %cst_60 : f32 to vector<4x16xf32>
    %182 = arith.addf %181, %180 : vector<4x16xf32>
    %183 = arith.divf %181, %182 : vector<4x16xf32>
    %184 = vector.extract_strided_slice %171 {offsets = [0, 32], sizes = [4, 16], strides = [1, 1]} : vector<4x64xf32> to vector<4x16xf32>
    %185 = math.tanh %184 : vector<4x16xf32>
    %186 = vector.extract_strided_slice %171 {offsets = [0, 48], sizes = [4, 16], strides = [1, 1]} : vector<4x64xf32> to vector<4x16xf32>
    %187 = arith.negf %186 : vector<4x16xf32>
    %188 = math.exp %187 : vector<4x16xf32>
    %cst_61 = arith.constant 1.000000e+00 : f32
    %189 = vector.broadcast %cst_61 : f32 to vector<4x16xf32>
    %190 = arith.addf %189, %188 : vector<4x16xf32>
    %191 = arith.divf %189, %190 : vector<4x16xf32>
    %192 = arith.mulf %183, %146 : vector<4x16xf32>
    %193 = arith.mulf %177, %185 : vector<4x16xf32>
    %194 = arith.addf %192, %193 : vector<4x16xf32>
    %195 = math.tanh %194 : vector<4x16xf32>
    %196 = arith.mulf %191, %195 : vector<4x16xf32>
    %197 = vector.extract_strided_slice %196 {offsets = [0, 0], sizes = [2, 16], strides = [1, 1]} : vector<4x16xf32> to vector<2x16xf32>
    %198 = arith.index_cast %c3_i32_52 : i32 to index
    %c0_62 = arith.constant 0 : index
    %c0_63 = arith.constant 0 : index
    %199 = vector.load %arg5[%198, %c0_62, %c0_63] : memref<4x2x32xf32, #tpu.memory_space<vmem>>, vector<1x2x16xf32>
    %200 = vector.shape_cast %199 : vector<1x2x16xf32> to vector<2x16xf32>
    %201 = vector.shape_cast %197 : vector<2x16xf32> to vector<1x2x16xf32>
    tpu.vector_store %arg5[%198, %c0_62, %c0_63], %201 {strides = array<i32>} : memref<4x2x32xf32, #tpu.memory_space<vmem>>, vector<1x2x16xf32>,
    %202 = vector.extract_strided_slice %196 {offsets = [2, 0], sizes = [2, 16], strides = [1, 1]} : vector<4x16xf32> to vector<2x16xf32>
    %203 = arith.index_cast %159 : i32 to index
    %c0_64 = arith.constant 0 : index
    %c16_65 = arith.constant 16 : index
    %204 = vector.load %arg5[%203, %c0_64, %c16_65] : memref<4x2x32xf32, #tpu.memory_space<vmem>>, vector<1x2x16xf32>
    %205 = vector.shape_cast %204 : vector<1x2x16xf32> to vector<2x16xf32>
    %206 = vector.shape_cast %202 : vector<2x16xf32> to vector<1x2x16xf32>
    tpu.vector_store %arg5[%203, %c0_64, %c16_65], %206 {strides = array<i32>} : memref<4x2x32xf32, #tpu.memory_space<vmem>>, vector<1x2x16xf32>,
    %c4_i32 = arith.constant 4 : i32
    return
  }
  func.func @transform_0(%arg0: i32) -> (i32, i32, i32) {
    %c0_i32 = arith.constant 0 : i32
    %c0_i32_0 = arith.constant 0 : i32
    %c0_i32_1 = arith.constant 0 : i32
    return %c0_i32, %arg0, %c0_i32_0 : i32, i32, i32
  }
  func.func @transform_1(%arg0: i32) -> (i32, i32) {
    %c0_i32 = arith.constant 0 : i32
    %c0_i32_0 = arith.constant 0 : i32
    %c0_i32_1 = arith.constant 0 : i32
    return %c0_i32, %c0_i32_0 : i32, i32
  }
  func.func @transform_2(%arg0: i32) -> (i32, i32) {
    %c0_i32 = arith.constant 0 : i32
    %c0_i32_0 = arith.constant 0 : i32
    %c0_i32_1 = arith.constant 0 : i32
    return %c0_i32, %c0_i32_0 : i32, i32
  }
  func.func @transform_3(%arg0: i32) -> (i32, i32) {
    %c0_i32 = arith.constant 0 : i32
    %c0_i32_0 = arith.constant 0 : i32
    %c0_i32_1 = arith.constant 0 : i32
    return %c0_i32, %c0_i32_0 : i32, i32
  }
  func.func @transform_4(%arg0: i32) -> (i32, i32, i32) {
    %c0_i32 = arith.constant 0 : i32
    %c0_i32_0 = arith.constant 0 : i32
    %c0_i32_1 = arith.constant 0 : i32
    return %c0_i32, %arg0, %c0_i32_0 : i32, i32, i32
  }
}

</mosaic_0001>

<bundles_post_ra>
// kernel: dec_forward.5
= control target key start
LH: loop header
LB: loop body
LE: loop exit
PB: predicated region body
PF: predicated region fallthrough
CT: control target
= control target key end

     0   :  { %v41_v0 = vlaneseq  ;;  %v800_v1 = vmov 0.0   ;;  %vm801_vm0 = vmmov 0   ;;  %v802_v4 = vmov 1983009808   ;;  %s804_s8 = smov 96   ;;  %s805_s9 = smov 16   ;;  %s1004_s1 = inlined_call_operand.vmem [shape: f32[32,128], index: 1, kind: input, shape index: {}]   ;;  %s1005_s0 = inlined_call_operand.vmem [shape: f32[4,2,32], index: 0, kind: input, shape index: {}]   ;;  %s1006_s2 = inlined_call_operand.vmem [shape: f32[16,128], index: 2, kind: input, shape index: {}]   ;;  %s1007_s3 = inlined_call_operand.vmem [shape: f32[1,128], index: 3, kind: input, shape index: {}]   ;;  %s1008_s4 = inlined_call_operand.vmem [shape: f32[4,2,32], index: 4, kind: output, shape index: {}]  }
   0x1   :  { %721 = vmatprep.subr.mxu0 %v800_v1  ;;  %v24_v2 = vld [vmem:[%s1004_s1 + $0x18] sm:$0xff]  ;;  %v23_v3 = vld [vmem:[%s1004_s1 + $0x10] sm:$0xff]  ;;  %729 = vmatprep.mubr.msk.f32.mxu0 %vm801_vm0, %v800_v1  ;;  %v39_v5 = vunpack.c.l.s4 %v802_v4  ;;  %v22_v6 = vld [vmem:[%s1004_s1 + $0x8] sm:$0xff]  ;;  %vm53_vm1 = vcmask 261120   ;;  %vm148_vm2 = vcmask 517120   ;;  %vm286_vm3 = vcmask 1041408  }
   0x2   :  { %722 = vmatpush3.msra.mxu0 %v24_v2  ;;  %v17_v7 = vld [vmem:[%s1005_s0] sm:$0x3]  ;;  %v18_v8 = vld [vmem:[%s1005_s0 + $0x2] sm:$0x3]  ;;  %v42_v9 = vshrl.u32 %v41_v0, 7  ;;  %732 = vmatprep.subr.mxu1 %v800_v1  ;;  %v862_v14 = vld [vmem:[%s1006_s2 + $0x8] sm:$0xff] }
   0x3   :  { %723 = vmatprep.subr.mxu0 %v800_v1  ;;  %v19_v10 = vld [vmem:[%s1005_s0 + $0x4] sm:$0x3]  ;;  %v20_v11 = vld [vmem:[%s1005_s0 + $0x6] sm:$0x3]  ;;  %v36_v12 = vcombine.low %v17_v7, %v18_v8  ;;  %v40_v13 = vunpack.c.0.s8 %v39_v5  ;;  %736 = vmatprep.mubr.msk.f32.mxu1 %vm801_vm0, %v800_v1  ;;  %v689_v23 = vld [vmem:[%s1007_s3] ss:$0 sm:$0xff] }
   0x4   :  { %724 = vmatpush3.msra.mxu0 %v23_v3  ;;  %v37_v15 = vcombine.low %v19_v10, %v20_v11  ;;  %733 = vmatpush3.msra.mxu1 %v862_v14  ;;  %v870_v16 = vld [vmem:[%s1006_s2] sm:$0xff]  ;;  %s803_s3 = smov 64   ;;  %s806_s10 = smov 32   ;;  %vm316_vm4 = vcmask 123904   ;;  %vm199_vm5 = vcmask 130048   ;;  %vm322_vm6 = vcmask 257154  }
   0x5   :  { %725 = vmatprep.subr.mxu0 %v800_v1  ;;  %v21_v17 = vld [vmem:[%s1004_s1] sm:$0xff]  ;;  %v876_v18 = vsub.s32 %v40_v13, %v42_v9  ;;  %734 = vmatprep.subr.mxu1 %v800_v1  ;;  %s807_s11 = smov 80  }
   0x6   :  { %726 = vmatpush3.msra.mxu0 %v22_v6  ;;  %735 = vmatpush3.msra.mxu1 %v870_v16 }
   0x7   :  { %727 = vmatprep.subr.mxu0 %v800_v1  ;;  %v44_v19 = vrot.slane %v36_v12, %v876_v18  ;;  %v51_v20 = vrot.slane %v37_v15, %v876_v18  ;;  %737 = vmatmul.mubr.f32.vlgmr.msra.gmra.mxu1 %v800_v1 }
   0x8   :  { %728 = vmatpush3.msra.mxu0 %v21_v17  ;;  %739 = vmatprep.subr.mxu1 %v800_v1 }
   0x9   :  { %v52_v21 = vcombine.low %v44_v19, %v51_v20  ;;  %740 = vmatpush3.msra.mxu1 %v862_v14  ;;  %743 = vmatprep.mubr.msk.f32.mxu1 %vm801_vm0, %v800_v1 }
   0xa   :  { %741 = vmatprep.subr.mxu1 %v800_v1  ;;  %746 = vmatprep.subr.mxu0 %v800_v1 }
   0xb   :  { %730 = vmatmul.mubr.msk.f32.vlgmr.msra.gmra.mxu0 %vm53_vm1, %v52_v21  ;;  %742 = vmatpush3.msra.mxu1 %v870_v16 }
   0xc   :  { %747 = vmatpush3.msra.mxu0 %v862_v14  ;;  %750 = vmatprep.mubr.msk.f32.mxu0 %vm801_vm0, %v800_v1 }
   0xd   :  { %748 = vmatprep.subr.mxu0 %v800_v1  ;;  %753 = vmatprep.subr.mxu1 %v800_v1 }
   0xe   :  { %749 = vmatpush3.msra.mxu0 %v870_v16 }
  0xc7   :  { %v269_v22 = vpop.f32.mrf.mxu1 }
  0xc8   :  { %v278_v34 = vrot.slane %v269_v22, 2 }
  0xc9   :  { %v738_v24 = vpop.f32.mrf.mxu1 }
  0xcb   :  { %v122_v25 = vpop.f32.mrf.mxu0 }
  0xcc   :  { %v123_v26 = vadd.f32 %v689_v23, %v122_v25 }
  0xcd   :  { %v731_v27 = vpop.f32.mrf.mxu0 }
  0xce   :  { %v127_v28 = vcombine.high %v123_v26, %v123_v26  ;;  %v901_v29 = vrot.slane %v123_v26, %v876_v18 }
  0xd0   :  { %v141_v30 = vrot.slane %v127_v28, %v876_v18  ;;  %v906_v31 = vcombine.high %v901_v29, %v901_v29  ;;  %149 = vst.msk [vmem:[#allocation2] sm:$0x3] %vm148_vm2, %v901_v29 }
  0xd2   :  { %150 = vst.msk [vmem:[#allocation2 + $0x2] sm:$0x3] %vm148_vm2, %v906_v31  ;;  %151 = vst.msk [vmem:[#allocation2 + $0x4] sm:$0x3] %vm148_vm2, %v141_v30  ;;  %v143_v32 = vcombine.high %v141_v30, %v141_v30  ;;  %v173_v54 = vrot.slane %v141_v30, %v876_v18 }
  0xd4   :  { %v180_v33 = vrot.slane %v143_v32, %v876_v18  ;;  %152 = vst.msk [vmem:[#allocation2 + $0x6] sm:$0x3] %vm148_vm2, %v143_v32 }
  0xd6   :  { %187 = vrot.lane.b32.xlu0 %v180_v33, %s803_s3 }
  0xd7   :  { %v273_v37 = vld [vmem:[#allocation2] sm:$0x3] }
  0xd8   :  { %v274_v40 = vadd.f32 %v273_v37, %v269_v22 }
  0xd9   :  { %v397_v2 = vld [vmem:[#allocation2 + $0x2] sm:$0x3]  ;;  %v519_v28 = vld [vmem:[#allocation2 + $0x4] sm:$0x3] }
  0xda   :  { %279 = vrot.lane.b32.xlu0 %v278_v34, %s803_s3 }
 0x148   :  { %v188_v35 = vpop.permute.xlu0 %187 }
 0x149   :  { %196 = vst.msk [vmem:[#allocation3 + $0x6] sm:$0x3] %vm148_vm2, %v188_v35 }
 0x14c   :  { %v280_v36 = vpop.permute.xlu0 %279 }
 0x150   :  { %v276_v38 = vld [vmem:[#allocation3 + $0x6] sm:$0x3] }
 0x151   :  { %v282_v39 = vadd.f32 %v280_v36, %v276_v38 }
 0x153   :  { %v284_v41 = vrot.slane %v282_v39, 6 }
 0x155   :  { %v287_v42 = vsel %vm286_vm3, %v274_v40, %v284_v41 }
 0x156   :  { %768 = vtanh.f32 %v287_v42  ;;  %v691_v44 = vmul.f32 -1.442695, %v287_v42 }
 0x158   :  { %770 = vpow2.f32 %v691_v44  ;;  %v159_v44 = vrot.slane %v901_v29, %v876_v18  ;;  %v639_v29 = vld [vmem:[#allocation2 + $0x6] sm:$0x3] }
 0x163   :  { %v769_v43 = vpop.eup %768 }
 0x164   :  { %297 = vrot.lane.b32.xlu1 %v769_v43, %s804_s8 }
 0x165   :  { %v771_v45 = vpop.eup %770 }
 0x166   :  { %v291_v46 = vadd.f32 1.0, %v771_v45 }
 0x168   :  { %772 = vrcp.f32 %v291_v46 }
 0x175   :  { %v773_v47 = vpop.eup %772 }
 0x176   :  { %v295_v50 = vmul.f32 0.0, %v773_v47 }
 0x1d6   :  { %v298_v48 = vpop.permute.xlu1 %297 }
 0x1d7   :  { %v300_v49 = vmul.f32 %v773_v47, %v298_v48 }
 0x1d9   :  { %302 = vrot.lane.b32.xlu1 %v300_v49, %s805_s9 }
 0x24b   :  { %v303_v51 = vpop.permute.xlu1 %302 }
 0x24c   :  { %v305_v52 = vadd.f32 %v303_v51, %v295_v50 }
 0x24e   :  { %774 = vtanh.f32 %v305_v52 }
 0x25b   :  { %v775_v53 = vpop.eup %774 }
 0x25c   :  { %308 = vrot.lane.b32.xlu0 %v775_v53, %s806_s10 }
 0x260   :  { %185 = vrot.lane.b32.xlu0 %v173_v54, %s803_s3 }
 0x2ce   :  { %v309_v55 = vpop.permute.xlu0 %308 }
 0x2cf   :  { %v924_v56 = vmul.f32 %v773_v47, %v309_v55 }
 0x2d1   :  { %313 = vrot.lane.b32.xlu1 %v924_v56, %s807_s11 }
 0x2d2   :  { %v186_v57 = vpop.permute.xlu0 %185 }
 0x2d3   :  { %195 = vst.msk [vmem:[#allocation3 + $0x4] sm:$0x3] %vm148_vm2, %v186_v57 }
 0x2da   :  { %v400_v63 = vld [vmem:[#allocation3 + $0x4] sm:$0x3] }
 0x343   :  { %v314_v58 = vpop.permute.xlu1 %313 }
 0x344   :  { %317 = vst.msk [vmem:[%s1008_s4] sm:$0x3] %vm316_vm4, %v314_v58  ;;  %744 = vmatmul.mubr.msk.f32.vlgmr.msra.gmra.mxu1 %vm199_vm5, %v314_v58 }
 0x345   :  { %754 = vmatpush3.msra.mxu1 %v862_v14  ;;  %757 = vmatprep.mubr.msk.f32.mxu1 %vm801_vm0, %v800_v1 }
 0x346   :  { %755 = vmatprep.subr.mxu1 %v800_v1 }
 0x347   :  { %756 = vmatpush3.msra.mxu1 %v870_v16  ;;  %v166_v16 = vrot.slane %v906_v31, %v876_v18 }
 0x404   :  { %v392_v59 = vpop.f32.mrf.mxu1 }
 0x405   :  { %v402_v60 = vrot.slane %v392_v59, 2  ;;  %v398_v3 = vadd.f32 %v397_v2, %v392_v59 }
 0x406   :  { %v745_v61 = vpop.f32.mrf.mxu1 }
 0x407   :  { %403 = vrot.lane.b32.xlu1 %v402_v60, %s803_s3 }
 0x479   :  { %v404_v62 = vpop.permute.xlu1 %403 }
 0x47a   :  { %v406_v0 = vadd.f32 %v404_v62, %v400_v63 }
 0x47c   :  { %v408_v4 = vrot.slane %v406_v0, 6 }
 0x47e   :  { %v410_v5 = vsel %vm286_vm3, %v398_v3, %v408_v4 }
 0x47f   :  { %776 = vtanh.f32 %v410_v5  ;;  %v694_v1 = vmul.f32 -1.442695, %v410_v5 }
 0x481   :  { %778 = vpow2.f32 %v694_v1 }
 0x48c   :  { %v777_v6 = vpop.eup %776 }
 0x48d   :  { %420 = vrot.lane.b32.xlu0 %v777_v6, %s804_s8 }
 0x48e   :  { %v779_v7 = vpop.eup %778 }
 0x48f   :  { %v414_v8 = vadd.f32 1.0, %v779_v7 }
 0x491   :  { %780 = vrcp.f32 %v414_v8 }
 0x49e   :  { %v781_v9 = vpop.eup %780 }
 0x49f   :  { %v418_v12 = vmul.f32 %v781_v9, %v305_v52 }
 0x4ff   :  { %v421_v10 = vpop.permute.xlu0 %420 }
 0x500   :  { %v423_v11 = vmul.f32 %v781_v9, %v421_v10 }
 0x502   :  { %425 = vrot.lane.b32.xlu1 %v423_v11, %s805_s9 }
 0x574   :  { %v426_v13 = vpop.permute.xlu1 %425 }
 0x575   :  { %v428_v14 = vadd.f32 %v426_v13, %v418_v12 }
 0x577   :  { %782 = vtanh.f32 %v428_v14 }
 0x584   :  { %v783_v15 = vpop.eup %782 }
 0x585   :  { %431 = vrot.lane.b32.xlu0 %v783_v15, %s806_s10 }
 0x589   :  { %183 = vrot.lane.b32.xlu0 %v166_v16, %s803_s3 }
 0x5f7   :  { %v432_v17 = vpop.permute.xlu0 %431 }
 0x5f8   :  { %v947_v19 = vmul.f32 %v781_v9, %v432_v17 }
 0x5fa   :  { %436 = vrot.lane.b32.xlu1 %v947_v19, %s807_s11 }
 0x5fb   :  { %v184_v20 = vpop.permute.xlu0 %183 }
 0x5fc   :  { %194 = vst.msk [vmem:[#allocation3 + $0x2] sm:$0x3] %vm148_vm2, %v184_v20 }
 0x603   :  { %v522_v25 = vld [vmem:[#allocation3 + $0x2] sm:$0x3] }
 0x66c   :  { %v437_v21 = vpop.permute.xlu1 %436 }
 0x66d   :  { %695 = vst.msk [vmem:[%s1008_s4 + $0x2] sm:$0x3] %vm316_vm4, %v437_v21  ;;  %751 = vmatmul.mubr.msk.f32.vlgmr.msra.gmra.mxu0 %vm199_vm5, %v437_v21 }
 0x72d   :  { %v514_v22 = vpop.f32.mrf.mxu0 }
 0x72e   :  { %v524_v23 = vrot.slane %v514_v22, 2  ;;  %v520_v30 = vadd.f32 %v519_v28, %v514_v22 }
 0x72f   :  { %v752_v24 = vpop.f32.mrf.mxu0 }
 0x730   :  { %525 = vrot.lane.b32.xlu1 %v524_v23, %s803_s3 }
 0x7a2   :  { %v526_v26 = vpop.permute.xlu1 %525 }
 0x7a3   :  { %v528_v27 = vadd.f32 %v526_v26, %v522_v25 }
 0x7a5   :  { %v530_v31 = vrot.slane %v528_v27, 6 }
 0x7a7   :  { %v532_v32 = vsel %vm286_vm3, %v520_v30, %v530_v31 }
 0x7a8   :  { %784 = vtanh.f32 %v532_v32  ;;  %v698_v34 = vmul.f32 -1.442695, %v532_v32 }
 0x7aa   :  { %786 = vpow2.f32 %v698_v34 }
 0x7b5   :  { %v785_v33 = vpop.eup %784 }
 0x7b6   :  { %542 = vrot.lane.b32.xlu0 %v785_v33, %s804_s8 }
 0x7b7   :  { %v787_v35 = vpop.eup %786 }
 0x7b8   :  { %v536_v36 = vadd.f32 1.0, %v787_v35 }
 0x7ba   :  { %788 = vrcp.f32 %v536_v36 }
 0x7c7   :  { %v789_v37 = vpop.eup %788 }
 0x7c8   :  { %v540_v40 = vmul.f32 %v789_v37, %v428_v14 }
 0x828   :  { %v543_v38 = vpop.permute.xlu0 %542 }
 0x829   :  { %v545_v39 = vmul.f32 %v789_v37, %v543_v38 }
 0x82b   :  { %547 = vrot.lane.b32.xlu1 %v545_v39, %s805_s9 }
 0x89d   :  { %v548_v41 = vpop.permute.xlu1 %547 }
 0x89e   :  { %v550_v42 = vadd.f32 %v548_v41, %v540_v40 }
 0x8a0   :  { %790 = vtanh.f32 %v550_v42 }
 0x8ad   :  { %v791_v43 = vpop.eup %790 }
 0x8ae   :  { %553 = vrot.lane.b32.xlu0 %v791_v43, %s806_s10 }
 0x8b2   :  { %181 = vrot.lane.b32.xlu0 %v159_v44, %s803_s3 }
 0x920   :  { %v554_v45 = vpop.permute.xlu0 %553 }
 0x921   :  { %v556_v46 = vmul.f32 %v789_v37, %v554_v45 }
 0x923   :  { %558 = vrot.lane.b32.xlu1 %v556_v46, %s807_s11 }
 0x924   :  { %v182_v47 = vpop.permute.xlu0 %181 }
 0x925   :  { %193 = vst.msk [vmem:[#allocation3] sm:$0x3] %vm148_vm2, %v182_v47 }
 0x92c   :  { %v641_v53 = vld [vmem:[#allocation3] sm:$0x3] }
 0x995   :  { %v559_v48 = vpop.permute.xlu1 %558 }
 0x996   :  { %758 = vmatmul.mubr.msk.f32.vlgmr.msra.gmra.mxu1 %vm199_vm5, %v559_v48 }
 0xa56   :  { %v634_v49 = vpop.f32.mrf.mxu1 }
 0xa57   :  { %v643_v50 = vrot.slane %v634_v49, 2  ;;  %v640_v54 = vadd.f32 %v639_v29, %v634_v49 }
 0xa58   :  { %v759_v51 = vpop.f32.mrf.mxu1 }
 0xa59   :  { %644 = vrot.lane.b32.xlu1 %v643_v50, %s803_s3 }
 0xacb   :  { %v645_v52 = vpop.permute.xlu1 %644 }
 0xacc   :  { %v647_v18 = vadd.f32 %v645_v52, %v641_v53 }
 0xace   :  { %v649_v55 = vrot.slane %v647_v18, 6 }
 0xad0   :  { %v651_v57 = vsel %vm286_vm3, %v640_v54, %v649_v55 }
 0xad1   :  { %792 = vtanh.f32 %v651_v57  ;;  %v702_v59 = vmul.f32 -1.442695, %v651_v57 }
 0xad3   :  { %794 = vpow2.f32 %v702_v59 }
 0xade   :  { %v793_v58 = vpop.eup %792 }
 0xadf   :  { %661 = vrot.lane.b32.xlu0 %v793_v58, %s804_s8 }
 0xae0   :  { %v795_v60 = vpop.eup %794 }
 0xae1   :  { %v655_v61 = vadd.f32 1.0, %v795_v60 }
 0xae3   :  { %796 = vrcp.f32 %v655_v61 }
 0xaf0   :  { %v797_v62 = vpop.eup %796 }
 0xaf1   :  { %v659_v2 = vmul.f32 %v797_v62, %v550_v42 }
 0xb51   :  { %v662_v63 = vpop.permute.xlu0 %661 }
 0xb52   :  { %v664_v0 = vmul.f32 %v797_v62, %v662_v63 }
 0xb54   :  { %666 = vrot.lane.b32.xlu1 %v664_v0, %s805_s9 }
 0xb58   :  { %318 = vrot.lane.b32.xlu1 %v924_v56, %s804_s8 }
 0xb5c   :  { %562 = vrot.lane.b32.xlu1 %v556_v46, %s804_s8 }
 0xbc6   :  { %v667_v3 = vpop.permute.xlu1 %666 }
 0xbc7   :  { %v669_v4 = vadd.f32 %v667_v3, %v659_v2 }
 0xbc9   :  { %798 = vtanh.f32 %v669_v4 }
 0xbca   :  { %v319_v5 = vpop.permute.xlu1 %318 }
 0xbcb   :  { %692 = vst.msk [vmem:[%s1008_s4 + $0x4] sm:$0xc] %vm322_vm6, %v319_v5 }
 0xbce   :  { %v563_v6 = vpop.permute.xlu1 %562 }
 0xbcf   :  { %700 = vst.msk [vmem:[%s1008_s4] sm:$0xc] %vm322_vm6, %v563_v6 }
 0xbd6   :  { %v799_v56 = vpop.eup %798 }
 0xbd7   :  { %672 = vrot.lane.b32.xlu0 %v799_v56, %s806_s10 }
 0xbdb   :  { %441 = vrot.lane.b32.xlu0 %v947_v19, %s804_s8 }
 0xc49   :  { %v673_v1 = vpop.permute.xlu0 %672 }
 0xc4a   :  { %v675_v7 = vmul.f32 %v797_v62, %v673_v1 }
 0xc4c   :  { %681 = vrot.lane.b32.xlu1 %v675_v7, %s804_s8  ;;  %677 = vrot.lane.b32.xlu0 %v675_v7, %s807_s11 }
 0xc4d   :  { %v442_v8 = vpop.permute.xlu0 %441 }
 0xc4e   :  { %696 = vst.msk [vmem:[%s1008_s4 + $0x2] sm:$0xc] %vm322_vm6, %v442_v8 }
 0xc4f   :  { %699 = vst.msk [vmem:[%s1008_s4 + $0x4] sm:$0x3] %vm316_vm4, %v559_v48 }
 0xcbe   :  { %v682_v9 = vpop.permute.xlu1 %681  ;;  %v678_v10 = vpop.permute.xlu0 %677 }
 0xcbf   :  { %684 = vst.msk [vmem:[%s1008_s4 - $0x2] sm:$0xc] %vm322_vm6, %v682_v9 }
 0xcc0   :  { %703 = vst.msk [vmem:[%s1008_s4 + $0x6] sm:$0x3] %vm316_vm4, %v678_v10 }

// kernel: dec_forward.3
= control target key start
LH: loop header
LB: loop body
LE: loop exit
PB: predicated region body
PF: predicated region fallthrough
CT: control target
= control target key end

     0   :  { %vm36_vm0 = vcmask 261120   ;;  %v1724_v2 = vmov 0.0   ;;  %vm166_vm1 = vcmask 523264   ;;  %s1727_s17 = smov 16   ;;  %s1728_s18 = smov 32   ;;  %vm217_vm2 = vcmask 130048   ;;  %s2093_s1 = inlined_call_operand.vmem [shape: f32[32,128], index: 1, kind: input, shape index: {}]   ;;  %s2094_s0 = inlined_call_operand.vmem [shape: f32[8,8,32], index: 0, kind: input, shape index: {}]   ;;  %s2095_s2 = inlined_call_operand.vmem [shape: f32[16,128], index: 2, kind: input, shape index: {}]   ;;  %s2096_s3 = inlined_call_operand.vmem [shape: f32[1,128], index: 3, kind: input, shape index: {}]   ;;  %s2097_s4 = inlined_call_operand.vmem [shape: f32[8,8,32], index: 4, kind: output, shape index: {}]  }
   0x1   :  { %v28_v0 = vld [vmem:[%s2093_s1 + $0x18] sm:$0xff]  ;;  %v27_v1 = vld [vmem:[%s2093_s1 + $0x10] sm:$0xff]  ;;  %1538 = vmatprep.mubr.f32.mxu1 %v1724_v2  ;;  %v17_v3 = vld [vmem:[%s2094_s0] sm:$0xff]  ;;  %s1729_s19 = smov 80   ;;  %vm363_vm3 = vcmask 261248  }
   0x2   :  { %1514 = vmatprep.subr.mxu0 %v28_v0  ;;  %v26_v4 = vld [vmem:[%s2093_s1 + $0x8] sm:$0xff]  ;;  %1522 = vmatprep.mubr.msk.f32.mxu0 %vm36_vm0, %v17_v3  ;;  %v1777_v6 = vld [vmem:[%s2095_s2] sm:$0xff]  ;;  %v19_v9 = vld [vmem:[%s2094_s0 + $0x10] sm:$0xff] }
   0x3   :  { %1515 = vmatpush3.msra.mxu0 %v28_v0  ;;  %v1771_v5 = vld [vmem:[%s2095_s2 + $0x8] sm:$0xff]  ;;  %v25_v7 = vld [vmem:[%s2093_s1] sm:$0xff]  ;;  %v20_v10 = vld [vmem:[%s2094_s0 + $0x18] sm:$0xff] }
   0x4   :  { %1516 = vmatprep.subr.mxu0 %v27_v1  ;;  %1534 = vmatprep.subr.mxu1 %v1771_v5  ;;  %v18_v8 = vld [vmem:[%s2094_s0 + $0x8] sm:$0xff]  ;;  %v21_v11 = vld [vmem:[%s2094_s0 + $0x20] sm:$0xff]  ;;  %v23_v13 = vld [vmem:[%s2094_s0 + $0x30] sm:$0xff] }
   0x5   :  { %1517 = vmatpush3.msra.mxu0 %v27_v1  ;;  %1535 = vmatpush3.msra.mxu1 %v1771_v5  ;;  %v22_v12 = vld [vmem:[%s2094_s0 + $0x28] sm:$0xff]  ;;  %v24_v14 = vld [vmem:[%s2094_s0 + $0x38] sm:$0xff]  ;;  %v1417_v15 = vld [vmem:[%s2096_s3] ss:$0 sm:$0xff]  ;;  %s1725_s0 = smov 64   ;;  %s1726_s3 = smov 96  }
   0x6   :  { %1518 = vmatprep.subr.mxu0 %v26_v4  ;;  %1536 = vmatprep.subr.mxu1 %v1777_v6 }
   0x7   :  { %1519 = vmatpush3.msra.mxu0 %v26_v4  ;;  %1537 = vmatpush3.msra.mxu1 %v1777_v6 }
   0x8   :  { %1520 = vmatprep.subr.mxu0 %v25_v7  ;;  %1539 = vmatmul.mubr.f32.vlgmr.msra.gmra.mxu1 %v1724_v2 }
   0x9   :  { %1521 = vmatpush3.msra.mxu0 %v25_v7  ;;  %1541 = vmatprep.subr.mxu1 %v1771_v5 }
   0xa   :  { %1523 = vmatmul.mubr.msk.f32.vlgmr.msra.gmra.mxu0 %vm36_vm0, %v18_v8  ;;  %1542 = vmatpush3.msra.mxu1 %v1771_v5 }
   0xb   :  { %1525 = vmatprep.mubr.msk.f32.mxu0 %vm36_vm0, %v19_v9  ;;  %1543 = vmatprep.subr.mxu1 %v1777_v6 }
   0xc   :  { %1544 = vmatpush3.msra.mxu1 %v1777_v6  ;;  %1569 = vmatprep.subr.mxu0 %v1771_v5 }
   0xd   :  { %1548 = vmatprep.subr.mxu1 %v1771_v5  ;;  %1570 = vmatpush3.msra.mxu0 %v1771_v5 }
   0xe   :  { %1526 = vmatmul.mubr.msk.f32.gmra.mxu0 %vm36_vm0, %v20_v10  ;;  %1571 = vmatprep.subr.mxu0 %v1777_v6 }
   0xf   :  { %1528 = vmatprep.mubr.msk.f32.mxu0 %vm36_vm0, %v21_v11  ;;  %1572 = vmatpush3.msra.mxu0 %v1777_v6 }
  0x10   :  { %1583 = vmatprep.subr.mxu0 %v1771_v5 }
  0x12   :  { %1529 = vmatmul.mubr.msk.f32.gmra.mxu0 %vm36_vm0, %v22_v12 }
  0x13   :  { %1531 = vmatprep.mubr.msk.f32.mxu0 %vm36_vm0, %v23_v13 }
  0x16   :  { %1532 = vmatmul.mubr.msk.f32.gmra.mxu0 %vm36_vm0, %v24_v14 }
  0xc8   :  { %v1540_v23 = vpop.f32.mrf.mxu1 }
  0xca   :  { %v1524_v16 = vpop.f32.mrf.mxu0  ;;  %v287_v28 = vpop.f32.mrf.mxu1 }
  0xcb   :  { %v1826_v17 = vadd.f32 %v1524_v16, %v1417_v15 }
  0xcc   :  { %v127_v18 = vpop.f32.mrf.mxu0 }
  0xcd   :  { %168 = vst.msk [vmem:[#allocation2 + $0x8] sm:$0xff] %vm166_vm1, %v1826_v17  ;;  %v1830_v19 = vadd.f32 %v1417_v15, %v127_v18 }
  0xce   :  { %v1527_v20 = vpop.f32.mrf.mxu0 }
  0xcf   :  { %167 = vst.msk [vmem:[#allocation2] sm:$0xff] %vm166_vm1, %v1830_v19  ;;  %v1834_v21 = vadd.f32 %v1527_v20, %v1417_v15 }
  0xd0   :  { %v137_v22 = vpop.f32.mrf.mxu0 }
  0xd1   :  { %170 = vst.msk [vmem:[#allocation2 + $0x18] sm:$0xff] %vm166_vm1, %v1834_v21  ;;  %v1838_v24 = vadd.f32 %v1417_v15, %v137_v22 }
  0xd2   :  { %v1530_v25 = vpop.f32.mrf.mxu0 }
  0xd3   :  { %169 = vst.msk [vmem:[#allocation2 + $0x10] sm:$0xff] %vm166_vm1, %v1838_v24  ;;  %v1842_v26 = vadd.f32 %v1530_v25, %v1417_v15 }
  0xd4   :  { %v147_v27 = vpop.f32.mrf.mxu0  ;;  %v447_v9 = vld [vmem:[#allocation2 + $0x8] sm:$0xff] }
  0xd5   :  { %172 = vst.msk [vmem:[#allocation2 + $0x28] sm:$0xff] %vm166_vm1, %v1842_v26  ;;  %v1846_v29 = vadd.f32 %v1417_v15, %v147_v27 }
  0xd6   :  { %v1533_v30 = vpop.f32.mrf.mxu0  ;;  %v296_v31 = vld [vmem:[#allocation2] sm:$0xff] }
  0xd7   :  { %171 = vst.msk [vmem:[#allocation2 + $0x20] sm:$0xff] %vm166_vm1, %v1846_v29  ;;  %v163_v32 = vadd.f32 %v1533_v30, %v1417_v15  ;;  %v297_v33 = vadd.f32 %v296_v31, %v287_v28 }
  0xd8   :  { %v157_v34 = vpop.f32.mrf.mxu0 }
  0xd9   :  { %174 = vst.msk [vmem:[#allocation2 + $0x38] sm:$0xff] %vm166_vm1, %v163_v32  ;;  %1596 = vtanh.f32 %v297_v33  ;;  %v158_v35 = vadd.f32 %v1417_v15, %v157_v34  ;;  %197 = vrot.lane.b32.xlu0 %v163_v32, %s1725_s0  ;;  %v1426_v37 = vmul.f32 -1.442695, %v297_v33 }
  0xdb   :  { %173 = vst.msk [vmem:[#allocation2 + $0x30] sm:$0xff] %vm166_vm1, %v158_v35  ;;  %1598 = vpow2.f32 %v1426_v37 }
  0xdd   :  { %301 = vrot.lane.b32.xlu0 %v1540_v23, %s1725_s0 }
  0xe6   :  { %v1597_v36 = vpop.eup %1596 }
  0xe7   :  { %323 = vrot.lane.b32.xlu1 %v1597_v36, %s1726_s3 }
  0xe8   :  { %v1599_v38 = vpop.eup %1598 }
  0xe9   :  { %v311_v39 = vadd.f32 1.0, %v1599_v38 }
  0xeb   :  { %1600 = vrcp.f32 %v311_v39 }
  0xf8   :  { %v1601_v44 = vpop.eup %1600 }
  0xf9   :  { %v319_v51 = vmul.f32 0.0, %v1601_v44 }
 0x14b   :  { %v198_v40 = vpop.permute.xlu0 %197 }
 0x14c   :  { %214 = vst.msk [vmem:[#allocation3 + $0x38] sm:$0xff] %vm166_vm1, %v198_v40 }
 0x14f   :  { %v302_v41 = vpop.permute.xlu0 %301 }
 0x153   :  { %v299_v42 = vld [vmem:[#allocation3 + $0x38] sm:$0xff] }
 0x154   :  { %v304_v43 = vadd.f32 %v302_v41, %v299_v42 }
 0x156   :  { %1602 = vtanh.f32 %v304_v43  ;;  %v1427_v48 = vmul.f32 -1.442695, %v304_v43 }
 0x158   :  { %1604 = vpow2.f32 %v1427_v48 }
 0x159   :  { %v324_v45 = vpop.permute.xlu1 %323 }
 0x15a   :  { %v329_v46 = vmul.f32 %v1601_v44, %v324_v45 }
 0x15c   :  { %333 = vrot.lane.b32.xlu0 %v329_v46, %s1727_s17 }
 0x163   :  { %v1603_v47 = vpop.eup %1602 }
 0x164   :  { %325 = vrot.lane.b32.xlu1 %v1603_v47, %s1726_s3 }
 0x165   :  { %v1605_v49 = vpop.eup %1604 }
 0x166   :  { %v312_v50 = vadd.f32 1.0, %v1605_v49 }
 0x168   :  { %1606 = vrcp.f32 %v312_v50  ;;  %v598_v50 = vld [vmem:[#allocation2 + $0x10] sm:$0xff] }
 0x175   :  { %v1607_v54 = vpop.eup %1606 }
 0x176   :  { %v320_v58 = vmul.f32 0.0, %v1607_v54 }
 0x1ce   :  { %v334_v52 = vpop.permute.xlu0 %333 }
 0x1cf   :  { %v1858_v53 = vadd.f32 %v334_v52, %v319_v51 }
 0x1d1   :  { %1608 = vtanh.f32 %v1858_v53 }
 0x1d6   :  { %v326_v55 = vpop.permute.xlu1 %325 }
 0x1d7   :  { %v330_v56 = vmul.f32 %v1607_v54, %v326_v55 }
 0x1d9   :  { %335 = vrot.lane.b32.xlu1 %v330_v56, %s1727_s17 }
 0x1de   :  { %v1609_v57 = vpop.eup %1608 }
 0x1df   :  { %345 = vrot.lane.b32.xlu0 %v1609_v57, %s1728_s18 }
 0x24b   :  { %v336_v59 = vpop.permute.xlu1 %335 }
 0x24c   :  { %v1863_v60 = vadd.f32 %v336_v59, %v320_v58 }
 0x24e   :  { %1610 = vtanh.f32 %v1863_v60 }
 0x251   :  { %v346_v61 = vpop.permute.xlu0 %345 }
 0x252   :  { %v351_v62 = vmul.f32 %v1601_v44, %v346_v61 }
 0x254   :  { %354 = vrot.lane.b32.xlu0 %v351_v62, %s1729_s19 }
 0x258   :  { %195 = vrot.lane.b32.xlu0 %v158_v35, %s1725_s0 }
 0x25b   :  { %v1611_v63 = vpop.eup %1610 }
 0x25c   :  { %347 = vrot.lane.b32.xlu1 %v1611_v63, %s1728_s18 }
 0x2c6   :  { %v355_v0 = vpop.permute.xlu0 %354 }
 0x2c7   :  { %357 = vst.msk [vmem:[%s2097_s4] sm:$0xff] %vm217_vm2, %v355_v0  ;;  %1545 = vmatprep.mubr.msk.f32.mxu1 %vm217_vm2, %v355_v0 }
 0x2ca   :  { %v196_v1 = vpop.permute.xlu0 %195 }
 0x2cb   :  { %213 = vst.msk [vmem:[#allocation3 + $0x30] sm:$0xff] %vm166_vm1, %v196_v1 }
 0x2ce   :  { %v348_v2 = vpop.permute.xlu1 %347 }
 0x2cf   :  { %v1875_v3 = vmul.f32 %v1607_v54, %v348_v2 }
 0x2d1   :  { %365 = vrot.lane.b32.xlu1 %v1875_v3, %s1729_s19 }
 0x2d2   :  { %v450_v15 = vld [vmem:[#allocation3 + $0x30] sm:$0xff] }
 0x343   :  { %v366_v4 = vpop.permute.xlu1 %365 }
 0x344   :  { %1546 = vmatmul.mubr.msk.f32.vlgmr.msra.gmra.mxu1 %vm217_vm2, %v366_v4 }
 0x345   :  { %1549 = vmatpush3.msra.mxu1 %v1771_v5 }
 0x346   :  { %1550 = vmatprep.subr.mxu1 %v1777_v6 }
 0x347   :  { %1551 = vmatpush3.msra.mxu1 %v1777_v6 }
 0x348   :  { %1555 = vmatprep.subr.mxu1 %v1771_v5 }
 0x404   :  { %v1547_v7 = vpop.f32.mrf.mxu1 }
 0x405   :  { %452 = vrot.lane.b32.xlu1 %v1547_v7, %s1725_s0 }
 0x406   :  { %v437_v8 = vpop.f32.mrf.mxu1 }
 0x407   :  { %v448_v10 = vadd.f32 %v447_v9, %v437_v8 }
 0x409   :  { %1612 = vtanh.f32 %v448_v10  ;;  %v1431_v12 = vmul.f32 -1.442695, %v448_v10 }
 0x40b   :  { %1614 = vpow2.f32 %v1431_v12 }
 0x416   :  { %v1613_v11 = vpop.eup %1612 }
 0x417   :  { %474 = vrot.lane.b32.xlu0 %v1613_v11, %s1726_s3 }
 0x418   :  { %v1615_v13 = vpop.eup %1614 }
 0x419   :  { %v462_v16 = vadd.f32 1.0, %v1615_v13 }
 0x477   :  { %v453_v14 = vpop.permute.xlu1 %452 }
 0x478   :  { %v455_v18 = vadd.f32 %v453_v14, %v450_v15 }
 0x47a   :  { %1616 = vtanh.f32 %v455_v18  ;;  %v1432_v27 = vmul.f32 -1.442695, %v455_v18 }
 0x47b   :  { %1618 = vrcp.f32 %v462_v16 }
 0x47c   :  { %1620 = vpow2.f32 %v1432_v27 }
 0x487   :  { %v1617_v20 = vpop.eup %1616 }
 0x488   :  { %476 = vrot.lane.b32.xlu1 %v1617_v20, %s1726_s3  ;;  %v1619_v22 = vpop.eup %1618 }
 0x489   :  { %v475_v23 = vpop.permute.xlu0 %474  ;;  %v1621_v28 = vpop.eup %1620  ;;  %v470_v34 = vmul.f32 %v1619_v22, %v1858_v53 }
 0x48a   :  { %v480_v25 = vmul.f32 %v1619_v22, %v475_v23  ;;  %v463_v30 = vadd.f32 1.0, %v1621_v28 }
 0x48c   :  { %484 = vrot.lane.b32.xlu0 %v480_v25, %s1727_s17  ;;  %1622 = vrcp.f32 %v463_v30  ;;  %v749_v30 = vld [vmem:[#allocation2 + $0x18] sm:$0xff] }
 0x499   :  { %v1623_v31 = vpop.eup %1622 }
 0x49a   :  { %v471_v38 = vmul.f32 %v1623_v31, %v1863_v60 }
 0x4fa   :  { %v477_v32 = vpop.permute.xlu1 %476 }
 0x4fb   :  { %v481_v33 = vmul.f32 %v1623_v31, %v477_v32 }
 0x4fd   :  { %486 = vrot.lane.b32.xlu1 %v481_v33, %s1727_s17 }
 0x4fe   :  { %v485_v35 = vpop.permute.xlu0 %484 }
 0x4ff   :  { %v490_v36 = vadd.f32 %v485_v35, %v470_v34 }
 0x501   :  { %1624 = vtanh.f32 %v490_v36 }
 0x50e   :  { %v1625_v37 = vpop.eup %1624 }
 0x50f   :  { %496 = vrot.lane.b32.xlu0 %v1625_v37, %s1728_s18 }
 0x56f   :  { %v487_v39 = vpop.permute.xlu1 %486 }
 0x570   :  { %v491_v40 = vadd.f32 %v487_v39, %v471_v38 }
 0x572   :  { %1626 = vtanh.f32 %v491_v40 }
 0x57f   :  { %v1627_v41 = vpop.eup %1626 }
 0x580   :  { %498 = vrot.lane.b32.xlu1 %v1627_v41, %s1728_s18 }
 0x581   :  { %v497_v42 = vpop.permute.xlu0 %496 }
 0x582   :  { %v502_v43 = vmul.f32 %v1619_v22, %v497_v42 }
 0x584   :  { %505 = vrot.lane.b32.xlu0 %v502_v43, %s1729_s19 }
 0x588   :  { %193 = vrot.lane.b32.xlu0 %v1842_v26, %s1725_s0 }
 0x5f2   :  { %v499_v44 = vpop.permute.xlu1 %498 }
 0x5f3   :  { %v1896_v45 = vmul.f32 %v1623_v31, %v499_v44 }
 0x5f5   :  { %516 = vrot.lane.b32.xlu1 %v1896_v45, %s1729_s19 }
 0x5f6   :  { %v506_v46 = vpop.permute.xlu0 %505 }
 0x5f7   :  { %1433 = vst.msk [vmem:[%s2097_s4 + $0x8] sm:$0xff] %vm217_vm2, %v506_v46  ;;  %1552 = vmatprep.mubr.msk.f32.mxu1 %vm217_vm2, %v506_v46 }
 0x5fa   :  { %v194_v47 = vpop.permute.xlu0 %193 }
 0x5fb   :  { %212 = vst.msk [vmem:[#allocation3 + $0x28] sm:$0xff] %vm166_vm1, %v194_v47 }
 0x602   :  { %v601_v56 = vld [vmem:[#allocation3 + $0x28] sm:$0xff] }
 0x667   :  { %v517_v48 = vpop.permute.xlu1 %516 }
 0x668   :  { %1553 = vmatmul.mubr.msk.f32.vlgmr.msra.gmra.mxu1 %vm217_vm2, %v517_v48 }
 0x669   :  { %1556 = vmatpush3.msra.mxu1 %v1771_v5 }
 0x66a   :  { %1557 = vmatprep.subr.mxu1 %v1777_v6 }
 0x66b   :  { %1558 = vmatpush3.msra.mxu1 %v1777_v6 }
 0x66c   :  { %1562 = vmatprep.subr.mxu1 %v1771_v5 }
 0x728   :  { %v1554_v26 = vpop.f32.mrf.mxu1 }
 0x729   :  { %603 = vrot.lane.b32.xlu1 %v1554_v26, %s1725_s0 }
 0x72a   :  { %v588_v49 = vpop.f32.mrf.mxu1 }
 0x72b   :  { %v599_v51 = vadd.f32 %v598_v50, %v588_v49 }
 0x72d   :  { %1628 = vtanh.f32 %v599_v51  ;;  %v1437_v53 = vmul.f32 -1.442695, %v599_v51 }
 0x72f   :  { %1630 = vpow2.f32 %v1437_v53 }
 0x73a   :  { %v1629_v52 = vpop.eup %1628 }
 0x73b   :  { %625 = vrot.lane.b32.xlu0 %v1629_v52, %s1726_s3 }
 0x73c   :  { %v1631_v54 = vpop.eup %1630 }
 0x73d   :  { %v613_v57 = vadd.f32 1.0, %v1631_v54 }
 0x79b   :  { %v604_v55 = vpop.permute.xlu1 %603 }
 0x79c   :  { %v606_v58 = vadd.f32 %v604_v55, %v601_v56 }
 0x79e   :  { %1632 = vtanh.f32 %v606_v58  ;;  %v1438_v63 = vmul.f32 -1.442695, %v606_v58 }
 0x79f   :  { %1634 = vrcp.f32 %v613_v57 }
 0x7a0   :  { %1636 = vpow2.f32 %v1438_v63 }
 0x7ab   :  { %v1633_v59 = vpop.eup %1632 }
 0x7ac   :  { %627 = vrot.lane.b32.xlu1 %v1633_v59, %s1726_s3  ;;  %v1635_v60 = vpop.eup %1634 }
 0x7ad   :  { %v626_v61 = vpop.permute.xlu0 %625  ;;  %v1637_v0 = vpop.eup %1636  ;;  %v621_v8 = vmul.f32 %v1635_v60, %v490_v36 }
 0x7ae   :  { %v631_v62 = vmul.f32 %v1635_v60, %v626_v61  ;;  %v614_v1 = vadd.f32 1.0, %v1637_v0 }
 0x7b0   :  { %635 = vrot.lane.b32.xlu0 %v631_v62, %s1727_s17  ;;  %1638 = vrcp.f32 %v614_v1  ;;  %v900_v1 = vld [vmem:[#allocation2 + $0x20] sm:$0xff] }
 0x7bd   :  { %v1639_v2 = vpop.eup %1638 }
 0x7be   :  { %v622_v12 = vmul.f32 %v1639_v2, %v491_v40 }
 0x81e   :  { %v628_v4 = vpop.permute.xlu1 %627 }
 0x81f   :  { %v632_v7 = vmul.f32 %v1639_v2, %v628_v4 }
 0x821   :  { %637 = vrot.lane.b32.xlu1 %v632_v7, %s1727_s17 }
 0x822   :  { %v636_v9 = vpop.permute.xlu0 %635 }
 0x823   :  { %v641_v10 = vadd.f32 %v636_v9, %v621_v8 }
 0x825   :  { %1640 = vtanh.f32 %v641_v10 }
 0x832   :  { %v1641_v11 = vpop.eup %1640 }
 0x833   :  { %647 = vrot.lane.b32.xlu0 %v1641_v11, %s1728_s18 }
 0x893   :  { %v638_v13 = vpop.permute.xlu1 %637 }
 0x894   :  { %v642_v14 = vadd.f32 %v638_v13, %v622_v12 }
 0x896   :  { %1642 = vtanh.f32 %v642_v14 }
 0x8a3   :  { %v1643_v15 = vpop.eup %1642 }
 0x8a4   :  { %649 = vrot.lane.b32.xlu1 %v1643_v15, %s1728_s18 }
 0x8a5   :  { %v648_v16 = vpop.permute.xlu0 %647 }
 0x8a6   :  { %v653_v18 = vmul.f32 %v1635_v60, %v648_v16 }
 0x8a8   :  { %656 = vrot.lane.b32.xlu0 %v653_v18, %s1729_s19 }
 0x8ac   :  { %191 = vrot.lane.b32.xlu0 %v1846_v29, %s1725_s0 }
 0x916   :  { %v650_v20 = vpop.permute.xlu1 %649 }
 0x917   :  { %v1921_v22 = vmul.f32 %v1639_v2, %v650_v20 }
 0x919   :  { %667 = vrot.lane.b32.xlu1 %v1921_v22, %s1729_s19 }
 0x91a   :  { %v657_v23 = vpop.permute.xlu0 %656 }
 0x91b   :  { %1439 = vst.msk [vmem:[%s2097_s4 + $0x10] sm:$0xff] %vm217_vm2, %v657_v23  ;;  %1559 = vmatprep.mubr.msk.f32.mxu1 %vm217_vm2, %v657_v23 }
 0x91e   :  { %v192_v25 = vpop.permute.xlu0 %191 }
 0x91f   :  { %211 = vst.msk [vmem:[#allocation3 + $0x20] sm:$0xff] %vm166_vm1, %v192_v25 }
 0x926   :  { %v752_v36 = vld [vmem:[#allocation3 + $0x20] sm:$0xff] }
 0x98b   :  { %v668_v27 = vpop.permute.xlu1 %667 }
 0x98c   :  { %1560 = vmatmul.mubr.msk.f32.vlgmr.msra.gmra.mxu1 %vm217_vm2, %v668_v27 }
 0x98d   :  { %1563 = vmatpush3.msra.mxu1 %v1771_v5 }
 0x98e   :  { %1564 = vmatprep.subr.mxu1 %v1777_v6 }
 0x98f   :  { %1565 = vmatpush3.msra.mxu1 %v1777_v6 }
 0x990   :  { %1576 = vmatprep.subr.mxu1 %v1771_v5 }
 0xa4c   :  { %v1561_v29 = vpop.f32.mrf.mxu1 }
 0xa4d   :  { %754 = vrot.lane.b32.xlu1 %v1561_v29, %s1725_s0 }
 0xa4e   :  { %v739_v28 = vpop.f32.mrf.mxu1 }
 0xa4f   :  { %v750_v31 = vadd.f32 %v749_v30, %v739_v28 }
 0xa51   :  { %1644 = vtanh.f32 %v750_v31  ;;  %v1443_v33 = vmul.f32 -1.442695, %v750_v31 }
 0xa53   :  { %1646 = vpow2.f32 %v1443_v33 }
 0xa5e   :  { %v1645_v32 = vpop.eup %1644 }
 0xa5f   :  { %776 = vrot.lane.b32.xlu0 %v1645_v32, %s1726_s3 }
 0xa60   :  { %v1647_v34 = vpop.eup %1646 }
 0xa61   :  { %v764_v37 = vadd.f32 1.0, %v1647_v34 }
 0xabf   :  { %v755_v35 = vpop.permute.xlu1 %754 }
 0xac0   :  { %v757_v38 = vadd.f32 %v755_v35, %v752_v36 }
 0xac2   :  { %1648 = vtanh.f32 %v757_v38  ;;  %v1444_v43 = vmul.f32 -1.442695, %v757_v38 }
 0xac3   :  { %1650 = vrcp.f32 %v764_v37 }
 0xac4   :  { %1652 = vpow2.f32 %v1444_v43 }
 0xacf   :  { %v1649_v39 = vpop.eup %1648 }
 0xad0   :  { %778 = vrot.lane.b32.xlu1 %v1649_v39, %s1726_s3  ;;  %v1651_v40 = vpop.eup %1650 }
 0xad1   :  { %v777_v41 = vpop.permute.xlu0 %776  ;;  %v1653_v44 = vpop.eup %1652  ;;  %v772_v49 = vmul.f32 %v1651_v40, %v641_v10 }
 0xad2   :  { %v782_v42 = vmul.f32 %v1651_v40, %v777_v41  ;;  %v765_v46 = vadd.f32 1.0, %v1653_v44 }
 0xad4   :  { %786 = vrot.lane.b32.xlu0 %v782_v42, %s1727_s17  ;;  %1654 = vrcp.f32 %v765_v46  ;;  %v1049_v46 = vld [vmem:[#allocation2 + $0x28] sm:$0xff] }
 0xae1   :  { %v1655_v47 = vpop.eup %1654 }
 0xae2   :  { %v773_v53 = vmul.f32 %v1655_v47, %v642_v14 }
 0xb42   :  { %v779_v48 = vpop.permute.xlu1 %778 }
 0xb43   :  { %v783_v26 = vmul.f32 %v1655_v47, %v779_v48 }
 0xb45   :  { %788 = vrot.lane.b32.xlu1 %v783_v26, %s1727_s17 }
 0xb46   :  { %v787_v50 = vpop.permute.xlu0 %786 }
 0xb47   :  { %v792_v51 = vadd.f32 %v787_v50, %v772_v49 }
 0xb49   :  { %1656 = vtanh.f32 %v792_v51 }
 0xb56   :  { %v1657_v52 = vpop.eup %1656 }
 0xb57   :  { %798 = vrot.lane.b32.xlu0 %v1657_v52, %s1728_s18 }
 0xbb7   :  { %v789_v54 = vpop.permute.xlu1 %788 }
 0xbb8   :  { %v793_v55 = vadd.f32 %v789_v54, %v773_v53 }
 0xbba   :  { %1658 = vtanh.f32 %v793_v55 }
 0xbc7   :  { %v1659_v56 = vpop.eup %1658 }
 0xbc8   :  { %800 = vrot.lane.b32.xlu1 %v1659_v56, %s1728_s18 }
 0xbc9   :  { %v799_v57 = vpop.permute.xlu0 %798 }
 0xbca   :  { %v804_v58 = vmul.f32 %v1651_v40, %v799_v57 }
 0xbcc   :  { %807 = vrot.lane.b32.xlu0 %v804_v58, %s1729_s19 }
 0xbd0   :  { %189 = vrot.lane.b32.xlu0 %v1834_v21, %s1725_s0 }
 0xc3a   :  { %v801_v59 = vpop.permute.xlu1 %800 }
 0xc3b   :  { %v1946_v60 = vmul.f32 %v1655_v47, %v801_v59 }
 0xc3d   :  { %818 = vrot.lane.b32.xlu1 %v1946_v60, %s1729_s19 }
 0xc3e   :  { %v808_v61 = vpop.permute.xlu0 %807 }
 0xc3f   :  { %1445 = vst.msk [vmem:[%s2097_s4 + $0x18] sm:$0xff] %vm217_vm2, %v808_v61  ;;  %1566 = vmatprep.mubr.msk.f32.mxu1 %vm217_vm2, %v808_v61 }
 0xc42   :  { %v190_v62 = vpop.permute.xlu0 %189 }
 0xc43   :  { %210 = vst.msk [vmem:[#allocation3 + $0x18] sm:$0xff] %vm166_vm1, %v190_v62 }
 0xc4a   :  { %v903_v10 = vld [vmem:[#allocation3 + $0x18] sm:$0xff] }
 0xcaf   :  { %v819_v63 = vpop.permute.xlu1 %818 }
 0xcb0   :  { %1567 = vmatmul.mubr.msk.f32.vlgmr.msra.gmra.mxu1 %vm217_vm2, %v819_v63 }
 0xcb1   :  { %1577 = vmatpush3.msra.mxu1 %v1771_v5 }
 0xcb2   :  { %1578 = vmatprep.subr.mxu1 %v1777_v6 }
 0xcb3   :  { %1579 = vmatpush3.msra.mxu1 %v1777_v6 }
 0xd70   :  { %v1568_v21 = vpop.f32.mrf.mxu1 }
 0xd71   :  { %905 = vrot.lane.b32.xlu1 %v1568_v21, %s1725_s0 }
 0xd72   :  { %v890_v0 = vpop.f32.mrf.mxu1 }
 0xd73   :  { %v901_v2 = vadd.f32 %v900_v1, %v890_v0 }
 0xd75   :  { %1660 = vtanh.f32 %v901_v2  ;;  %v1449_v7 = vmul.f32 -1.442695, %v901_v2 }
 0xd77   :  { %1662 = vpow2.f32 %v1449_v7 }
 0xd82   :  { %v1661_v4 = vpop.eup %1660 }
 0xd83   :  { %927 = vrot.lane.b32.xlu0 %v1661_v4, %s1726_s3 }
 0xd84   :  { %v1663_v8 = vpop.eup %1662 }
 0xd85   :  { %v915_v11 = vadd.f32 1.0, %v1663_v8 }
 0xde3   :  { %v906_v9 = vpop.permute.xlu1 %905 }
 0xde4   :  { %v908_v12 = vadd.f32 %v906_v9, %v903_v10 }
 0xde6   :  { %1664 = vtanh.f32 %v908_v12  ;;  %v1450_v18 = vmul.f32 -1.442695, %v908_v12 }
 0xde7   :  { %1666 = vrcp.f32 %v915_v11 }
 0xde8   :  { %1668 = vpow2.f32 %v1450_v18  ;;  %v1198_v18 = vld [vmem:[#allocation2 + $0x30] sm:$0xff] }
 0xdf3   :  { %v1665_v13 = vpop.eup %1664 }
 0xdf4   :  { %929 = vrot.lane.b32.xlu1 %v1665_v13, %s1726_s3  ;;  %v1667_v14 = vpop.eup %1666 }
 0xdf5   :  { %v928_v15 = vpop.permute.xlu0 %927  ;;  %v1669_v20 = vpop.eup %1668  ;;  %v923_v28 = vmul.f32 %v1667_v14, %v792_v51 }
 0xdf6   :  { %v933_v16 = vmul.f32 %v1667_v14, %v928_v15  ;;  %v916_v23 = vadd.f32 1.0, %v1669_v20 }
 0xdf8   :  { %937 = vrot.lane.b32.xlu0 %v933_v16, %s1727_s17  ;;  %1670 = vrcp.f32 %v916_v23 }
 0xe05   :  { %v1671_v25 = vpop.eup %1670 }
 0xe06   :  { %v924_v33 = vmul.f32 %v1671_v25, %v793_v55 }
 0xe66   :  { %v930_v27 = vpop.permute.xlu1 %929 }
 0xe67   :  { %v934_v29 = vmul.f32 %v1671_v25, %v930_v27 }
 0xe69   :  { %939 = vrot.lane.b32.xlu1 %v934_v29, %s1727_s17 }
 0xe6a   :  { %v938_v30 = vpop.permute.xlu0 %937 }
 0xe6b   :  { %v943_v31 = vadd.f32 %v938_v30, %v923_v28 }
 0xe6d   :  { %1672 = vtanh.f32 %v943_v31 }
 0xe7a   :  { %v1673_v32 = vpop.eup %1672 }
 0xe7b   :  { %949 = vrot.lane.b32.xlu0 %v1673_v32, %s1728_s18 }
 0xedb   :  { %v940_v34 = vpop.permute.xlu1 %939 }
 0xedc   :  { %v944_v35 = vadd.f32 %v940_v34, %v924_v33 }
 0xede   :  { %1674 = vtanh.f32 %v944_v35 }
 0xeeb   :  { %v1675_v36 = vpop.eup %1674 }
 0xeec   :  { %951 = vrot.lane.b32.xlu1 %v1675_v36, %s1728_s18 }
 0xeed   :  { %v950_v37 = vpop.permute.xlu0 %949 }
 0xeee   :  { %v955_v38 = vmul.f32 %v1667_v14, %v950_v37 }
 0xef0   :  { %958 = vrot.lane.b32.xlu0 %v955_v38, %s1729_s19 }
 0xef4   :  { %187 = vrot.lane.b32.xlu0 %v1838_v24, %s1725_s0 }
 0xf5e   :  { %v952_v39 = vpop.permute.xlu1 %951 }
 0xf5f   :  { %v1970_v40 = vmul.f32 %v1671_v25, %v952_v39 }
 0xf61   :  { %967 = vrot.lane.b32.xlu1 %v1970_v40, %s1729_s19 }
 0xf62   :  { %v1974_v41 = vpop.permute.xlu0 %958 }
 0xf63   :  { %1573 = vmatprep.mubr.msk.f32.mxu0 %vm217_vm2, %v1974_v41 }
 0xf66   :  { %v188_v42 = vpop.permute.xlu0 %187 }
 0xf67   :  { %209 = vst.msk [vmem:[#allocation3 + $0x10] sm:$0xff] %vm166_vm1, %v188_v42 }
 0xf6e   :  { %v1052_v51 = vld [vmem:[#allocation3 + $0x10] sm:$0xff] }
 0xfd3   :  { %v968_v43 = vpop.permute.xlu1 %967 }
 0xfd4   :  { %1574 = vmatmul.mubr.msk.f32.vlgmr.msra.gmra.mxu0 %vm217_vm2, %v968_v43 }
 0xfd5   :  { %1584 = vmatpush3.msra.mxu0 %v1771_v5 }
 0xfd6   :  { %1585 = vmatprep.subr.mxu0 %v1777_v6 }
 0xfd7   :  { %1586 = vmatpush3.msra.mxu0 %v1777_v6 }
0x1094   :  { %v1575_v24 = vpop.f32.mrf.mxu0 }
0x1095   :  { %1054 = vrot.lane.b32.xlu1 %v1575_v24, %s1725_s0 }
0x1096   :  { %v1039_v44 = vpop.f32.mrf.mxu0 }
0x1097   :  { %v1050_v47 = vadd.f32 %v1049_v46, %v1039_v44 }
0x1099   :  { %1676 = vtanh.f32 %v1050_v47  ;;  %v1455_v26 = vmul.f32 -1.442695, %v1050_v47 }
0x109b   :  { %1678 = vpow2.f32 %v1455_v26 }
0x10a6   :  { %v1677_v48 = vpop.eup %1676 }
0x10a7   :  { %1076 = vrot.lane.b32.xlu0 %v1677_v48, %s1726_s3 }
0x10a8   :  { %v1679_v49 = vpop.eup %1678 }
0x10a9   :  { %v1064_v5 = vadd.f32 1.0, %v1679_v49 }
0x1107   :  { %v1055_v50 = vpop.permute.xlu1 %1054 }
0x1108   :  { %v1057_v52 = vadd.f32 %v1055_v50, %v1052_v51 }
0x110a   :  { %1680 = vtanh.f32 %v1057_v52  ;;  %v1456_v56 = vmul.f32 -1.442695, %v1057_v52 }
0x110b   :  { %1682 = vrcp.f32 %v1064_v5 }
0x110c   :  { %1684 = vpow2.f32 %v1456_v56 }
0x1117   :  { %v1681_v6 = vpop.eup %1680 }
0x1118   :  { %1078 = vrot.lane.b32.xlu1 %v1681_v6, %s1726_s3  ;;  %v1683_v53 = vpop.eup %1682 }
0x1119   :  { %v1077_v54 = vpop.permute.xlu0 %1076  ;;  %v1685_v57 = vpop.eup %1684  ;;  %v1072_v63 = vmul.f32 %v1683_v53, %v943_v31 }
0x111a   :  { %v1082_v55 = vmul.f32 %v1683_v53, %v1077_v54  ;;  %v1065_v58 = vadd.f32 1.0, %v1685_v57 }
0x111c   :  { %1086 = vrot.lane.b32.xlu0 %v1082_v55, %s1727_s17  ;;  %1686 = vrcp.f32 %v1065_v58 }
0x1129   :  { %v1687_v59 = vpop.eup %1686 }
0x112a   :  { %v1073_v2 = vmul.f32 %v1687_v59, %v944_v35 }
0x118a   :  { %v1079_v61 = vpop.permute.xlu1 %1078 }
0x118b   :  { %v1083_v62 = vmul.f32 %v1687_v59, %v1079_v61 }
0x118d   :  { %1088 = vrot.lane.b32.xlu1 %v1083_v62, %s1727_s17 }
0x118e   :  { %v1087_v21 = vpop.permute.xlu0 %1086 }
0x118f   :  { %v1092_v0 = vadd.f32 %v1087_v21, %v1072_v63 }
0x1191   :  { %1688 = vtanh.f32 %v1092_v0 }
0x119e   :  { %v1689_v1 = vpop.eup %1688 }
0x119f   :  { %1098 = vrot.lane.b32.xlu0 %v1689_v1, %s1728_s18 }
0x11ff   :  { %v1089_v4 = vpop.permute.xlu1 %1088 }
0x1200   :  { %v1093_v7 = vadd.f32 %v1089_v4, %v1073_v2 }
0x1202   :  { %1690 = vtanh.f32 %v1093_v7 }
0x120f   :  { %v1691_v8 = vpop.eup %1690 }
0x1210   :  { %1100 = vrot.lane.b32.xlu1 %v1691_v8, %s1728_s18 }
0x1211   :  { %v1099_v9 = vpop.permute.xlu0 %1098 }
0x1212   :  { %v1104_v10 = vmul.f32 %v1683_v53, %v1099_v9 }
0x1214   :  { %1107 = vrot.lane.b32.xlu0 %v1104_v10, %s1729_s19 }
0x1218   :  { %185 = vrot.lane.b32.xlu0 %v1826_v17, %s1725_s0 }
0x1282   :  { %v1101_v11 = vpop.permute.xlu1 %1100 }
0x1283   :  { %v1993_v12 = vmul.f32 %v1687_v59, %v1101_v11 }
0x1285   :  { %1116 = vrot.lane.b32.xlu1 %v1993_v12, %s1729_s19 }
0x1286   :  { %v1997_v13 = vpop.permute.xlu0 %1107 }
0x1287   :  { %1580 = vmatprep.mubr.msk.f32.mxu1 %vm217_vm2, %v1997_v13 }
0x128a   :  { %v186_v14 = vpop.permute.xlu0 %185 }
0x128b   :  { %208 = vst.msk [vmem:[#allocation3 + $0x8] sm:$0xff] %vm166_vm1, %v186_v14 }
0x1292   :  { %v1201_v28 = vld [vmem:[#allocation3 + $0x8] sm:$0xff] }
0x12f7   :  { %v1117_v15 = vpop.permute.xlu1 %1116 }
0x12f8   :  { %1581 = vmatmul.mubr.msk.f32.vlgmr.msra.gmra.mxu1 %vm217_vm2, %v1117_v15 }
0x13b8   :  { %v1582_v16 = vpop.f32.mrf.mxu1 }
0x13b9   :  { %1203 = vrot.lane.b32.xlu1 %v1582_v16, %s1725_s0 }
0x13ba   :  { %v1188_v17 = vpop.f32.mrf.mxu1 }
0x13bb   :  { %v1199_v20 = vadd.f32 %v1198_v18, %v1188_v17 }
0x13bd   :  { %1692 = vtanh.f32 %v1199_v20  ;;  %v1461_v25 = vmul.f32 -1.442695, %v1199_v20 }
0x13bf   :  { %1694 = vpow2.f32 %v1461_v25 }
0x13ca   :  { %v1693_v23 = vpop.eup %1692 }
0x13cb   :  { %1225 = vrot.lane.b32.xlu0 %v1693_v23, %s1726_s3 }
0x13cc   :  { %v1695_v27 = vpop.eup %1694 }
0x13cd   :  { %v1213_v30 = vadd.f32 1.0, %v1695_v27 }
0x142b   :  { %v1204_v29 = vpop.permute.xlu1 %1203 }
0x142c   :  { %v1206_v31 = vadd.f32 %v1204_v29, %v1201_v28 }
0x142e   :  { %1696 = vtanh.f32 %v1206_v31  ;;  %v1462_v36 = vmul.f32 -1.442695, %v1206_v31 }
0x142f   :  { %1698 = vrcp.f32 %v1213_v30 }
0x1430   :  { %1700 = vpow2.f32 %v1462_v36 }
0x143b   :  { %v1697_v32 = vpop.eup %1696 }
0x143c   :  { %1227 = vrot.lane.b32.xlu1 %v1697_v32, %s1726_s3  ;;  %v1699_v33 = vpop.eup %1698 }
0x143d   :  { %v1226_v34 = vpop.permute.xlu0 %1225  ;;  %v1701_v37 = vpop.eup %1700  ;;  %v1221_v24 = vmul.f32 %v1699_v33, %v1092_v0 }
0x143e   :  { %v1231_v35 = vmul.f32 %v1699_v33, %v1226_v34  ;;  %v1214_v38 = vadd.f32 1.0, %v1701_v37 }
0x1440   :  { %1235 = vrot.lane.b32.xlu0 %v1231_v35, %s1727_s17  ;;  %1702 = vrcp.f32 %v1214_v38 }
0x144d   :  { %v1703_v39 = vpop.eup %1702 }
0x144e   :  { %v1222_v48 = vmul.f32 %v1703_v39, %v1093_v7 }
0x14ae   :  { %v1228_v42 = vpop.permute.xlu1 %1227 }
0x14af   :  { %v1232_v43 = vmul.f32 %v1703_v39, %v1228_v42 }
0x14b1   :  { %1237 = vrot.lane.b32.xlu1 %v1232_v43, %s1727_s17 }
0x14b2   :  { %v1236_v44 = vpop.permute.xlu0 %1235 }
0x14b3   :  { %v1241_v46 = vadd.f32 %v1236_v44, %v1221_v24 }
0x14b5   :  { %1704 = vtanh.f32 %v1241_v46 }
0x14c2   :  { %v1705_v47 = vpop.eup %1704 }
0x14c3   :  { %1247 = vrot.lane.b32.xlu0 %v1705_v47, %s1728_s18 }
0x1523   :  { %v1238_v26 = vpop.permute.xlu1 %1237 }
0x1524   :  { %v1242_v49 = vadd.f32 %v1238_v26, %v1222_v48 }
0x1526   :  { %1706 = vtanh.f32 %v1242_v49 }
0x1533   :  { %v1707_v50 = vpop.eup %1706 }
0x1534   :  { %1249 = vrot.lane.b32.xlu1 %v1707_v50, %s1728_s18 }
0x1535   :  { %v1248_v51 = vpop.permute.xlu0 %1247 }
0x1536   :  { %v1253_v5 = vmul.f32 %v1699_v33, %v1248_v51 }
0x1538   :  { %1256 = vrot.lane.b32.xlu0 %v1253_v5, %s1729_s19 }
0x153c   :  { %183 = vrot.lane.b32.xlu0 %v1830_v19, %s1725_s0  ;;  %v1347_v19 = vld [vmem:[#allocation2 + $0x38] sm:$0xff] }
0x15a6   :  { %v1250_v52 = vpop.permute.xlu1 %1249 }
0x15a7   :  { %v1254_v6 = vmul.f32 %v1703_v39, %v1250_v52 }
0x15a9   :  { %1265 = vrot.lane.b32.xlu1 %v1254_v6, %s1729_s19 }
0x15aa   :  { %v2014_v53 = vpop.permute.xlu0 %1256 }
0x15ab   :  { %1587 = vmatprep.mubr.msk.f32.mxu0 %vm217_vm2, %v2014_v53 }
0x15ae   :  { %v184_v54 = vpop.permute.xlu0 %183 }
0x15af   :  { %207 = vst.msk [vmem:[#allocation3] sm:$0xff] %vm166_vm1, %v184_v54 }
0x15b6   :  { %v1349_v21 = vld [vmem:[#allocation3] sm:$0xff] }
0x161b   :  { %v1266_v55 = vpop.permute.xlu1 %1265 }
0x161c   :  { %1588 = vmatmul.mubr.msk.f32.vlgmr.msra.gmra.mxu0 %vm217_vm2, %v1266_v55 }
0x16dc   :  { %v1589_v56 = vpop.f32.mrf.mxu0 }
0x16dd   :  { %1351 = vrot.lane.b32.xlu1 %v1589_v56, %s1725_s0 }
0x16de   :  { %v1337_v57 = vpop.f32.mrf.mxu0 }
0x16df   :  { %v1348_v58 = vadd.f32 %v1347_v19, %v1337_v57 }
0x16e1   :  { %1708 = vtanh.f32 %v1348_v58  ;;  %v1467_v61 = vmul.f32 -1.442695, %v1348_v58 }
0x16e3   :  { %1710 = vpow2.f32 %v1467_v61 }
0x16ee   :  { %v1709_v59 = vpop.eup %1708 }
0x16ef   :  { %1373 = vrot.lane.b32.xlu0 %v1709_v59, %s1726_s3 }
0x16f0   :  { %v1711_v62 = vpop.eup %1710 }
0x16f1   :  { %v1361_v0 = vadd.f32 1.0, %v1711_v62 }
0x174f   :  { %v1352_v63 = vpop.permute.xlu1 %1351 }
0x1750   :  { %v1354_v1 = vadd.f32 %v1352_v63, %v1349_v21 }
0x1752   :  { %1712 = vtanh.f32 %v1354_v1  ;;  %v1468_v9 = vmul.f32 -1.442695, %v1354_v1 }
0x1753   :  { %1714 = vrcp.f32 %v1361_v0 }
0x1754   :  { %1716 = vpow2.f32 %v1468_v9 }
0x175f   :  { %v1713_v2 = vpop.eup %1712 }
0x1760   :  { %1375 = vrot.lane.b32.xlu1 %v1713_v2, %s1726_s3  ;;  %v1715_v4 = vpop.eup %1714 }
0x1761   :  { %v1374_v7 = vpop.permute.xlu0 %1373  ;;  %v1717_v10 = vpop.eup %1716  ;;  %v1369_v17 = vmul.f32 %v1715_v4, %v1241_v46 }
0x1762   :  { %v1379_v8 = vmul.f32 %v1715_v4, %v1374_v7  ;;  %v1362_v11 = vadd.f32 1.0, %v1717_v10 }
0x1764   :  { %1383 = vrot.lane.b32.xlu0 %v1379_v8, %s1727_s17  ;;  %1718 = vrcp.f32 %v1362_v11 }
0x1771   :  { %v1719_v14 = vpop.eup %1718 }
0x1772   :  { %v1370_v25 = vmul.f32 %v1719_v14, %v1242_v49 }
0x17d2   :  { %v1376_v15 = vpop.permute.xlu1 %1375 }
0x17d3   :  { %v1380_v16 = vmul.f32 %v1719_v14, %v1376_v15 }
0x17d5   :  { %1385 = vrot.lane.b32.xlu1 %v1380_v16, %s1727_s17 }
0x17d6   :  { %v1384_v18 = vpop.permute.xlu0 %1383 }
0x17d7   :  { %v1389_v20 = vadd.f32 %v1384_v18, %v1369_v17 }
0x17d9   :  { %1720 = vtanh.f32 %v1389_v20 }
0x17e6   :  { %v1721_v23 = vpop.eup %1720 }
0x17e7   :  { %1395 = vrot.lane.b32.xlu0 %v1721_v23, %s1728_s18 }
0x17eb   :  { %359 = vrot.lane.b32.xlu0 %v1875_v3, %s1726_s3 }
0x17ef   :  { %662 = vrot.lane.b32.xlu0 %v1921_v22, %s1726_s3 }
0x17f3   :  { %963 = vrot.lane.b32.xlu0 %v1970_v40, %s1726_s3 }
0x17f7   :  { %1261 = vrot.lane.b32.xlu0 %v1254_v6, %s1726_s3 }
0x1847   :  { %v1386_v27 = vpop.permute.xlu1 %1385 }
0x1848   :  { %v1390_v29 = vadd.f32 %v1386_v27, %v1370_v25 }
0x184a   :  { %1722 = vtanh.f32 %v1390_v29 }
0x1857   :  { %v1723_v28 = vpop.eup %1722 }
0x1858   :  { %1397 = vrot.lane.b32.xlu1 %v1723_v28, %s1728_s18 }
0x1859   :  { %v1396_v30 = vpop.permute.xlu0 %1395 }
0x185a   :  { %v1401_v40 = vmul.f32 %v1715_v4, %v1396_v30 }
0x185c   :  { %511 = vrot.lane.b32.xlu1 %v1896_v45, %s1726_s3 }
0x185d   :  { %v360_v3 = vpop.permute.xlu0 %359 }
0x185e   :  { %1428 = vst.msk [vmem:[%s2097_s4 + $0x38] sm:$0xff] %vm363_vm3, %v360_v3 }
0x1860   :  { %813 = vrot.lane.b32.xlu1 %v1946_v60, %s1726_s3 }
0x1861   :  { %v663_v22 = vpop.permute.xlu0 %662 }
0x1862   :  { %1440 = vst.msk [vmem:[%s2097_s4 + $0x28] sm:$0xff] %vm363_vm3, %v663_v22 }
0x1863   :  { %1457 = vst.msk [vmem:[%s2097_s4 + $0x28] sm:$0xff] %vm217_vm2, %v1997_v13 }
0x1864   :  { %1112 = vrot.lane.b32.xlu1 %v1993_v12, %s1726_s3 }
0x1865   :  { %v964_v45 = vpop.permute.xlu0 %963 }
0x1866   :  { %1452 = vst.msk [vmem:[%s2097_s4 + $0x18] sm:$0xff] %vm363_vm3, %v964_v45 }
0x1868   :  { %1404 = vrot.lane.b32.xlu1 %v1401_v40, %s1729_s19 }
0x1869   :  { %v1262_v60 = vpop.permute.xlu0 %1261 }
0x186a   :  { %1464 = vst.msk [vmem:[%s2097_s4 + $0x8] sm:$0xff] %vm363_vm3, %v1262_v60 }
0x18ca   :  { %v1398_v31 = vpop.permute.xlu1 %1397 }
0x18cb   :  { %v1402_v13 = vmul.f32 %v1719_v14, %v1398_v31 }
0x18cd   :  { %1409 = vrot.lane.b32.xlu0 %v1402_v13, %s1726_s3 }
0x18ce   :  { %v512_v12 = vpop.permute.xlu1 %511 }
0x18cf   :  { %1434 = vst.msk [vmem:[%s2097_s4 + $0x30] sm:$0xff] %vm363_vm3, %v512_v12 }
0x18d0   :  { %1463 = vst.msk [vmem:[%s2097_s4 + $0x30] sm:$0xff] %vm217_vm2, %v2014_v53 }
0x18d2   :  { %v814_v32 = vpop.permute.xlu1 %813 }
0x18d3   :  { %1446 = vst.msk [vmem:[%s2097_s4 + $0x20] sm:$0xff] %vm363_vm3, %v814_v32 }
0x18d4   :  { %1451 = vst.msk [vmem:[%s2097_s4 + $0x20] sm:$0xff] %vm217_vm2, %v1974_v41 }
0x18d6   :  { %v1113_v33 = vpop.permute.xlu1 %1112 }
0x18d7   :  { %1458 = vst.msk [vmem:[%s2097_s4 + $0x10] sm:$0xff] %vm363_vm3, %v1113_v33 }
0x18da   :  { %v1405_v34 = vpop.permute.xlu1 %1404 }
0x18db   :  { %1469 = vst.msk [vmem:[%s2097_s4 + $0x38] sm:$0xff] %vm217_vm2, %v1405_v34 }
0x193f   :  { %v1410_v35 = vpop.permute.xlu0 %1409 }
0x1940   :  { %1412 = vst.msk [vmem:[%s2097_s4] sm:$0xff] %vm363_vm3, %v1410_v35 }

// kernel: dec_forward.4
= control target key start
LH: loop header
LB: loop body
LE: loop exit
PB: predicated region body
PF: predicated region fallthrough
CT: control target
= control target key end

     0   :  { %vm16_vm0 = vcmask 261120   ;;  %v1528_v0 = vmov 0.0   ;;  %vm1529_vm1 = vmmov 0   ;;  %vm601_vm2 = vcmask 64512   ;;  %s1696_s0 = inlined_call_operand.vmem [shape: f32[8,8,32], index: 0, kind: input, shape index: {}]   ;;  %s1697_s1 = inlined_call_operand.vmem [shape: f32[8,32], index: 1, kind: output, shape index: {}]  }
   0x1   :  { %1414 = vmatprep.subr.mxu0 %v1528_v0  ;;  %v8_v1 = vld [vmem:[%s1696_s0] sm:$0xff]  ;;  %1416 = vmatprep.mubr.msk.f32.mxu0 %vm1529_vm1, %v1528_v0  ;;  %v9_v2 = vld [vmem:[%s1696_s0 + $0x8] sm:$0xff]  ;;  %v1556_v3 = vld [vmem:[%s1696_s0 + $0x10] sm:$0xff]  ;;  %vm1338_vm3 = vcmask 1041409   ;;  %vm1340_vm4 = vcmask 1042434   ;;  %vm1342_vm5 = vcmask 1043459  }
   0x2   :  { %1415 = vmatpush3.xpose.msk.msra.mxu0 %vm16_vm0, %v8_v1  ;;  %1419 = vmatprep.subr.mxu1 %v1528_v0  ;;  %v1564_v4 = vld [vmem:[%s1696_s0 + $0x18] sm:$0xff]  ;;  %v1577_v5 = vld [vmem:[%s1696_s0 + $0x20] sm:$0xff]  ;;  %v1585_v6 = vld [vmem:[%s1696_s0 + $0x28] sm:$0xff]  ;;  %vm1344_vm6 = vcmask 1044484   ;;  %vm1346_vm7 = vcmask 1045509   ;;  %vm1348_vm8 = vcmask 1046534  }
   0x3   :  { %1420 = vmatpush3.xpose.msk.msra.mxu1 %vm16_vm0, %v9_v2  ;;  %1424 = vmatprep.subr.mxu0 %v1528_v0  ;;  %v1601_v7 = vld [vmem:[%s1696_s0 + $0x30] sm:$0xff]  ;;  %v1609_v8 = vld [vmem:[%s1696_s0 + $0x38] sm:$0xff]  ;;  %vm1350_vm9 = vcmask 1047559  }
   0x4   :  { %1421 = vmatprep.mubr.msk.f32.mxu1 %vm1529_vm1, %v1528_v0  ;;  %1429 = vmatprep.subr.mxu1 %v1528_v0 }
   0x5   :  { %1417 = vmatmul.mubr.msk.f32.vlgmr.msra.gmra.mxu0 %vm16_vm0, %v8_v1 }
   0x6   :  { %1425 = vmatpush3.xpose.msk.msra.mxu0 %vm16_vm0, %v1556_v3  ;;  %1422 = vmatmul.mubr.msk.f32.vlgmr.msra.gmra.mxu1 %vm16_vm0, %v9_v2 }
   0x7   :  { %1426 = vmatprep.mubr.msk.f32.mxu0 %vm1529_vm1, %v1528_v0  ;;  %1430 = vmatpush3.xpose.msk.msra.mxu1 %vm16_vm0, %v1564_v4 }
   0x8   :  { %1434 = vmatprep.subr.mxu0 %v1528_v0  ;;  %1431 = vmatprep.mubr.msk.f32.mxu1 %vm1529_vm1, %v1528_v0 }
   0x9   :  { %1427 = vmatmul.mubr.msk.f32.vlgmr.msra.gmra.mxu0 %vm16_vm0, %v1556_v3  ;;  %1439 = vmatprep.subr.mxu1 %v1528_v0 }
   0xa   :  { %1435 = vmatpush3.xpose.msk.msra.mxu0 %vm16_vm0, %v1577_v5  ;;  %1432 = vmatmul.mubr.msk.f32.vlgmr.msra.gmra.mxu1 %vm16_vm0, %v1564_v4 }
   0xb   :  { %1436 = vmatprep.mubr.msk.f32.mxu0 %vm1529_vm1, %v1528_v0  ;;  %1440 = vmatpush3.xpose.msk.msra.mxu1 %vm16_vm0, %v1585_v6 }
   0xc   :  { %1444 = vmatprep.subr.mxu0 %v1528_v0  ;;  %1441 = vmatprep.mubr.msk.f32.mxu1 %vm1529_vm1, %v1528_v0 }
   0xd   :  { %1437 = vmatmul.mubr.msk.f32.vlgmr.msra.gmra.mxu0 %vm16_vm0, %v1577_v5  ;;  %1449 = vmatprep.subr.mxu1 %v1528_v0 }
   0xe   :  { %1445 = vmatpush3.xpose.msk.msra.mxu0 %vm16_vm0, %v1601_v7  ;;  %1442 = vmatmul.mubr.msk.f32.vlgmr.msra.gmra.mxu1 %vm16_vm0, %v1585_v6 }
   0xf   :  { %1446 = vmatprep.mubr.msk.f32.mxu0 %vm1529_vm1, %v1528_v0  ;;  %1450 = vmatpush3.xpose.msk.msra.mxu1 %vm16_vm0, %v1609_v8 }
  0x10   :  { %1451 = vmatprep.mubr.msk.f32.mxu1 %vm1529_vm1, %v1528_v0  ;;  %1454 = vmatprep.subr.mxu0 %v1528_v0 }
  0x11   :  { %1447 = vmatmul.mubr.msk.f32.vlgmr.msra.gmra.mxu0 %vm16_vm0, %v1601_v7  ;;  %1459 = vmatprep.subr.mxu1 %v1528_v0 }
  0x12   :  { %1452 = vmatmul.mubr.msk.f32.vlgmr.msra.gmra.mxu1 %vm16_vm0, %v1609_v8  ;;  %1455 = vmatpush3.msra.mxu0 %v8_v1 }
  0x13   :  { %1456 = vmatprep.mubr.msk.f32.mxu0 %vm1529_vm1, %v1528_v0  ;;  %1460 = vmatpush3.msra.mxu1 %v9_v2 }
  0x14   :  { %1464 = vmatprep.subr.mxu0 %v1528_v0  ;;  %1461 = vmatprep.mubr.msk.f32.mxu1 %vm1529_vm1, %v1528_v0 }
  0x15   :  { %1469 = vmatprep.subr.mxu1 %v1528_v0 }
  0xc5   :  { %v86_v9 = vpop.f32.mrf.mxu0 }
  0xc6   :  { %v602_v10 = vsel %vm601_vm2, %v86_v9, -inf  ;;  %v159_v11 = vpop.f32.mrf.mxu1 }
  0xc7   :  { %603 = vmax.xlane.f32.xlu0 %v602_v10  ;;  %v1418_v12 = vpop.f32.mrf.mxu0  ;;  %v605_v14 = vsel %vm601_vm2, %v159_v11, -inf }
  0xc8   :  { %v1423_v13 = vpop.f32.mrf.mxu1 }
  0xc9   :  { %v232_v15 = vpop.f32.mrf.mxu0 }
  0xca   :  { %v608_v16 = vsel %vm601_vm2, %v232_v15, -inf  ;;  %v305_v17 = vpop.f32.mrf.mxu1 }
  0xcb   :  { %606 = vmax.xlane.f32.xlu0 %v605_v14  ;;  %609 = vmax.xlane.f32.xlu1 %v608_v16  ;;  %v1428_v18 = vpop.f32.mrf.mxu0  ;;  %v611_v20 = vsel %vm601_vm2, %v305_v17, -inf }
  0xcc   :  { %v1433_v19 = vpop.f32.mrf.mxu1 }
  0xcd   :  { %v378_v21 = vpop.f32.mrf.mxu0 }
  0xce   :  { %v614_v22 = vsel %vm601_vm2, %v378_v21, -inf  ;;  %v451_v23 = vpop.f32.mrf.mxu1 }
  0xcf   :  { %612 = vmax.xlane.f32.xlu1 %v611_v20  ;;  %615 = vmax.xlane.f32.xlu0 %v614_v22  ;;  %v1438_v24 = vpop.f32.mrf.mxu0  ;;  %v617_v26 = vsel %vm601_vm2, %v451_v23, -inf }
  0xd0   :  { %v1443_v25 = vpop.f32.mrf.mxu1 }
  0xd1   :  { %v524_v27 = vpop.f32.mrf.mxu0 }
  0xd2   :  { %v620_v28 = vsel %vm601_vm2, %v524_v27, -inf  ;;  %v597_v29 = vpop.f32.mrf.mxu1 }
  0xd3   :  { %618 = vmax.xlane.f32.xlu1 %v617_v26  ;;  %621 = vmax.xlane.f32.xlu0 %v620_v28  ;;  %v1448_v30 = vpop.f32.mrf.mxu0  ;;  %v623_v32 = vsel %vm601_vm2, %v597_v29, -inf }
  0xd4   :  { %v1453_v31 = vpop.f32.mrf.mxu1 }
  0xd7   :  { %624 = vmax.xlane.f32.xlu1 %v623_v32 }
 0x150   :  { %v604_v33 = vpop.xlane.xlu0 %603 }
 0x151   :  { %v626_v34 = vsub.f32 %v86_v9, %v604_v33 }
 0x153   :  { %v634_v35 = vmul.f32 1.442695, %v626_v34 }
 0x154   :  { %v607_v36 = vpop.xlane.xlu0 %606  ;;  %v610_v37 = vpop.xlane.xlu1 %609 }
 0x155   :  { %1496 = vpow2.f32 %v634_v35  ;;  %v627_v38 = vsub.f32 %v159_v11, %v607_v36  ;;  %v628_v39 = vsub.f32 %v232_v15, %v610_v37 }
 0x157   :  { %v636_v40 = vmul.f32 1.442695, %v627_v38  ;;  %v638_v41 = vmul.f32 1.442695, %v628_v39 }
 0x158   :  { %v613_v42 = vpop.xlane.xlu1 %612  ;;  %v616_v43 = vpop.xlane.xlu0 %615 }
 0x159   :  { %1498 = vpow2.f32 %v636_v40  ;;  %v629_v44 = vsub.f32 %v305_v17, %v613_v42  ;;  %v630_v45 = vsub.f32 %v378_v21, %v616_v43 }
 0x15a   :  { %1500 = vpow2.f32 %v638_v41 }
 0x15b   :  { %v640_v46 = vmul.f32 1.442695, %v629_v44  ;;  %v642_v47 = vmul.f32 1.442695, %v630_v45 }
 0x15c   :  { %v619_v48 = vpop.xlane.xlu1 %618  ;;  %v622_v49 = vpop.xlane.xlu0 %621 }
 0x15d   :  { %1502 = vpow2.f32 %v640_v46  ;;  %v631_v50 = vsub.f32 %v451_v23, %v619_v48  ;;  %v632_v51 = vsub.f32 %v524_v27, %v622_v49 }
 0x15e   :  { %1504 = vpow2.f32 %v642_v47 }
 0x15f   :  { %v644_v52 = vmul.f32 1.442695, %v631_v50  ;;  %v646_v53 = vmul.f32 1.442695, %v632_v51 }
 0x160   :  { %v625_v54 = vpop.xlane.xlu1 %624 }
 0x161   :  { %1506 = vpow2.f32 %v644_v52  ;;  %v633_v55 = vsub.f32 %v597_v29, %v625_v54 }
 0x162   :  { %v1497_v56 = vpop.eup %1496  ;;  %1508 = vpow2.f32 %v646_v53 }
 0x163   :  { %v648_v57 = vmul.f32 1.442695, %v633_v55  ;;  %v650_v58 = vsel %vm601_vm2, %v1497_v56, 0.0 }
 0x164   :  { %651 = vadd.xlane.f32.xlu0 %v650_v58 }
 0x165   :  { %1510 = vpow2.f32 %v648_v57 }
 0x166   :  { %v1499_v59 = vpop.eup %1498 }
 0x167   :  { %v1501_v60 = vpop.eup %1500  ;;  %v653_v61 = vsel %vm601_vm2, %v1499_v59, 0.0 }
 0x168   :  { %654 = vadd.xlane.f32.xlu1 %v653_v61  ;;  %v656_v62 = vsel %vm601_vm2, %v1501_v60, 0.0 }
 0x169   :  { %657 = vadd.xlane.f32.xlu0 %v656_v62 }
 0x16a   :  { %v1503_v63 = vpop.eup %1502 }
 0x16b   :  { %v1505_v1 = vpop.eup %1504  ;;  %v659_v2 = vsel %vm601_vm2, %v1503_v63, 0.0 }
 0x16c   :  { %660 = vadd.xlane.f32.xlu1 %v659_v2  ;;  %v662_v9 = vsel %vm601_vm2, %v1505_v1, 0.0 }
 0x16d   :  { %663 = vadd.xlane.f32.xlu0 %v662_v9 }
 0x16e   :  { %v1507_v10 = vpop.eup %1506 }
 0x16f   :  { %v1509_v11 = vpop.eup %1508  ;;  %v665_v12 = vsel %vm601_vm2, %v1507_v10, 0.0 }
 0x170   :  { %666 = vadd.xlane.f32.xlu1 %v665_v12  ;;  %v668_v13 = vsel %vm601_vm2, %v1509_v11, 0.0 }
 0x171   :  { %669 = vadd.xlane.f32.xlu0 %v668_v13 }
 0x172   :  { %v1511_v14 = vpop.eup %1510 }
 0x173   :  { %v671_v15 = vsel %vm601_vm2, %v1511_v14, 0.0 }
 0x174   :  { %672 = vadd.xlane.f32.xlu1 %v671_v15 }
 0x1ed   :  { %v652_v16 = vpop.xlane.xlu0 %651 }
 0x1ee   :  { %1512 = vrcp.f32 %v652_v16 }
 0x1f1   :  { %v655_v17 = vpop.xlane.xlu1 %654 }
 0x1f2   :  { %1514 = vrcp.f32 %v655_v17  ;;  %v658_v18 = vpop.xlane.xlu0 %657 }
 0x1f3   :  { %1516 = vrcp.f32 %v658_v18 }
 0x1f5   :  { %v661_v19 = vpop.xlane.xlu1 %660 }
 0x1f6   :  { %1518 = vrcp.f32 %v661_v19  ;;  %v664_v20 = vpop.xlane.xlu0 %663 }
 0x1f7   :  { %1520 = vrcp.f32 %v664_v20 }
 0x1f9   :  { %v667_v21 = vpop.xlane.xlu1 %666 }
 0x1fa   :  { %1522 = vrcp.f32 %v667_v21  ;;  %v670_v22 = vpop.xlane.xlu0 %669 }
 0x1fb   :  { %v1513_v23 = vpop.eup %1512  ;;  %1524 = vrcp.f32 %v670_v22 }
 0x1fc   :  { %v682_v24 = vmul.f32 %v1513_v23, %v1497_v56 }
 0x1fd   :  { %v673_v25 = vpop.xlane.xlu1 %672 }
 0x1fe   :  { %1526 = vrcp.f32 %v673_v25  ;;  %1457 = vmatmul.mubr.msk.f32.vlgmr.msra.gmra.mxu0 %vm601_vm2, %v682_v24 }
 0x1ff   :  { %v1515_v26 = vpop.eup %1514  ;;  %1465 = vmatpush3.msra.mxu0 %v1556_v3  ;;  %1466 = vmatprep.mubr.msk.f32.mxu0 %vm1529_vm1, %v1528_v0 }
 0x200   :  { %v1517_v27 = vpop.eup %1516  ;;  %v683_v28 = vmul.f32 %v1515_v26, %v1499_v59  ;;  %1474 = vmatprep.subr.mxu0 %v1528_v0 }
 0x201   :  { %v684_v29 = vmul.f32 %v1517_v27, %v1501_v60 }
 0x202   :  { %1462 = vmatmul.mubr.msk.f32.vlgmr.msra.gmra.mxu1 %vm601_vm2, %v683_v28 }
 0x203   :  { %v1519_v30 = vpop.eup %1518  ;;  %1467 = vmatmul.mubr.msk.f32.vlgmr.msra.gmra.mxu0 %vm601_vm2, %v684_v29  ;;  %1470 = vmatpush3.msra.mxu1 %v1564_v4 }
 0x204   :  { %v1521_v31 = vpop.eup %1520  ;;  %1471 = vmatprep.mubr.msk.f32.mxu1 %vm1529_vm1, %v1528_v0  ;;  %1475 = vmatpush3.msra.mxu0 %v1577_v5  ;;  %v685_v3 = vmul.f32 %v1519_v30, %v1503_v63 }
 0x205   :  { %1476 = vmatprep.mubr.msk.f32.mxu0 %vm1529_vm1, %v1528_v0  ;;  %v686_v32 = vmul.f32 %v1521_v31, %v1505_v1  ;;  %1479 = vmatprep.subr.mxu1 %v1528_v0 }
 0x206   :  { %1472 = vmatmul.mubr.msk.f32.vlgmr.msra.gmra.mxu1 %vm601_vm2, %v685_v3  ;;  %1484 = vmatprep.subr.mxu0 %v1528_v0 }
 0x207   :  { %v1523_v33 = vpop.eup %1522  ;;  %1477 = vmatmul.mubr.msk.f32.vlgmr.msra.gmra.mxu0 %vm601_vm2, %v686_v32  ;;  %1480 = vmatpush3.msra.mxu1 %v1585_v6 }
 0x208   :  { %v1525_v4 = vpop.eup %1524  ;;  %1481 = vmatprep.mubr.msk.f32.mxu1 %vm1529_vm1, %v1528_v0  ;;  %1485 = vmatpush3.msra.mxu0 %v1601_v7  ;;  %v687_v5 = vmul.f32 %v1523_v33, %v1507_v10 }
 0x209   :  { %1486 = vmatprep.mubr.msk.f32.mxu0 %vm1529_vm1, %v1528_v0  ;;  %v688_v34 = vmul.f32 %v1525_v4, %v1509_v11  ;;  %1489 = vmatprep.subr.mxu1 %v1528_v0 }
 0x20a   :  { %1482 = vmatmul.mubr.msk.f32.vlgmr.msra.gmra.mxu1 %vm601_vm2, %v687_v5 }
 0x20b   :  { %v1527_v35 = vpop.eup %1526  ;;  %1487 = vmatmul.mubr.msk.f32.vlgmr.msra.gmra.mxu0 %vm601_vm2, %v688_v34  ;;  %1490 = vmatpush3.msra.mxu1 %v1609_v8 }
 0x20c   :  { %1491 = vmatprep.mubr.msk.f32.mxu1 %vm1529_vm1, %v1528_v0  ;;  %v689_v6 = vmul.f32 %v1527_v35, %v1511_v14 }
 0x20e   :  { %1492 = vmatmul.mubr.msk.f32.vlgmr.msra.gmra.mxu1 %vm601_vm2, %v689_v6 }
 0x2be   :  { %v759_v7 = vpop.f32.mrf.mxu0 }
 0x2bf   :  { %v1274_v36 = vsel %vm16_vm0, %v759_v7, -inf }
 0x2c0   :  { %v1275_v37 = vrot.slane %v1274_v36, 4  ;;  %v1458_v38 = vpop.f32.mrf.mxu0 }
 0x2c2   :  { %v1276_v39 = vmax.f32 %v1274_v36, %v1275_v37  ;;  %v832_v40 = vpop.f32.mrf.mxu1 }
 0x2c3   :  { %v1281_v41 = vsel %vm16_vm0, %v832_v40, -inf  ;;  %v905_v42 = vpop.f32.mrf.mxu0 }
 0x2c4   :  { %v1277_v43 = vrot.slane %v1276_v39, 2  ;;  %v1282_v44 = vrot.slane %v1281_v41, 4  ;;  %v1288_v8 = vsel %vm16_vm0, %v905_v42, -inf  ;;  %v1463_v45 = vpop.f32.mrf.mxu1 }
 0x2c5   :  { %v1289_v46 = vrot.slane %v1288_v8, 4  ;;  %v1468_v0 = vpop.f32.mrf.mxu0 }
 0x2c6   :  { %v1278_v47 = vmax.f32 %v1276_v39, %v1277_v43  ;;  %v1283_v48 = vmax.f32 %v1281_v41, %v1282_v44  ;;  %v978_v49 = vpop.f32.mrf.mxu1 }
 0x2c7   :  { %v1290_v50 = vmax.f32 %v1288_v8, %v1289_v46  ;;  %v1295_v51 = vsel %vm16_vm0, %v978_v49, -inf  ;;  %v1051_v52 = vpop.f32.mrf.mxu0 }
 0x2c8   :  { %v1284_v53 = vrot.slane %v1283_v48, 2  ;;  %v1296_v54 = vrot.slane %v1295_v51, 4  ;;  %v1302_v55 = vsel %vm16_vm0, %v1051_v52, -inf  ;;  %v1473_v56 = vpop.f32.mrf.mxu1  ;;  %v1279_v60 = vrot.slane %v1278_v47, 1 }
 0x2c9   :  { %v1291_v57 = vrot.slane %v1290_v50, 2  ;;  %v1303_v58 = vrot.slane %v1302_v55, 4  ;;  %v1478_v59 = vpop.f32.mrf.mxu0 }
 0x2ca   :  { %v1285_v61 = vmax.f32 %v1283_v48, %v1284_v53  ;;  %v1297_v62 = vmax.f32 %v1295_v51, %v1296_v54  ;;  %v1124_v63 = vpop.f32.mrf.mxu1  ;;  %v1280_v20 = vmax.f32 %v1278_v47, %v1279_v60 }
 0x2cb   :  { %v1292_v1 = vmax.f32 %v1290_v50, %v1291_v57  ;;  %v1304_v2 = vmax.f32 %v1302_v55, %v1303_v58  ;;  %v1309_v9 = vsel %vm16_vm0, %v1124_v63, -inf  ;;  %v1197_v10 = vpop.f32.mrf.mxu0 }
 0x2cc   :  { %v1286_v11 = vrot.slane %v1285_v61, 1  ;;  %v1298_v12 = vrot.slane %v1297_v62, 2  ;;  %v1310_v13 = vrot.slane %v1309_v9, 4  ;;  %v1316_v14 = vsel %vm16_vm0, %v1197_v10, -inf  ;;  %v1483_v15 = vpop.f32.mrf.mxu1 }
 0x2cd   :  { %v1293_v16 = vrot.slane %v1292_v1, 1  ;;  %v1305_v17 = vrot.slane %v1304_v2, 2  ;;  %v1317_v18 = vrot.slane %v1316_v14, 4  ;;  %v1488_v19 = vpop.f32.mrf.mxu0 }
 0x2ce   :  { %v1287_v21 = vmax.f32 %v1285_v61, %v1286_v11  ;;  %v1299_v22 = vmax.f32 %v1297_v62, %v1298_v12  ;;  %v1311_v23 = vmax.f32 %v1309_v9, %v1310_v13  ;;  %v1270_v24 = vpop.f32.mrf.mxu1 }
 0x2cf   :  { %v1294_v25 = vmax.f32 %v1292_v1, %v1293_v16  ;;  %v1306_v26 = vmax.f32 %v1304_v2, %v1305_v17  ;;  %v1318_v27 = vmax.f32 %v1316_v14, %v1317_v18  ;;  %v1323_v28 = vsel %vm16_vm0, %v1270_v24, -inf }
 0x2d0   :  { %v1339_v29 = vsel %vm1338_vm3, %v1287_v21, %v1280_v20  ;;  %v1300_v30 = vrot.slane %v1299_v22, 1  ;;  %v1312_v31 = vrot.slane %v1311_v23, 2  ;;  %v1324_v3 = vrot.slane %v1323_v28, 4  ;;  %v1493_v32 = vpop.f32.mrf.mxu1 }
 0x2d1   :  { %v1307_v33 = vrot.slane %v1306_v26, 1  ;;  %v1319_v4 = vrot.slane %v1318_v27, 2  ;;  %v1341_v6 = vsel %vm1340_vm4, %v1294_v25, %v1339_v29 }
 0x2d2   :  { %v1301_v5 = vmax.f32 %v1299_v22, %v1300_v30  ;;  %v1313_v34 = vmax.f32 %v1311_v23, %v1312_v31  ;;  %v1325_v35 = vmax.f32 %v1323_v28, %v1324_v3 }
 0x2d3   :  { %v1308_v7 = vmax.f32 %v1306_v26, %v1307_v33  ;;  %v1320_v36 = vmax.f32 %v1318_v27, %v1319_v4 }
 0x2d4   :  { %v1343_v37 = vsel %vm1342_vm5, %v1301_v5, %v1341_v6  ;;  %v1314_v38 = vrot.slane %v1313_v34, 1  ;;  %v1326_v39 = vrot.slane %v1325_v35, 2 }
 0x2d5   :  { %v1321_v40 = vrot.slane %v1320_v36, 1  ;;  %v1345_v43 = vsel %vm1344_vm6, %v1308_v7, %v1343_v37 }
 0x2d6   :  { %v1315_v41 = vmax.f32 %v1313_v34, %v1314_v38  ;;  %v1327_v42 = vmax.f32 %v1325_v35, %v1326_v39 }
 0x2d7   :  { %v1322_v44 = vmax.f32 %v1320_v36, %v1321_v40 }
 0x2d8   :  { %v1347_v8 = vsel %vm1346_vm7, %v1315_v41, %v1345_v43  ;;  %v1328_v45 = vrot.slane %v1327_v42, 1 }
 0x2d9   :  { %v1349_v0 = vsel %vm1348_vm8, %v1322_v44, %v1347_v8 }
 0x2da   :  { %v1329_v46 = vmax.f32 %v1327_v42, %v1328_v45 }
 0x2dc   :  { %v1351_v47 = vsel %vm1350_vm9, %v1329_v46, %v1349_v0 }
 0x2dd   :  { %1353 = vst.msk [vmem:[%s1697_s1] sm:$0xff] %vm16_vm0, %v1351_v47 }

</bundles_post_ra>
